<compile_context>
chip_gen: v7x
topology: tpu7x:2x2x1
jax: 0.10.0
libtpu: 0.0.40
codegen_flags: <defaults>
</compile_context>

<pallas_src>
import jax
import jax.numpy as jnp
from jax.experimental import pallas as pl
from jax.experimental.pallas import tpu as pltpu

# Module hyperparameters (from the PyTorch spec)
INPUT = 5
HIDDEN = (100, 250, 500, 500, 250, 100)
OUTPUT = 1
DIMS = (INPUT,) + HIDDEN + (OUTPUT,)   # 5,100,250,500,500,250,100,1

_LANE = 128


def _round_up(x, m):
    return (x + m - 1) // m * m


IN_PAD = _round_up(INPUT, _LANE)     # 128
OUT_PAD = _round_up(OUTPUT, _LANE)   # 128


def _num_tensorcores_per_chip():
    """Best-effort TC-per-chip query (v7x has 2); default to 1 on any doubt."""
    try:
        kind = jax.devices()[0].device_kind.lower()
    except Exception:
        return 1
    return 2 if "v7" in kind else 1


def _mlp_kernel(x_ref,
                w1, b1, w2, b2, w3, b3, w4, b4, w5, b5, w6, b6, w7, b7,
                o_ref):
    """Fused forward: 7 MXU matmuls (bf16 in, f32 acc), f32 bias add + ReLU,
    bf16 intermediate activations, f32 lane-dense output tile."""

    def hidden_layer(h, w_ref, b_ref):
        y = jnp.dot(h.astype(w_ref.dtype), w_ref[...],
                    preferred_element_type=jnp.float32)
        y = y + b_ref[...]                           # bias add in f32
        return jnp.maximum(y, 0.0).astype(w_ref.dtype)   # ReLU f32 -> bf16 act

    h = x_ref[...]                                   # already matmul dtype
    h = hidden_layer(h, w1, b1)
    h = hidden_layer(h, w2, b2)
    h = hidden_layer(h, w3, b3)
    h = hidden_layer(h, w4, b4)
    h = hidden_layer(h, w5, b5)
    h = hidden_layer(h, w6, b6)
    y = jnp.dot(h.astype(w7.dtype), w7[...],
                preferred_element_type=jnp.float32) + b7[...]   # no ReLU
    o_ref[...] = y.astype(o_ref.dtype)               # lane-dense (bt, 128) store


def _pad_params(params, matmul_dtype):
    """Zero-pad every (W, b) to 128-multiples; W cast to matmul_dtype, b kept f32."""
    padded = []
    for w, b in params:
        fin, fout = w.shape
        fin_p, fout_p = _round_up(fin, _LANE), _round_up(fout, _LANE)
        wp = jnp.zeros((fin_p, fout_p), matmul_dtype)
        wp = wp.at[:fin, :fout].set(w.astype(matmul_dtype))
        bp = jnp.zeros((1, fout_p), jnp.float32)
        bp = bp.at[:, :fout].set(b.reshape(1, -1).astype(jnp.float32))
        padded.append((wp, bp))
    return padded


def mlp_regression_forward(x, params, *, batch_tile=1024,
                           matmul_dtype=jnp.bfloat16):
    """x: (B, INPUT) float32.  params: 7 pairs (W_i, b_i) with W_i (in, out)."""
    B, F = x.shape
    assert F == INPUT
    assert len(params) == len(DIMS) - 1

    # Small-batch clamp: don't pad a tiny batch up to the full tile.
    bt = min(batch_tile, _round_up(B, _LANE))
    n_tiles = pl.cdiv(B, bt)
    # Even grid only helps when 2 TensorCores share the "parallel" axis (v7x).
    if n_tiles > 1 and n_tiles % 2 and _num_tensorcores_per_chip() >= 2:
        n_tiles += 1
    B_pad = n_tiles * bt

    # Zero-pad batch and input features (5 -> 128) directly in the matmul dtype.
    x_pad = jnp.zeros((B_pad, IN_PAD), matmul_dtype)
    x_pad = x_pad.at[:B, :INPUT].set(x.astype(matmul_dtype))

    padded = _pad_params(params, matmul_dtype)
    flat_params = [a for wb in padded for a in wb]

    in_specs = [pl.BlockSpec((bt, IN_PAD), lambda i: (i, 0))]
    for wp, bp in padded:
        # Constant index_map: each weight/bias is VMEM-resident, DMA'd once.
        in_specs.append(pl.BlockSpec(wp.shape, lambda i: (0, 0)))
        in_specs.append(pl.BlockSpec(bp.shape, lambda i: (0, 0)))

    out_spec = pl.BlockSpec((bt, OUT_PAD), lambda i: (i, 0))

    flops = 2 * B_pad * sum(int(wp.shape[0]) * int(wp.shape[1])
                            for wp, _ in padded)
    bytes_accessed = (int(x_pad.size) * x_pad.dtype.itemsize
                      + sum(int(a.size) * a.dtype.itemsize for a in flat_params)
                      + B_pad * OUT_PAD * 4)

    out_full = pl.pallas_call(
        _mlp_kernel,
        out_shape=jax.ShapeDtypeStruct((B_pad, OUT_PAD), jnp.float32),
        grid_spec=pltpu.PrefetchScalarGridSpec(
            num_scalar_prefetch=0,
            grid=(n_tiles,),
            in_specs=in_specs,
            out_specs=out_spec,
        ),
        compiler_params=pltpu.CompilerParams(
            dimension_semantics=("parallel",),
            # 32 MiB: raises v5e's 16 MiB scoped default for the 1024-row tile,
            # and is within physical VMEM on v5e/v6e/v7x.
            vmem_limit_bytes=32 * 1024 * 1024,
        ),
        cost_estimate=pl.CostEstimate(
            flops=int(flops),
            transcendentals=0,
            bytes_accessed=int(bytes_accessed),
        ),
    )(x_pad, *flat_params)

    return out_full[:B, :OUTPUT]


def init_params(key):
    """PyTorch nn.Linear-style init: U(-1/sqrt(fan_in), 1/sqrt(fan_in))."""
    params = []
    for fan_in, fan_out in zip(DIMS[:-1], DIMS[1:]):
        key, kw, kb = jax.random.split(key, 3)
        bound = 1.0 / jnp.sqrt(float(fan_in))
        w = jax.random.uniform(kw, (fan_in, fan_out), jnp.float32, -bound, bound)
        b = jax.random.uniform(kb, (1, fan_out), jnp.float32, -bound, bound)
        params.append((w, b))
    return params


def reference_forward(x, params, matmul_dtype=jnp.float32):
    """Pure-JAX reference; matmul_dtype=jnp.bfloat16 mirrors the kernel's math."""
    h = x.astype(jnp.float32)
    n = len(params)
    for i, (w, b) in enumerate(params):
        y = jnp.dot(h.astype(matmul_dtype), w.astype(matmul_dtype),
                    preferred_element_type=jnp.float32)
        y = y + b.reshape(1, -1).astype(jnp.float32)
        h = jnp.maximum(y, 0.0) if i < n - 1 else y
    return h


if __name__ == "__main__":
    key = jax.random.PRNGKey(0)
    key, kx = jax.random.split(key)

    B = 16
    x = jax.random.normal(kx, (B, INPUT), jnp.float32)
    params = init_params(key)

    out = mlp_regression_forward(x, params)       # bt clamps to 128 for B=16
    out = jax.block_until_ready(out)
    assert out.shape == (B, OUTPUT)

    # Tight check against a reference that mirrors the kernel's bf16/f32 math.
    ref_bf16 = reference_forward(x, params, matmul_dtype=jnp.bfloat16)
    assert jnp.allclose(out, ref_bf16, atol=5e-3, rtol=5e-3), \
        "mismatch vs bf16-matmul reference"

    # Loose check against the exact f32 semantics of the original nn.Module.
    # (Weights are intentionally bf16 on the MXU; pass matmul_dtype=jnp.float32
    #  to mlp_regression_forward if strict f32 parity is required.)
    ref_f32 = reference_forward(x, params, matmul_dtype=jnp.float32)
    assert jnp.allclose(out, ref_f32, atol=5e-2, rtol=5e-2), \
        "mismatch vs f32 reference"

    print("KERNEL_OK")
</pallas_src>

<mosaic_0001>
module attributes {stable_mosaic.version = 11 : i64} {
  func.func @_mlp_kernel(%arg0: i32, %arg1: memref<128x128xbf16, #tpu.memory_space<vmem>>, %arg2: memref<128x128xbf16, #tpu.memory_space<vmem>>, %arg3: memref<1x128xf32, #tpu.memory_space<vmem>>, %arg4: memref<128x256xbf16, #tpu.memory_space<vmem>>, %arg5: memref<1x256xf32, #tpu.memory_space<vmem>>, %arg6: memref<256x512xbf16, #tpu.memory_space<vmem>>, %arg7: memref<1x512xf32, #tpu.memory_space<vmem>>, %arg8: memref<512x512xbf16, #tpu.memory_space<vmem>>, %arg9: memref<1x512xf32, #tpu.memory_space<vmem>>, %arg10: memref<512x256xbf16, #tpu.memory_space<vmem>>, %arg11: memref<1x256xf32, #tpu.memory_space<vmem>>, %arg12: memref<256x128xbf16, #tpu.memory_space<vmem>>, %arg13: memref<1x128xf32, #tpu.memory_space<vmem>>, %arg14: memref<128x128xbf16, #tpu.memory_space<vmem>>, %arg15: memref<1x128xf32, #tpu.memory_space<vmem>>, %arg16: memref<128x128xf32, #tpu.memory_space<vmem>>) attributes {dimension_semantics = [#tpu.dimension_semantics<parallel>], iteration_bounds = array<i64: 1>, scalar_prefetch = 0 : i64, scratch_operands = 0 : i64, tpu.core_type = #tpu.core_type<tc>, window_params = [{transform_indices = @transform_0, window_bounds = array<i64: 128, 128>}, {pipeline_mode = #tpu.pipeline_mode<synchronous>, transform_indices = @transform_1, window_bounds = array<i64: 128, 128>}, {pipeline_mode = #tpu.pipeline_mode<synchronous>, transform_indices = @transform_2, window_bounds = array<i64: 1, 128>}, {pipeline_mode = #tpu.pipeline_mode<synchronous>, transform_indices = @transform_3, window_bounds = array<i64: 128, 256>}, {pipeline_mode = #tpu.pipeline_mode<synchronous>, transform_indices = @transform_4, window_bounds = array<i64: 1, 256>}, {pipeline_mode = #tpu.pipeline_mode<synchronous>, transform_indices = @transform_5, window_bounds = array<i64: 256, 512>}, {pipeline_mode = #tpu.pipeline_mode<synchronous>, transform_indices = @transform_6, window_bounds = array<i64: 1, 512>}, {pipeline_mode = #tpu.pipeline_mode<synchronous>, transform_indices = @transform_7, window_bounds = array<i64: 512, 512>}, {pipeline_mode = #tpu.pipeline_mode<synchronous>, transform_indices = @transform_8, window_bounds = array<i64: 1, 512>}, {pipeline_mode = #tpu.pipeline_mode<synchronous>, transform_indices = @transform_9, window_bounds = array<i64: 512, 256>}, {pipeline_mode = #tpu.pipeline_mode<synchronous>, transform_indices = @transform_10, window_bounds = array<i64: 1, 256>}, {pipeline_mode = #tpu.pipeline_mode<synchronous>, transform_indices = @transform_11, window_bounds = array<i64: 256, 128>}, {pipeline_mode = #tpu.pipeline_mode<synchronous>, transform_indices = @transform_12, window_bounds = array<i64: 1, 128>}, {pipeline_mode = #tpu.pipeline_mode<synchronous>, transform_indices = @transform_13, window_bounds = array<i64: 128, 128>}, {pipeline_mode = #tpu.pipeline_mode<synchronous>, transform_indices = @transform_14, window_bounds = array<i64: 1, 128>}, {transform_indices = @transform_15, window_bounds = array<i64: 128, 128>}]} {
    %c0 = arith.constant 0 : index
    %c0_0 = arith.constant 0 : index
    %0 = vector.load %arg1[%c0, %c0_0] : memref<128x128xbf16, #tpu.memory_space<vmem>>, vector<128x128xbf16>
    %c0_1 = arith.constant 0 : index
    %c0_2 = arith.constant 0 : index
    %1 = vector.load %arg2[%c0_1, %c0_2] : memref<128x128xbf16, #tpu.memory_space<vmem>>, vector<128x128xbf16>
    %cst = arith.constant dense<0.000000e+00> : vector<128x128xf32>
    %2 = tpu.matmul %0, %1, %cst {dimension_numbers = #tpu.dot_dimension_numbers<[1], [0], [0], [1], [0, 0, 1, 1], [], []>} : vector<128x128xbf16>, vector<128x128xbf16>, vector<128x128xf32> -> vector<128x128xf32>
    %c0_3 = arith.constant 0 : index
    %c0_4 = arith.constant 0 : index
    %3 = vector.load %arg3[%c0_3, %c0_4] : memref<1x128xf32, #tpu.memory_space<vmem>>, vector<1x128xf32>
    %4 = vector.broadcast %3 : vector<1x128xf32> to vector<128x128xf32>
    %5 = arith.addf %2, %4 : vector<128x128xf32>
    %cst_5 = arith.constant 0.000000e+00 : f32
    %6 = vector.broadcast %cst_5 : f32 to vector<128x128xf32>
    %7 = arith.maximumf %5, %6 : vector<128x128xf32>
    %8 = arith.truncf %7 : vector<128x128xf32> to vector<128x128xbf16>
    %c0_6 = arith.constant 0 : index
    %c0_7 = arith.constant 0 : index
    %9 = vector.load %arg4[%c0_6, %c0_7] : memref<128x256xbf16, #tpu.memory_space<vmem>>, vector<128x256xbf16>
    %cst_8 = arith.constant dense<0.000000e+00> : vector<128x256xf32>
    %10 = tpu.matmul %8, %9, %cst_8 {dimension_numbers = #tpu.dot_dimension_numbers<[1], [0], [0], [1], [0, 0, 1, 1], [], []>} : vector<128x128xbf16>, vector<128x256xbf16>, vector<128x256xf32> -> vector<128x256xf32>
    %c0_9 = arith.constant 0 : index
    %c0_10 = arith.constant 0 : index
    %11 = vector.load %arg5[%c0_9, %c0_10] : memref<1x256xf32, #tpu.memory_space<vmem>>, vector<1x256xf32>
    %12 = vector.broadcast %11 : vector<1x256xf32> to vector<128x256xf32>
    %13 = arith.addf %10, %12 : vector<128x256xf32>
    %cst_11 = arith.constant 0.000000e+00 : f32
    %14 = vector.broadcast %cst_11 : f32 to vector<128x256xf32>
    %15 = arith.maximumf %13, %14 : vector<128x256xf32>
    %16 = arith.truncf %15 : vector<128x256xf32> to vector<128x256xbf16>
    %c0_12 = arith.constant 0 : index
    %c0_13 = arith.constant 0 : index
    %17 = vector.load %arg6[%c0_12, %c0_13] : memref<256x512xbf16, #tpu.memory_space<vmem>>, vector<256x512xbf16>
    %cst_14 = arith.constant dense<0.000000e+00> : vector<128x512xf32>
    %18 = tpu.matmul %16, %17, %cst_14 {dimension_numbers = #tpu.dot_dimension_numbers<[1], [0], [0], [1], [0, 0, 1, 1], [], []>} : vector<128x256xbf16>, vector<256x512xbf16>, vector<128x512xf32> -> vector<128x512xf32>
    %c0_15 = arith.constant 0 : index
    %c0_16 = arith.constant 0 : index
    %19 = vector.load %arg7[%c0_15, %c0_16] : memref<1x512xf32, #tpu.memory_space<vmem>>, vector<1x512xf32>
    %20 = vector.broadcast %19 : vector<1x512xf32> to vector<128x512xf32>
    %21 = arith.addf %18, %20 : vector<128x512xf32>
    %cst_17 = arith.constant 0.000000e+00 : f32
    %22 = vector.broadcast %cst_17 : f32 to vector<128x512xf32>
    %23 = arith.maximumf %21, %22 : vector<128x512xf32>
    %24 = arith.truncf %23 : vector<128x512xf32> to vector<128x512xbf16>
    %c0_18 = arith.constant 0 : index
    %c0_19 = arith.constant 0 : index
    %25 = vector.load %arg8[%c0_18, %c0_19] : memref<512x512xbf16, #tpu.memory_space<vmem>>, vector<512x512xbf16>
    %cst_20 = arith.constant dense<0.000000e+00> : vector<128x512xf32>
    %26 = tpu.matmul %24, %25, %cst_20 {dimension_numbers = #tpu.dot_dimension_numbers<[1], [0], [0], [1], [0, 0, 1, 1], [], []>} : vector<128x512xbf16>, vector<512x512xbf16>, vector<128x512xf32> -> vector<128x512xf32>
    %c0_21 = arith.constant 0 : index
    %c0_22 = arith.constant 0 : index
    %27 = vector.load %arg9[%c0_21, %c0_22] : memref<1x512xf32, #tpu.memory_space<vmem>>, vector<1x512xf32>
    %28 = vector.broadcast %27 : vector<1x512xf32> to vector<128x512xf32>
    %29 = arith.addf %26, %28 : vector<128x512xf32>
    %cst_23 = arith.constant 0.000000e+00 : f32
    %30 = vector.broadcast %cst_23 : f32 to vector<128x512xf32>
    %31 = arith.maximumf %29, %30 : vector<128x512xf32>
    %32 = arith.truncf %31 : vector<128x512xf32> to vector<128x512xbf16>
    %c0_24 = arith.constant 0 : index
    %c0_25 = arith.constant 0 : index
    %33 = vector.load %arg10[%c0_24, %c0_25] : memref<512x256xbf16, #tpu.memory_space<vmem>>, vector<512x256xbf16>
    %cst_26 = arith.constant dense<0.000000e+00> : vector<128x256xf32>
    %34 = tpu.matmul %32, %33, %cst_26 {dimension_numbers = #tpu.dot_dimension_numbers<[1], [0], [0], [1], [0, 0, 1, 1], [], []>} : vector<128x512xbf16>, vector<512x256xbf16>, vector<128x256xf32> -> vector<128x256xf32>
    %c0_27 = arith.constant 0 : index
    %c0_28 = arith.constant 0 : index
    %35 = vector.load %arg11[%c0_27, %c0_28] : memref<1x256xf32, #tpu.memory_space<vmem>>, vector<1x256xf32>
    %36 = vector.broadcast %35 : vector<1x256xf32> to vector<128x256xf32>
    %37 = arith.addf %34, %36 : vector<128x256xf32>
    %cst_29 = arith.constant 0.000000e+00 : f32
    %38 = vector.broadcast %cst_29 : f32 to vector<128x256xf32>
    %39 = arith.maximumf %37, %38 : vector<128x256xf32>
    %40 = arith.truncf %39 : vector<128x256xf32> to vector<128x256xbf16>
    %c0_30 = arith.constant 0 : index
    %c0_31 = arith.constant 0 : index
    %41 = vector.load %arg12[%c0_30, %c0_31] : memref<256x128xbf16, #tpu.memory_space<vmem>>, vector<256x128xbf16>
    %cst_32 = arith.constant dense<0.000000e+00> : vector<128x128xf32>
    %42 = tpu.matmul %40, %41, %cst_32 {dimension_numbers = #tpu.dot_dimension_numbers<[1], [0], [0], [1], [0, 0, 1, 1], [], []>} : vector<128x256xbf16>, vector<256x128xbf16>, vector<128x128xf32> -> vector<128x128xf32>
    %c0_33 = arith.constant 0 : index
    %c0_34 = arith.constant 0 : index
    %43 = vector.load %arg13[%c0_33, %c0_34] : memref<1x128xf32, #tpu.memory_space<vmem>>, vector<1x128xf32>
    %44 = vector.broadcast %43 : vector<1x128xf32> to vector<128x128xf32>
    %45 = arith.addf %42, %44 : vector<128x128xf32>
    %cst_35 = arith.constant 0.000000e+00 : f32
    %46 = vector.broadcast %cst_35 : f32 to vector<128x128xf32>
    %47 = arith.maximumf %45, %46 : vector<128x128xf32>
    %48 = arith.truncf %47 : vector<128x128xf32> to vector<128x128xbf16>
    %c0_36 = arith.constant 0 : index
    %c0_37 = arith.constant 0 : index
    %49 = vector.load %arg14[%c0_36, %c0_37] : memref<128x128xbf16, #tpu.memory_space<vmem>>, vector<128x128xbf16>
    %cst_38 = arith.constant dense<0.000000e+00> : vector<128x128xf32>
    %50 = tpu.matmul %48, %49, %cst_38 {dimension_numbers = #tpu.dot_dimension_numbers<[1], [0], [0], [1], [0, 0, 1, 1], [], []>} : vector<128x128xbf16>, vector<128x128xbf16>, vector<128x128xf32> -> vector<128x128xf32>
    %c0_39 = arith.constant 0 : index
    %c0_40 = arith.constant 0 : index
    %51 = vector.load %arg15[%c0_39, %c0_40] : memref<1x128xf32, #tpu.memory_space<vmem>>, vector<1x128xf32>
    %52 = vector.broadcast %51 : vector<1x128xf32> to vector<128x128xf32>
    %53 = arith.addf %50, %52 : vector<128x128xf32>
    %c0_41 = arith.constant 0 : index
    %c0_42 = arith.constant 0 : index
    %54 = vector.load %arg16[%c0_41, %c0_42] : memref<128x128xf32, #tpu.memory_space<vmem>>, vector<128x128xf32>
    tpu.vector_store %arg16[%c0_41, %c0_42], %53 {strides = array<i32>} : memref<128x128xf32, #tpu.memory_space<vmem>>, vector<128x128xf32>,
    return
  }
  func.func @transform_0(%arg0: i32) -> (i32, i32) {
    %c0_i32 = arith.constant 0 : i32
    %c0_i32_0 = arith.constant 0 : i32
    return %arg0, %c0_i32 : i32, i32
  }
  func.func @transform_1(%arg0: i32) -> (i32, i32) {
    %c0_i32 = arith.constant 0 : i32
    %c0_i32_0 = arith.constant 0 : i32
    %c0_i32_1 = arith.constant 0 : i32
    return %c0_i32, %c0_i32_0 : i32, i32
  }
  func.func @transform_2(%arg0: i32) -> (i32, i32) {
    %c0_i32 = arith.constant 0 : i32
    %c0_i32_0 = arith.constant 0 : i32
    %c0_i32_1 = arith.constant 0 : i32
    return %c0_i32, %c0_i32_0 : i32, i32
  }
  func.func @transform_3(%arg0: i32) -> (i32, i32) {
    %c0_i32 = arith.constant 0 : i32
    %c0_i32_0 = arith.constant 0 : i32
    %c0_i32_1 = arith.constant 0 : i32
    return %c0_i32, %c0_i32_0 : i32, i32
  }
  func.func @transform_4(%arg0: i32) -> (i32, i32) {
    %c0_i32 = arith.constant 0 : i32
    %c0_i32_0 = arith.constant 0 : i32
    %c0_i32_1 = arith.constant 0 : i32
    return %c0_i32, %c0_i32_0 : i32, i32
  }
  func.func @transform_5(%arg0: i32) -> (i32, i32) {
    %c0_i32 = arith.constant 0 : i32
    %c0_i32_0 = arith.constant 0 : i32
    %c0_i32_1 = arith.constant 0 : i32
    return %c0_i32, %c0_i32_0 : i32, i32
  }
  func.func @transform_6(%arg0: i32) -> (i32, i32) {
    %c0_i32 = arith.constant 0 : i32
    %c0_i32_0 = arith.constant 0 : i32
    %c0_i32_1 = arith.constant 0 : i32
    return %c0_i32, %c0_i32_0 : i32, i32
  }
  func.func @transform_7(%arg0: i32) -> (i32, i32) {
    %c0_i32 = arith.constant 0 : i32
    %c0_i32_0 = arith.constant 0 : i32
    %c0_i32_1 = arith.constant 0 : i32
    return %c0_i32, %c0_i32_0 : i32, i32
  }
  func.func @transform_8(%arg0: i32) -> (i32, i32) {
    %c0_i32 = arith.constant 0 : i32
    %c0_i32_0 = arith.constant 0 : i32
    %c0_i32_1 = arith.constant 0 : i32
    return %c0_i32, %c0_i32_0 : i32, i32
  }
  func.func @transform_9(%arg0: i32) -> (i32, i32) {
    %c0_i32 = arith.constant 0 : i32
    %c0_i32_0 = arith.constant 0 : i32
    %c0_i32_1 = arith.constant 0 : i32
    return %c0_i32, %c0_i32_0 : i32, i32
  }
  func.func @transform_10(%arg0: i32) -> (i32, i32) {
    %c0_i32 = arith.constant 0 : i32
    %c0_i32_0 = arith.constant 0 : i32
    %c0_i32_1 = arith.constant 0 : i32
    return %c0_i32, %c0_i32_0 : i32, i32
  }
  func.func @transform_11(%arg0: i32) -> (i32, i32) {
    %c0_i32 = arith.constant 0 : i32
    %c0_i32_0 = arith.constant 0 : i32
    %c0_i32_1 = arith.constant 0 : i32
    return %c0_i32, %c0_i32_0 : i32, i32
  }
  func.func @transform_12(%arg0: i32) -> (i32, i32) {
    %c0_i32 = arith.constant 0 : i32
    %c0_i32_0 = arith.constant 0 : i32
    %c0_i32_1 = arith.constant 0 : i32
    return %c0_i32, %c0_i32_0 : i32, i32
  }
  func.func @transform_13(%arg0: i32) -> (i32, i32) {
    %c0_i32 = arith.constant 0 : i32
    %c0_i32_0 = arith.constant 0 : i32
    %c0_i32_1 = arith.constant 0 : i32
    return %c0_i32, %c0_i32_0 : i32, i32
  }
  func.func @transform_14(%arg0: i32) -> (i32, i32) {
    %c0_i32 = arith.constant 0 : i32
    %c0_i32_0 = arith.constant 0 : i32
    %c0_i32_1 = arith.constant 0 : i32
    return %c0_i32, %c0_i32_0 : i32, i32
  }
  func.func @transform_15(%arg0: i32) -> (i32, i32) {
    %c0_i32 = arith.constant 0 : i32
    %c0_i32_0 = arith.constant 0 : i32
    return %arg0, %c0_i32 : i32, i32
  }
}

</mosaic_0001>

<bundles_post_ra>
// kernel: tpu_custom_call.1
= control target key start
LH: loop header
LB: loop body
LE: loop exit
PB: predicated region body
PF: predicated region fallthrough
CT: control target
= control target key end

     0   :  { %20 = vsyncpa [#allocation3], 0  ;;  %s5893_s0 = inlined_call_operand.hbm [shape: bf16[128,128], index: 0, kind: input, shape index: {}]   ;;  %s5894_s1 = inlined_call_operand.hbm [shape: bf16[128,128], index: 1, kind: input, shape index: {}]   ;;  %s5895_s2 = inlined_call_operand.vmem [shape: f32[1,128], index: 2, kind: input, shape index: {}]   ;;  %s5896_s3 = inlined_call_operand.hbm [shape: bf16[128,256], index: 3, kind: input, shape index: {}]   ;;  %s5897_s4 = inlined_call_operand.vmem [shape: f32[1,256], index: 4, kind: input, shape index: {}]   ;;  %s5898_s5 = inlined_call_operand.hbm [shape: bf16[256,512], index: 5, kind: input, shape index: {}]   ;;  %s5899_s6 = inlined_call_operand.vmem [shape: f32[1,512], index: 6, kind: input, shape index: {}]   ;;  %s5900_s7 = inlined_call_operand.hbm [shape: bf16[512,512], index: 7, kind: input, shape index: {}]   ;;  %s5901_s8 = inlined_call_operand.vmem [shape: f32[1,512], index: 8, kind: input, shape index: {}]   ;;  %s5902_s9 = inlined_call_operand.hbm [shape: bf16[512,256], index: 9, kind: input, shape index: {}]   ;;  %s5903_s10 = inlined_call_operand.vmem [shape: f32[1,256], index: 10, kind: input, shape index: {}]   ;;  %s5904_s11 = inlined_call_operand.hbm [shape: bf16[256,128], index: 11, kind: input, shape index: {}]   ;;  %s5905_s12 = inlined_call_operand.vmem [shape: f32[1,128], index: 12, kind: input, shape index: {}]   ;;  %s5906_s13 = inlined_call_operand.hbm [shape: bf16[128,128], index: 13, kind: input, shape index: {}]   ;;  %s5907_s14 = inlined_call_operand.vmem [shape: f32[1,128], index: 14, kind: input, shape index: {}]   ;;  %s5908_s15 = inlined_call_operand.hbm [shape: f32[128,128], index: 15, kind: output, shape index: {}]  }
   0x1   :  { %21 = vsyncpa [#allocation6], 0 }
   0x2   :  { %22 = vsyncpa [#allocation9], 0 }
   0x3   :  { %23 = vsyncpa [#allocation12], 0 }
   0x4   :  { %24 = vsyncpa [#allocation15], 0 }
   0x5   :  { %25 = vsyncpa [#allocation4], 0  ;;  %s5224_s18 = smov [#allocation5]   ;;  %s5225_s20 = smov [#allocation8]  }
   0x6   :  { %s43_s19 = sshll.u32 %s5224_s18, 4  ;;  %s71_s21 = sshll.u32 %s5225_s20, 4  ;;  %s44_s19 = int_to_ptr.vmem [resolvable:$true] %s43_s19  ;;  %s5320_s21 = int_to_ptr.vmem [resolvable:$true] %s71_s21 }
   0x7   :  { %s5014_s24 = scalar_lea.hbm %s5894_s1, 1024 }
   0x8   :  { %p5015_p0 = scmp.ne.s32.totalorder %s5894_s1, %s5014_s24  ;;  %p5018_p1 = scmp.lt.u32.totalorder %s5014_s24, %s5894_s1 }
   0xa   :  { %p5020_p2 = pnand %p5018_p1, %p5015_p0 }
   0xc   :  { %5023 = shalt.err (!%p5020_p2)
}
   0xd   :  { %s5024_s29 = scalar_lea.vmem %s44_s19, 1024  ;;  %p5029_p4 = scmp.lt.s32.totalorder %s44_s19, %s44_s19 }
   0xe   :  { %p5025_p3 = scmp.ne.s32.totalorder %s44_s19, %s5024_s29  ;;  %p5030_p5 = scmp.lt.s32.totalorder %s5024_s29, %s5024_s29 }
  0x10   :  { %p5031_p6 = por %p5030_p5, %p5029_p4 }
  0x12   :  { %p5032_p7 = pnand %p5031_p6, %p5025_p3 }
  0x14   :  { %5035 = shalt.err (!%p5032_p7)
}
  0x15   :  { %s5909_s30 = smov 64   ;;  %s5911_s16 = smov 4  }
  0x16   :  { %49 = dma.hbm_to_vmem [thread:$0]  %s5894_s1, 1024, %s44_s19, [#allocation6], %s5909_s30, %s5909_s30, %s5911_s16  }
  0x17   :  { %s5036_s23 = scalar_lea.hbm %s5898_s5, 8192 }
  0x18   :  { %p5037_p8 = scmp.ne.s32.totalorder %s5898_s5, %s5036_s23  ;;  %p5040_p9 = scmp.lt.u32.totalorder %s5036_s23, %s5898_s5 }
  0x1a   :  { %p5042_p10 = pnand %p5040_p9, %p5037_p8 }
  0x1c   :  { %5045 = shalt.err (!%p5042_p10)
}
  0x1d   :  { %s5046_s28 = scalar_lea.vmem %s5320_s21, 8192  ;;  %p5051_p12 = scmp.lt.s32.totalorder %s5320_s21, %s5320_s21 }
  0x1e   :  { %p5047_p11 = scmp.ne.s32.totalorder %s5320_s21, %s5046_s28  ;;  %p5052_p13 = scmp.lt.s32.totalorder %s5046_s28, %s5046_s28 }
  0x20   :  { %p5053_p0 = por %p5052_p13, %p5051_p12 }
  0x22   :  { %p5054_p1 = pnand %p5053_p0, %p5047_p11 }
  0x24   :  { %5057 = shalt.err (!%p5054_p1)
}
  0x25   :  { %s5913_s1 = smov 256   ;;  %s5914_s19 = smov 16  }
  0x26   :  { %77 = dma.hbm_to_vmem [thread:$0]  %s5898_s5, 8192, %s5320_s21, [#allocation9], %s5913_s1, %s5913_s1, %s5914_s19  }
  0x27   :  { %s5230_s18 = smov [#allocation11]   ;;  %s5231_s22 = smov [#allocation2]  }
  0x28   :  { %s99_s20 = sshll.u32 %s5230_s18, 4  ;;  %s31_s23 = sshll.u32 %s5231_s22, 4  ;;  %s100_s20 = int_to_ptr.vmem [resolvable:$true] %s99_s20  ;;  %s5357_s23 = int_to_ptr.vmem [resolvable:$true] %s31_s23 }
  0x29   :  { %s5058_s26 = scalar_lea.hbm %s5902_s9, 8192 }
  0x2a   :  { %p5059_p2 = scmp.ne.s32.totalorder %s5902_s9, %s5058_s26  ;;  %p5062_p3 = scmp.lt.u32.totalorder %s5058_s26, %s5902_s9 }
  0x2c   :  { %p5064_p4 = pnand %p5062_p3, %p5059_p2 }
  0x2e   :  { %5067 = shalt.err (!%p5064_p4)
}
  0x2f   :  { %s5068_s5 = scalar_lea.vmem %s100_s20, 8192  ;;  %p5073_p6 = scmp.lt.s32.totalorder %s100_s20, %s100_s20 }
  0x30   :  { %p5069_p5 = scmp.ne.s32.totalorder %s100_s20, %s5068_s5  ;;  %p5074_p7 = scmp.lt.s32.totalorder %s5068_s5, %s5068_s5 }
  0x32   :  { %p5075_p8 = por %p5074_p7, %p5073_p6 }
  0x34   :  { %p5076_p9 = pnand %p5075_p8, %p5069_p5 }
  0x36   :  { %5079 = shalt.err (!%p5076_p9)
}
  0x37   :  { %s5232_s21 = smov 128   ;;  %s5233_s29 = smov 8  }
  0x38   :  { %105 = dma.hbm_to_vmem [thread:$0]  %s5902_s9, 8192, %s100_s20, [#allocation12], %s5232_s21, %s5232_s21, %s5233_s29  }
  0x39   :  { %s5080_s22 = scalar_lea.hbm %s5893_s0, 1024 }
  0x3a   :  { %p5081_p10 = scmp.ne.s32.totalorder %s5893_s0, %s5080_s22  ;;  %p5084_p11 = scmp.lt.u32.totalorder %s5080_s22, %s5893_s0 }
  0x3c   :  { %p5086_p12 = pnand %p5084_p11, %p5081_p10 }
  0x3e   :  { %5089 = shalt.err (!%p5086_p12)
}
  0x3f   :  { %s5090_s28 = scalar_lea.vmem %s5357_s23, 1024  ;;  %p5095_p0 = scmp.lt.s32.totalorder %s5357_s23, %s5357_s23 }
  0x40   :  { %p5091_p13 = scmp.ne.s32.totalorder %s5357_s23, %s5090_s28  ;;  %p5096_p1 = scmp.lt.s32.totalorder %s5090_s28, %s5090_s28 }
  0x42   :  { %p5097_p2 = por %p5096_p1, %p5095_p0 }
  0x44   :  { %p5098_p3 = pnand %p5097_p2, %p5091_p13 }
  0x46   :  { %5101 = shalt.err (!%p5098_p3)
}
  0x47   :  { %s5915_s9 = smov 4   ;;  %s5916_s20 = smov 64  }
  0x48   :  { %37 = dma.hbm_to_vmem [thread:$0]  %s5893_s0, 1024, %s5357_s23, [#allocation3], %s5916_s20, %s5916_s20, %s5915_s9  }
  0x49   :  { %s5234_s18 = smov [#allocation7]   ;;  %s5235_s16 = smov [#allocation10]  }
  0x4a   :  { %s57_s30 = sshll.u32 %s5234_s18, 4  ;;  %s85_s22 = sshll.u32 %s5235_s16, 4  ;;  %s58_s30 = int_to_ptr.vmem [resolvable:$true] %s57_s30  ;;  %s5394_s22 = int_to_ptr.vmem [resolvable:$true] %s85_s22 }
  0x4b   :  { %s5102_s26 = scalar_lea.hbm %s5896_s3, 2048 }
  0x4c   :  { %p5103_p4 = scmp.ne.s32.totalorder %s5896_s3, %s5102_s26  ;;  %p5106_p5 = scmp.lt.u32.totalorder %s5102_s26, %s5896_s3 }
  0x4e   :  { %p5108_p6 = pnand %p5106_p5, %p5103_p4 }
  0x50   :  { %5111 = shalt.err (!%p5108_p6)
}
  0x51   :  { %s5112_s0 = scalar_lea.vmem %s58_s30, 2048  ;;  %p5117_p8 = scmp.lt.s32.totalorder %s58_s30, %s58_s30 }
  0x52   :  { %p5113_p7 = scmp.ne.s32.totalorder %s58_s30, %s5112_s0  ;;  %p5118_p9 = scmp.lt.s32.totalorder %s5112_s0, %s5112_s0 }
  0x54   :  { %p5119_p10 = por %p5118_p9, %p5117_p8 }
  0x56   :  { %p5120_p11 = pnand %p5119_p10, %p5113_p7 }
  0x58   :  { %5123 = shalt.err (!%p5120_p11)
}
  0x59   :  { %63 = dma.hbm_to_vmem [thread:$0]  %s5896_s3, 2048, %s58_s30, [#allocation6], %s5232_s21, %s5232_s21, %s5233_s29  }
  0x5a   :  { %s5124_s1 = scalar_lea.hbm %s5900_s7, 16384 }
  0x5b   :  { %p5125_p12 = scmp.ne.s32.totalorder %s5900_s7, %s5124_s1  ;;  %p5128_p13 = scmp.lt.u32.totalorder %s5124_s1, %s5900_s7 }
  0x5d   :  { %p5130_p0 = pnand %p5128_p13, %p5125_p12 }
  0x5f   :  { %5133 = shalt.err (!%p5130_p0)
}
  0x60   :  { %s5134_s26 = scalar_lea.vmem %s5394_s22, 16384  ;;  %p5139_p2 = scmp.lt.s32.totalorder %s5394_s22, %s5394_s22 }
  0x61   :  { %p5135_p1 = scmp.ne.s32.totalorder %s5394_s22, %s5134_s26  ;;  %p5140_p3 = scmp.lt.s32.totalorder %s5134_s26, %s5134_s26 }
  0x63   :  { %p5141_p4 = por %p5140_p3, %p5139_p2 }
  0x65   :  { %p5142_p5 = pnand %p5141_p4, %p5135_p1 }
  0x67   :  { %5145 = shalt.err (!%p5142_p5)
}
  0x68   :  { %s5917_s3 = smov 16   ;;  %s5918_s30 = smov 256  }
  0x69   :  { %91 = dma.hbm_to_vmem [thread:$0]  %s5900_s7, 16384, %s5394_s22, [#allocation9], %s5918_s30, %s5918_s30, %s5917_s3  }
  0x6a   :  { %s5236_s0 = smov [#allocation13]   ;;  %s5237_s5 = smov [#allocation14]  }
  0x6b   :  { %s113_s23 = sshll.u32 %s5236_s0, 4  ;;  %s127_s17 = sshll.u32 %s5237_s5, 4  ;;  %s114_s23 = int_to_ptr.vmem [resolvable:$true] %s113_s23  ;;  %s5431_s17 = int_to_ptr.vmem [resolvable:$true] %s127_s17 }
  0x6c   :  { %s5146_s19 = scalar_lea.hbm %s5904_s11, 2048 }
  0x6d   :  { %p5147_p6 = scmp.ne.s32.totalorder %s5904_s11, %s5146_s19  ;;  %p5150_p7 = scmp.lt.u32.totalorder %s5146_s19, %s5904_s11 }
  0x6f   :  { %p5152_p8 = pnand %p5150_p7, %p5147_p6 }
  0x71   :  { %5155 = shalt.err (!%p5152_p8)
}
  0x72   :  { %s5156_s7 = scalar_lea.vmem %s114_s23, 2048  ;;  %p5161_p10 = scmp.lt.s32.totalorder %s114_s23, %s114_s23 }
  0x73   :  { %p5157_p9 = scmp.ne.s32.totalorder %s114_s23, %s5156_s7  ;;  %p5162_p11 = scmp.lt.s32.totalorder %s5156_s7, %s5156_s7 }
  0x75   :  { %p5163_p12 = por %p5162_p11, %p5161_p10 }
  0x77   :  { %p5164_p13 = pnand %p5163_p12, %p5157_p9 }
  0x79   :  { %5167 = shalt.err (!%p5164_p13)
}
  0x7a   :  { %119 = dma.hbm_to_vmem [thread:$0]  %s5904_s11, 2048, %s114_s23, [#allocation12], %s5916_s20, %s5916_s20, %s5915_s9  }
  0x7b   :  { %s5168_s28 = scalar_lea.hbm %s5906_s13, 1024 }
  0x7c   :  { %p5169_p0 = scmp.ne.s32.totalorder %s5906_s13, %s5168_s28  ;;  %p5172_p1 = scmp.lt.u32.totalorder %s5168_s28, %s5906_s13 }
  0x7e   :  { %p5174_p2 = pnand %p5172_p1, %p5169_p0 }
  0x80   :  { %5177 = shalt.err (!%p5174_p2)
}
  0x81   :  { %s5178_s19 = scalar_lea.vmem %s5431_s17, 1024  ;;  %p5183_p4 = scmp.lt.s32.totalorder %s5431_s17, %s5431_s17 }
  0x82   :  { %p5179_p3 = scmp.ne.s32.totalorder %s5431_s17, %s5178_s19  ;;  %p5184_p5 = scmp.lt.s32.totalorder %s5178_s19, %s5178_s19 }
  0x84   :  { %p5185_p6 = por %p5184_p5, %p5183_p4 }
  0x86   :  { %p5186_p7 = pnand %p5185_p6, %p5179_p3 }
  0x88   :  { %5189 = shalt.err (!%p5186_p7)
}
  0x89   :  { %133 = dma.hbm_to_vmem [thread:$0]  %s5906_s13, 1024, %s5431_s17, [#allocation15], %s5916_s20, %s5916_s20, %s5915_s9  }
  0x8a   :  { %5212 = dma.done.wait [#allocation3], 1024  }
  0x8b   :  { %5213 = vsyncadd [#allocation3], 4294966272 }
  0x8c   :  { %5214 = dma.done.wait [#allocation6], 3072  }
  0x8d   :  { %5215 = vsyncadd [#allocation6], 4294964224 }
  0x8e   :  { %5216 = dma.done.wait [#allocation9], 24576  }
  0x8f   :  { %5217 = vsyncadd [#allocation9], 4294942720 }
  0x90   :  { %5218 = dma.done.wait [#allocation12], 10240  }
  0x91   :  { %5219 = vsyncadd [#allocation12], 4294957056 }
  0x92   :  { %5220 = dma.done.wait [#allocation15], 1024  }
  0x93   :  { %5221 = vsyncadd [#allocation15], 4294966272  ;;  %v4566_v0 = vld [vmem:[#allocation5] sm:$0xff]   ;;  %v4567_v1 = vld [vmem:[#allocation5 + $0x8] sm:$0xff]   ;;  %v5238_v32 = vmov 0  }
  0x94   :  { %4294 = vmatprep.subr.bf16.mxu0 %v4566_v0  ;;  %v4568_v2 = vld [vmem:[#allocation5 + $0x10] sm:$0xff]   ;;  %v4569_v3 = vld [vmem:[#allocation5 + $0x18] sm:$0xff]   ;;  %v4574_v4 = vld [vmem:[#allocation2] sm:$0xff]   ;;  %557 = vmatprep.mubr.bf16.mxu1 %v5238_v32 }
  0x95   :  { %4295 = vmatpush3.bf16.msra.mxu0 %v4566_v0  ;;  %4310 = vmatprep.mubr.bf16.mxu0 %v4574_v4  ;;  %v4570_v5 = vld [vmem:[#allocation5 + $0x20] sm:$0xff]   ;;  %v4571_v6 = vld [vmem:[#allocation5 + $0x28] sm:$0xff]   ;;  %v4585_v9 = vld [vmem:[#allocation7 + $0x14] ss:$8 sps:$4 sm:$0xff]  }
  0x96   :  { %4296 = vmatprep.subr.bf16.mxu0 %v4567_v1  ;;  %v4582_v7 = vld [vmem:[#allocation7 + $0x4] ss:$8 sps:$4 sm:$0xff]   ;;  %v4584_v8 = vld [vmem:[#allocation7] ss:$8 sps:$4 sm:$0xff]   ;;  %v4572_v10 = vld [vmem:[#allocation5 + $0x30] sm:$0xff]  }
  0x97   :  { %525 = vmatprep.subr.bf16.mxu1 %v4582_v7  ;;  %v4587_v11 = vld [vmem:[#allocation7 + $0x10] ss:$8 sps:$4 sm:$0xff]   ;;  %v4588_v12 = vld [vmem:[#allocation7 + $0x24] ss:$8 sps:$4 sm:$0xff]   ;;  %v4590_v14 = vld [vmem:[#allocation7 + $0x20] ss:$8 sps:$4 sm:$0xff]  }
  0x98   :  { %526 = vmatpush1.bf16.msra.mxu1 %v4584_v8  ;;  %v4573_v13 = vld [vmem:[#allocation5 + $0x38] sm:$0xff]   ;;  %v4594_v17 = vld [vmem:[#allocation7 + $0x44] ss:$8 sps:$4 sm:$0xff]   ;;  %v4576_v19 = vld [vmem:[#allocation2 + $0x10] sm:$0xff]  }
  0x99   :  { %4297 = vmatpush3.bf16.msra.mxu0 %v4567_v1  ;;  %527 = vmatprep.subr.bf16.mxu1 %v4585_v9  ;;  %v4591_v15 = vld [vmem:[#allocation7 + $0x34] ss:$8 sps:$4 sm:$0xff]   ;;  %v4593_v16 = vld [vmem:[#allocation7 + $0x30] ss:$8 sps:$4 sm:$0xff]   ;;  %v4575_v18 = vld [vmem:[#allocation2 + $0x8] sm:$0xff]  }
  0x9a   :  { %4298 = vmatprep.subr.bf16.mxu0 %v4568_v2  ;;  %v4596_v20 = vld [vmem:[#allocation7 + $0x40] ss:$8 sps:$4 sm:$0xff]   ;;  %v4597_v21 = vld [vmem:[#allocation7 + $0x54] ss:$8 sps:$4 sm:$0xff]   ;;  %v4599_v22 = vld [vmem:[#allocation7 + $0x50] ss:$8 sps:$4 sm:$0xff]  }
  0x9b   :  { %v4577_v23 = vld [vmem:[#allocation2 + $0x18] sm:$0xff]   ;;  %v4578_v24 = vld [vmem:[#allocation2 + $0x20] sm:$0xff]   ;;  %v4579_v25 = vld [vmem:[#allocation2 + $0x28] sm:$0xff]  }
  0x9c   :  { %528 = vmatpush1.bf16.msra.mxu1 %v4587_v11  ;;  %v4580_v26 = vld [vmem:[#allocation2 + $0x30] sm:$0xff]   ;;  %v4581_v27 = vld [vmem:[#allocation2 + $0x38] sm:$0xff]   ;;  %v4600_v28 = vld [vmem:[#allocation7 + $0x64] ss:$8 sps:$4 sm:$0xff]  }
  0x9d   :  { %4299 = vmatpush3.bf16.msra.mxu0 %v4568_v2  ;;  %529 = vmatprep.subr.bf16.mxu1 %v4588_v12  ;;  %v4602_v29 = vld [vmem:[#allocation7 + $0x60] ss:$8 sps:$4 sm:$0xff]   ;;  %v4603_v30 = vld [vmem:[#allocation7 + $0x74] ss:$8 sps:$4 sm:$0xff]   ;;  %v4605_v31 = vld [vmem:[#allocation7 + $0x70] ss:$8 sps:$4 sm:$0xff]  }
  0x9e   :  { %4300 = vmatprep.subr.bf16.mxu0 %v4569_v3  ;;  %v4606_v33 = vld [vmem:[#allocation8] ss:$16 sps:$4 sm:$0xff]   ;;  %v4608_v34 = vld [vmem:[#allocation8 + $0x4] ss:$16 sps:$4 sm:$0xff]   ;;  %v4611_v35 = vld [vmem:[#allocation8 + $0xc] ss:$16 sps:$4 sm:$0xff]  }
  0x9f   :  { %v4614_v36 = vld [vmem:[#allocation8 + $0x24] ss:$16 sps:$4 sm:$0xff]   ;;  %v4612_v37 = vld [vmem:[#allocation8 + $0x20] ss:$16 sps:$4 sm:$0xff]   ;;  %v4609_v12 = vld [vmem:[#allocation8 + $0x8] ss:$16 sps:$4 sm:$0xff]  }
  0xa0   :  { %530 = vmatpush1.bf16.msra.mxu1 %v4590_v14  ;;  %v4620_v38 = vld [vmem:[#allocation8 + $0x44] ss:$16 sps:$4 sm:$0xff]   ;;  %v4618_v39 = vld [vmem:[#allocation8 + $0x40] ss:$16 sps:$4 sm:$0xff]  }
  0xa1   :  { %4301 = vmatpush3.bf16.msra.mxu0 %v4569_v3  ;;  %531 = vmatprep.subr.bf16.mxu1 %v4591_v15  ;;  %v4626_v40 = vld [vmem:[#allocation8 + $0x64] ss:$16 sps:$4 sm:$0xff]   ;;  %v4624_v41 = vld [vmem:[#allocation8 + $0x60] ss:$16 sps:$4 sm:$0xff]   ;;  %v4617_v15 = vld [vmem:[#allocation8 + $0x2c] ss:$16 sps:$4 sm:$0xff]  }
  0xa2   :  { %4302 = vmatprep.subr.bf16.mxu0 %v4570_v5  ;;  %v4632_v42 = vld [vmem:[#allocation8 + $0x84] ss:$16 sps:$4 sm:$0xff]   ;;  %v4630_v43 = vld [vmem:[#allocation8 + $0x80] ss:$16 sps:$4 sm:$0xff]  }
  0xa3   :  { %v4638_v44 = vld [vmem:[#allocation8 + $0xa4] ss:$16 sps:$4 sm:$0xff]   ;;  %v4636_v45 = vld [vmem:[#allocation8 + $0xa0] ss:$16 sps:$4 sm:$0xff]  }
  0xa4   :  { %532 = vmatpush1.bf16.msra.mxu1 %v4593_v16  ;;  %v4644_v46 = vld [vmem:[#allocation8 + $0xc4] ss:$16 sps:$4 sm:$0xff]   ;;  %v4642_v47 = vld [vmem:[#allocation8 + $0xc0] ss:$16 sps:$4 sm:$0xff]  }
  0xa5   :  { %4303 = vmatpush3.bf16.msra.mxu0 %v4570_v5  ;;  %533 = vmatprep.subr.bf16.mxu1 %v4594_v17  ;;  %v4650_v48 = vld [vmem:[#allocation8 + $0xe4] ss:$16 sps:$4 sm:$0xff]   ;;  %v4648_v49 = vld [vmem:[#allocation8 + $0xe0] ss:$16 sps:$4 sm:$0xff]  }
  0xa6   :  { %4304 = vmatprep.subr.bf16.mxu0 %v4571_v6  ;;  %v4656_v50 = vld [vmem:[#allocation8 + $0x104] ss:$16 sps:$4 sm:$0xff]   ;;  %v4654_v51 = vld [vmem:[#allocation8 + $0x100] ss:$16 sps:$4 sm:$0xff]  }
  0xa7   :  { %v4662_v52 = vld [vmem:[#allocation8 + $0x124] ss:$16 sps:$4 sm:$0xff]   ;;  %v4660_v53 = vld [vmem:[#allocation8 + $0x120] ss:$16 sps:$4 sm:$0xff]  }
  0xa8   :  { %534 = vmatpush1.bf16.msra.mxu1 %v4596_v20  ;;  %v4668_v54 = vld [vmem:[#allocation8 + $0x144] ss:$16 sps:$4 sm:$0xff]   ;;  %v4666_v55 = vld [vmem:[#allocation8 + $0x140] ss:$16 sps:$4 sm:$0xff]  }
  0xa9   :  { %4305 = vmatpush3.bf16.msra.mxu0 %v4571_v6  ;;  %535 = vmatprep.subr.bf16.mxu1 %v4597_v21  ;;  %v4674_v56 = vld [vmem:[#allocation8 + $0x164] ss:$16 sps:$4 sm:$0xff]   ;;  %v4672_v57 = vld [vmem:[#allocation8 + $0x160] ss:$16 sps:$4 sm:$0xff]  }
  0xaa   :  { %4306 = vmatprep.subr.bf16.mxu0 %v4572_v10  ;;  %v4680_v58 = vld [vmem:[#allocation8 + $0x184] ss:$16 sps:$4 sm:$0xff]   ;;  %v4678_v59 = vld [vmem:[#allocation8 + $0x180] ss:$16 sps:$4 sm:$0xff]  }
  0xab   :  { %v4686_v60 = vld [vmem:[#allocation8 + $0x1a4] ss:$16 sps:$4 sm:$0xff]   ;;  %v4684_v61 = vld [vmem:[#allocation8 + $0x1a0] ss:$16 sps:$4 sm:$0xff]  }
  0xac   :  { %536 = vmatpush1.bf16.msra.mxu1 %v4599_v22  ;;  %v5472_v62 = vld [vmem:[%s5895_s2] ss:$0 sm:$0xff] }
  0xad   :  { %4307 = vmatpush3.bf16.msra.mxu0 %v4572_v10  ;;  %537 = vmatprep.subr.bf16.mxu1 %v4600_v28 }
  0xae   :  { %4308 = vmatprep.subr.bf16.mxu0 %v4573_v13 }
  0xb0   :  { %538 = vmatpush1.bf16.msra.mxu1 %v4602_v29 }
  0xb1   :  { %4309 = vmatpush3.bf16.msra.mxu0 %v4573_v13  ;;  %539 = vmatprep.subr.bf16.mxu1 %v4603_v30  ;;  %v4621_v30 = vld [vmem:[#allocation8 + $0x48] ss:$16 sps:$4 sm:$0xff]  }
  0xb2   :  { %1092 = vmatprep.subr.bf16.mxu0 %v4608_v34  ;;  %v4629_v34 = vld [vmem:[#allocation8 + $0x6c] ss:$16 sps:$4 sm:$0xff]  }
  0xb4   :  { %4311 = vmatmul.mubr.bf16.vlgmr.msra.gmra.mrb[0].mxu0 %v4575_v18  ;;  %540 = vmatpush1.bf16.msra.mxu1 %v4605_v31 }
  0xb5   :  { %4314 = vmatprep.mubr.bf16.mxu0 %v4576_v19  ;;  %1205 = vmatprep.subr.bf16.mxu1 %v4611_v35 }
  0xb6   :  { %1093 = vmatpush1.bf16.msra.mxu0 %v4606_v33 }
  0xb7   :  { %1094 = vmatprep.subr.bf16.mxu0 %v4614_v36 }
  0xba   :  { %1095 = vmatpush1.bf16.msra.mxu0 %v4612_v37 }
  0xbb   :  { %1096 = vmatprep.subr.bf16.mxu0 %v4620_v38 }
  0xbc   :  { %4315 = vmatmul.mubr.bf16.gmra.mrb[4].mxu0 %v4577_v23  ;;  %v4615_v23 = vld [vmem:[#allocation8 + $0x28] ss:$16 sps:$4 sm:$0xff]  }
  0xbd   :  { %4318 = vmatprep.mubr.bf16.mxu0 %v4578_v24 }
  0xbe   :  { %1097 = vmatpush1.bf16.msra.mxu0 %v4618_v39 }
  0xbf   :  { %1098 = vmatprep.subr.bf16.mxu0 %v4626_v40 }
  0xc2   :  { %1099 = vmatpush1.bf16.msra.mxu0 %v4624_v41 }
  0xc3   :  { %1100 = vmatprep.subr.bf16.mxu0 %v4632_v42  ;;  %v4627_v42 = vld [vmem:[#allocation8 + $0x68] ss:$16 sps:$4 sm:$0xff]  }
  0xc4   :  { %4319 = vmatmul.mubr.bf16.gmra.mrb[8].mxu0 %v4579_v25 }
  0xc5   :  { %4322 = vmatprep.mubr.bf16.mxu0 %v4580_v26  ;;  %v4623_v26 = vld [vmem:[#allocation8 + $0x4c] ss:$16 sps:$4 sm:$0xff]  }
  0xc6   :  { %1101 = vmatpush1.bf16.msra.mxu0 %v4630_v43 }
  0xc7   :  { %1102 = vmatprep.subr.bf16.mxu0 %v4638_v44 }
  0xca   :  { %1103 = vmatpush1.bf16.msra.mxu0 %v4636_v45  ;;  %v4635_v45 = vld [vmem:[#allocation8 + $0x8c] ss:$16 sps:$4 sm:$0xff]  }
  0xcb   :  { %1104 = vmatprep.subr.bf16.mxu0 %v4644_v46 }
  0xcc   :  { %4323 = vmatmul.mubr.bf16.gmra.mrb[12].mxu0 %v4581_v27 }
  0xce   :  { %1105 = vmatpush1.bf16.msra.mxu0 %v4642_v47 }
  0xcf   :  { %1106 = vmatprep.subr.bf16.mxu0 %v4650_v48 }
  0xd2   :  { %1107 = vmatpush1.bf16.msra.mxu0 %v4648_v49  ;;  %v4633_v49 = vld [vmem:[#allocation8 + $0x88] ss:$16 sps:$4 sm:$0xff]  }
  0xd3   :  { %1108 = vmatprep.subr.bf16.mxu0 %v4656_v50 }
  0xd6   :  { %1109 = vmatpush1.bf16.msra.mxu0 %v4654_v51 }
  0xd7   :  { %1110 = vmatprep.subr.bf16.mxu0 %v4662_v52  ;;  %v4641_v52 = vld [vmem:[#allocation8 + $0xac] ss:$16 sps:$4 sm:$0xff]  }
  0xda   :  { %1111 = vmatpush1.bf16.msra.mxu0 %v4660_v53 }
  0xdb   :  { %1112 = vmatprep.subr.bf16.mxu0 %v4668_v54 }
  0xde   :  { %1113 = vmatpush1.bf16.msra.mxu0 %v4666_v55 }
  0xdf   :  { %1114 = vmatprep.subr.bf16.mxu0 %v4674_v56 }
  0xe2   :  { %1115 = vmatpush1.bf16.msra.mxu0 %v4672_v57 }
  0xe3   :  { %1116 = vmatprep.subr.bf16.mxu0 %v4680_v58 }
  0xe6   :  { %1117 = vmatpush1.bf16.msra.mxu0 %v4678_v59 }
  0xe7   :  { %1118 = vmatprep.subr.bf16.mxu0 %v4686_v60  ;;  %v4639_v60 = vld [vmem:[#allocation8 + $0xa8] ss:$16 sps:$4 sm:$0xff]  }
  0xea   :  { %1119 = vmatpush1.bf16.msra.mxu0 %v4684_v61 }
 0x187   :  { %v4312_v63 = vpop.f32.mrb[0].mxu0 }
 0x188   :  { %v339_v0 = vadd.f32 %v4312_v63, %v5472_v62  ;;  %v330_v1 = vpop.f32.mrb[1].mxu0 }
 0x189   :  { %v331_v2 = vadd.f32 %v5472_v62, %v330_v1  ;;  %v4313_v3 = vpop.f32.mrb[2].mxu0 }
 0x18a   :  { %v342_v4 = vadd.f32 %v4313_v3, %v5472_v62  ;;  %v333_v5 = vpop.f32.mrb[3].mxu0  ;;  %v395_v7 = vmax.f32 %v339_v0, 0.0  ;;  %v4647_v0 = vld [vmem:[#allocation8 + $0xcc] ss:$16 sps:$4 sm:$0xff]  }
 0x18b   :  { %v334_v6 = vadd.f32 %v5472_v62, %v333_v5  ;;  %v393_v9 = vmax.f32 %v331_v2, 0.0 }
 0x18c   :  { %v396_v8 = vmax.f32 %v342_v4, 0.0  ;;  %v4645_v4 = vld [vmem:[#allocation8 + $0xc8] ss:$16 sps:$4 sm:$0xff]  }
 0x18d   :  { %v394_v10 = vmax.f32 %v334_v6, 0.0  ;;  %v4653_v6 = vld [vmem:[#allocation8 + $0xec] ss:$16 sps:$4 sm:$0xff]  }
 0x18e   :  { %v410_v11 = vpack.c.bf16 %v396_v8, %v395_v7  ;;  %v4651_v7 = vld [vmem:[#allocation8 + $0xe8] ss:$16 sps:$4 sm:$0xff]   ;;  %v4659_v8 = vld [vmem:[#allocation8 + $0x10c] ss:$16 sps:$4 sm:$0xff]  }
 0x18f   :  { %v409_v13 = vpack.c.bf16 %v394_v10, %v393_v9  ;;  %v4316_v14 = vpop.f32.mrb[4].mxu0  ;;  %v4657_v9 = vld [vmem:[#allocation8 + $0x108] ss:$16 sps:$4 sm:$0xff]  }
 0x190   :  { %v355_v16 = vadd.f32 %v4316_v14, %v5472_v62  ;;  %v346_v17 = vpop.f32.mrb[5].mxu0  ;;  %v4663_v10 = vld [vmem:[#allocation8 + $0x128] ss:$16 sps:$4 sm:$0xff]  }
 0x191   :  { %558 = vmatmul.mubr.bf16.vlgmr.msra.gmra.mrb[0].mxu1 %v409_v13  ;;  %v347_v18 = vadd.f32 %v5472_v62, %v346_v17  ;;  %v4317_v19 = vpop.f32.mrb[6].mxu0  ;;  %v4677_v13 = vld [vmem:[#allocation8 + $0x16c] ss:$16 sps:$4 sm:$0xff]   ;;  %v4675_v14 = vld [vmem:[#allocation8 + $0x168] ss:$16 sps:$4 sm:$0xff]  }
 0x192   :  { %v399_v20 = vmax.f32 %v355_v16, 0.0  ;;  %v358_v21 = vadd.f32 %v4317_v19, %v5472_v62  ;;  %v349_v22 = vpop.f32.mrb[7].mxu0  ;;  %567 = vmatprep.mubr.bf16.mxu1 %v5238_v32  ;;  %1206 = vmatpush1.bf16.msra.mxu1 %v4609_v12  ;;  %v4669_v12 = vld [vmem:[#allocation8 + $0x148] ss:$16 sps:$4 sm:$0xff]   ;;  %v4689_v17 = vld [vmem:[#allocation8 + $0x1ac] ss:$16 sps:$4 sm:$0xff]  }
 0x193   :  { %v397_v24 = vmax.f32 %v347_v18, 0.0  ;;  %v350_v25 = vadd.f32 %v5472_v62, %v349_v22  ;;  %1207 = vmatprep.subr.bf16.mxu1 %v4617_v15  ;;  %v4683_v15 = vld [vmem:[#allocation8 + $0x18c] ss:$16 sps:$4 sm:$0xff]   ;;  %v4681_v16 = vld [vmem:[#allocation8 + $0x188] ss:$16 sps:$4 sm:$0xff]  }
 0x194   :  { %v400_v27 = vmax.f32 %v358_v21, 0.0  ;;  %v4687_v18 = vld [vmem:[#allocation8 + $0x1a8] ss:$16 sps:$4 sm:$0xff]   ;;  %v4692_v19 = vld [vmem:[#allocation8 + $0x1c4] ss:$16 sps:$4 sm:$0xff]  }
 0x195   :  { %v398_v28 = vmax.f32 %v350_v25, 0.0  ;;  %v4690_v21 = vld [vmem:[#allocation8 + $0x1c0] ss:$16 sps:$4 sm:$0xff]   ;;  %v4693_v22 = vld [vmem:[#allocation8 + $0x1c8] ss:$16 sps:$4 sm:$0xff]   ;;  %1120 = vmatprep.subr.bf16.mxu0 %v4692_v19 }
 0x196   :  { %v412_v29 = vpack.c.bf16 %v400_v27, %v399_v20  ;;  %1208 = vmatpush1.bf16.msra.mxu1 %v4615_v23  ;;  %v4695_v20 = vld [vmem:[#allocation8 + $0x1cc] ss:$16 sps:$4 sm:$0xff]   ;;  %1121 = vmatpush1.bf16.msra.mxu0 %v4690_v21  ;;  %v4698_v23 = vld [vmem:[#allocation8 + $0x1e4] ss:$16 sps:$4 sm:$0xff]   ;;  %v4696_v25 = vld [vmem:[#allocation8 + $0x1e0] ss:$16 sps:$4 sm:$0xff]  }
 0x197   :  { %v411_v31 = vpack.c.bf16 %v398_v28, %v397_v24  ;;  %v4320_v33 = vpop.f32.mrb[8].mxu0  ;;  %1209 = vmatprep.subr.bf16.mxu1 %v4623_v26  ;;  %v4701_v24 = vld [vmem:[#allocation8 + $0x1ec] ss:$16 sps:$4 sm:$0xff]   ;;  %v4699_v26 = vld [vmem:[#allocation8 + $0x1e8] ss:$16 sps:$4 sm:$0xff]   ;;  %1122 = vmatprep.subr.bf16.mxu0 %v4698_v23  ;;  %v435_v28 = vlaneseq }
 0x198   :  { %v371_v35 = vadd.f32 %v4320_v33, %v5472_v62  ;;  %v362_v36 = vpop.f32.mrb[9].mxu0  ;;  %v4707_v27 = vld [vmem:[#allocation10 + $0xc] ss:$16 sps:$4 sm:$0xff]   ;;  %v4723_v21 = vld [vmem:[#allocation10 + $0x68] ss:$16 sps:$4 sm:$0xff]  }
 0x199   :  { %568 = vmatmul.mubr.bf16.gmra.mrb[4].mxu1 %v410_v11  ;;  %v363_v37 = vadd.f32 %v5472_v62, %v362_v36  ;;  %v4321_v38 = vpop.f32.mrb[10].mxu0  ;;  %v4671_v11 = vld [vmem:[#allocation8 + $0x14c] ss:$16 sps:$4 sm:$0xff]  }
 0x19a   :  { %577 = vmatprep.mubr.bf16.mxu1 %v5238_v32  ;;  %v403_v39 = vmax.f32 %v371_v35, 0.0  ;;  %v374_v40 = vadd.f32 %v4321_v38, %v5472_v62  ;;  %v365_v41 = vpop.f32.mrb[11].mxu0  ;;  %1210 = vmatpush1.bf16.msra.mxu1 %v4621_v30 }
 0x19b   :  { %v401_v43 = vmax.f32 %v363_v37, 0.0  ;;  %v366_v44 = vadd.f32 %v5472_v62, %v365_v41  ;;  %1211 = vmatprep.subr.bf16.mxu1 %v4629_v34  ;;  %1123 = vmatpush1.bf16.msra.mxu0 %v4696_v25  ;;  %v4731_v25 = vld [vmem:[#allocation10 + $0x8c] ss:$16 sps:$4 sm:$0xff]  }
 0x19c   :  { %v404_v46 = vmax.f32 %v374_v40, 0.0 }
 0x19d   :  { %v402_v47 = vmax.f32 %v366_v44, 0.0 }
 0x19e   :  { %v414_v48 = vpack.c.bf16 %v404_v46, %v403_v39  ;;  %1212 = vmatpush1.bf16.msra.mxu1 %v4627_v42 }
 0x19f   :  { %v413_v50 = vpack.c.bf16 %v402_v47, %v401_v43  ;;  %v4324_v51 = vpop.f32.mrb[12].mxu0  ;;  %1213 = vmatprep.subr.bf16.mxu1 %v4635_v45 }
 0x1a0   :  { %v387_v53 = vadd.f32 %v4324_v51, %v5472_v62  ;;  %v378_v54 = vpop.f32.mrb[13].mxu0  ;;  %v4702_v51 = vld [vmem:[#allocation10] ss:$16 sps:$4 sm:$0xff]  }
 0x1a1   :  { %578 = vmatmul.mubr.bf16.gmra.mrb[8].mxu1 %v411_v31  ;;  %v379_v55 = vadd.f32 %v5472_v62, %v378_v54  ;;  %v4325_v56 = vpop.f32.mrb[14].mxu0  ;;  %v433_v31 = vld [vmem:[%s5897_s4] sm:$0x3] }
 0x1a2   :  { %587 = vmatprep.mubr.bf16.mxu1 %v5238_v32  ;;  %v407_v57 = vmax.f32 %v387_v53, 0.0  ;;  %v390_v58 = vadd.f32 %v4325_v56, %v5472_v62  ;;  %v381_v59 = vpop.f32.mrb[15].mxu0  ;;  %1214 = vmatpush1.bf16.msra.mxu1 %v4633_v49  ;;  %v4713_v56 = vld [vmem:[#allocation10 + $0x2c] ss:$16 sps:$4 sm:$0xff]  }
 0x1a3   :  { %v405_v61 = vmax.f32 %v379_v55, 0.0  ;;  %v382_v63 = vadd.f32 %v5472_v62, %v381_v59  ;;  %1215 = vmatprep.subr.bf16.mxu1 %v4641_v52  ;;  %v4665_v62 = vld [vmem:[#allocation8 + $0x12c] ss:$16 sps:$4 sm:$0xff]   ;;  %v4705_v52 = vld [vmem:[#allocation10 + $0x8] ss:$16 sps:$4 sm:$0xff]  }
 0x1a4   :  { %v408_v1 = vmax.f32 %v390_v58, 0.0  ;;  %v4710_v55 = vld [vmem:[#allocation10 + $0x24] ss:$16 sps:$4 sm:$0xff]  }
 0x1a5   :  { %v406_v2 = vmax.f32 %v382_v63, 0.0  ;;  %v4708_v63 = vld [vmem:[#allocation10 + $0x20] ss:$16 sps:$4 sm:$0xff]  }
 0x1a6   :  { %v416_v3 = vpack.c.bf16 %v408_v1, %v407_v57  ;;  %1216 = vmatpush1.bf16.msra.mxu1 %v4639_v60 }
 0x1a7   :  { %v415_v5 = vpack.c.bf16 %v406_v2, %v405_v61  ;;  %1217 = vmatprep.subr.bf16.mxu1 %v4647_v0  ;;  %v4711_v0 = vld [vmem:[#allocation10 + $0x28] ss:$16 sps:$4 sm:$0xff]  }
 0x1a9   :  { %588 = vmatmul.mubr.bf16.gmra.mrb[12].mxu1 %v412_v29  ;;  %v5497_v29 = vshrl.u32 %v435_v28, 7 }
 0x1aa   :  { %597 = vmatprep.mubr.bf16.mxu1 %v5238_v32  ;;  %1218 = vmatpush1.bf16.msra.mxu1 %v4645_v4  ;;  %v4719_v4 = vld [vmem:[#allocation10 + $0x4c] ss:$16 sps:$4 sm:$0xff]  }
 0x1ab   :  { %1219 = vmatprep.subr.bf16.mxu1 %v4653_v6  ;;  %v5500_v30 = vsub.s32 0, %v5497_v29  ;;  %v5506_v33 = vsub.s32 1, %v5497_v29 }
 0x1ad   :  { %v5509_v34 = vrot.slane %v433_v31, %v5500_v30  ;;  %v5512_v35 = vrot.slane %v433_v31, %v5506_v33 }
 0x1ae   :  { %1220 = vmatpush1.bf16.msra.mxu1 %v4651_v7 }
 0x1af   :  { %1221 = vmatprep.subr.bf16.mxu1 %v4659_v8 }
 0x1b1   :  { %598 = vmatmul.mubr.bf16.gmra.mrb[16].mxu1 %v413_v50 }
 0x1b2   :  { %607 = vmatprep.mubr.bf16.mxu1 %v5238_v32  ;;  %1222 = vmatpush1.bf16.msra.mxu1 %v4657_v9 }
 0x1b3   :  { %1223 = vmatprep.subr.bf16.mxu1 %v4665_v62  ;;  %v4714_v62 = vld [vmem:[#allocation10 + $0x40] ss:$16 sps:$4 sm:$0xff]  }
 0x1b6   :  { %1224 = vmatpush1.bf16.msra.mxu1 %v4663_v10  ;;  %v4717_v10 = vld [vmem:[#allocation10 + $0x48] ss:$16 sps:$4 sm:$0xff]  }
 0x1b7   :  { %1225 = vmatprep.subr.bf16.mxu1 %v4671_v11 }
 0x1b9   :  { %608 = vmatmul.mubr.bf16.gmra.mrb[20].mxu1 %v414_v48 }
 0x1ba   :  { %617 = vmatprep.mubr.bf16.mxu1 %v5238_v32  ;;  %1226 = vmatpush1.bf16.msra.mxu1 %v4669_v12 }
 0x1bb   :  { %1227 = vmatprep.subr.bf16.mxu1 %v4677_v13  ;;  %v4722_v13 = vld [vmem:[#allocation10 + $0x64] ss:$16 sps:$4 sm:$0xff]  }
 0x1be   :  { %1228 = vmatpush1.bf16.msra.mxu1 %v4675_v14  ;;  %v4725_v14 = vld [vmem:[#allocation10 + $0x6c] ss:$16 sps:$4 sm:$0xff]  }
 0x1bf   :  { %1229 = vmatprep.subr.bf16.mxu1 %v4683_v15 }
 0x1c1   :  { %618 = vmatmul.mubr.bf16.gmra.mrb[24].mxu1 %v415_v5 }
 0x1c2   :  { %627 = vmatprep.mubr.bf16.mxu1 %v5238_v32  ;;  %1230 = vmatpush1.bf16.msra.mxu1 %v4681_v16  ;;  %v4704_v32 = vld [vmem:[#allocation10 + $0x4] ss:$16 sps:$4 sm:$0xff]  }
 0x1c3   :  { %1231 = vmatprep.subr.bf16.mxu1 %v4689_v17  ;;  %2204 = vmatprep.subr.bf16.mxu0 %v4704_v32 }
 0x1c6   :  { %1232 = vmatpush1.bf16.msra.mxu1 %v4687_v18 }
 0x1c7   :  { %1233 = vmatprep.subr.bf16.mxu1 %v4695_v20  ;;  %v4720_v20 = vld [vmem:[#allocation10 + $0x60] ss:$16 sps:$4 sm:$0xff]  }
 0x1c9   :  { %628 = vmatmul.mubr.bf16.gmra.mrb[28].mxu1 %v416_v3  ;;  %v4716_v3 = vld [vmem:[#allocation10 + $0x44] ss:$16 sps:$4 sm:$0xff]  }
 0x1ca   :  { %1234 = vmatpush1.bf16.msra.mxu1 %v4693_v22 }
 0x1cb   :  { %1235 = vmatprep.subr.bf16.mxu1 %v4701_v24  ;;  %v4728_v24 = vld [vmem:[#allocation10 + $0x84] ss:$16 sps:$4 sm:$0xff]  }
 0x1ce   :  { %1236 = vmatpush1.bf16.msra.mxu1 %v4699_v26 }
 0x1cf   :  { %2430 = vmatprep.subr.bf16.mxu1 %v4707_v27 }
 0x264   :  { %v559_v36 = vpop.f32.mrb[0].mxu1 }
 0x265   :  { %v560_v37 = vadd.f32 %v559_v36, %v5509_v34  ;;  %v561_v38 = vpop.f32.mrb[1].mxu1  ;;  %v4726_v36 = vld [vmem:[#allocation10 + $0x80] ss:$16 sps:$4 sm:$0xff]  }
 0x266   :  { %v562_v39 = vadd.f32 %v561_v38, %v5512_v35  ;;  %v563_v40 = vpop.f32.mrb[2].mxu1 }
 0x267   :  { %v564_v41 = vadd.f32 %v563_v40, %v5509_v34  ;;  %v565_v42 = vpop.f32.mrb[3].mxu1  ;;  %v638_v44 = vmax.f32 %v560_v37, 0.0  ;;  %v4729_v37 = vld [vmem:[#allocation10 + $0x88] ss:$16 sps:$4 sm:$0xff]   ;;  %v4734_v40 = vld [vmem:[#allocation10 + $0xa4] ss:$16 sps:$4 sm:$0xff]  }
 0x268   :  { %v566_v43 = vadd.f32 %v565_v42, %v5512_v35  ;;  %v639_v46 = vmax.f32 %v562_v39, 0.0 }
 0x269   :  { %v640_v45 = vmax.f32 %v564_v41, 0.0  ;;  %v4737_v41 = vld [vmem:[#allocation10 + $0xac] ss:$16 sps:$4 sm:$0xff]  }
 0x26a   :  { %v641_v47 = vmax.f32 %v566_v43, 0.0 }
 0x26b   :  { %v670_v48 = vpack.c.bf16 %v640_v45, %v638_v44 }
 0x26c   :  { %v671_v49 = vpack.c.bf16 %v641_v47, %v639_v46  ;;  %v569_v50 = vpop.f32.mrb[4].mxu1  ;;  %v4732_v47 = vld [vmem:[#allocation10 + $0xa0] ss:$16 sps:$4 sm:$0xff]  }
 0x26d   :  { %v570_v53 = vadd.f32 %v569_v50, %v5509_v34  ;;  %v571_v54 = vpop.f32.mrb[5].mxu1 }
 0x26e   :  { %v572_v57 = vadd.f32 %v571_v54, %v5512_v35  ;;  %v573_v58 = vpop.f32.mrb[6].mxu1  ;;  %1124 = vmatprep.mubr.bf16.mxu0 %v671_v49  ;;  %1237 = vmatprep.mubr.bf16.mxu1 %v671_v49 }
 0x26f   :  { %v574_v59 = vadd.f32 %v573_v58, %v5509_v34  ;;  %v575_v60 = vpop.f32.mrb[7].mxu1  ;;  %1125 = vmatmul.mubr.bf16.vlgmr.msra.gmra.mrb[16].mxu0 %v670_v48  ;;  %1238 = vmatmul.mubr.bf16.vlgmr.msra.gmra.mrb[32].mxu1 %v670_v48  ;;  %v642_v1 = vmax.f32 %v570_v53, 0.0  ;;  %v4735_v48 = vld [vmem:[#allocation10 + $0xa8] ss:$16 sps:$4 sm:$0xff]   ;;  %v4738_v58 = vld [vmem:[#allocation10 + $0xc0] ss:$16 sps:$4 sm:$0xff]  }
 0x270   :  { %v576_v61 = vadd.f32 %v575_v60, %v5512_v35  ;;  %2205 = vmatpush1.bf16.msra.mxu0 %v4702_v51  ;;  %2431 = vmatpush1.bf16.msra.mxu1 %v4705_v52  ;;  %v643_v5 = vmax.f32 %v572_v57, 0.0  ;;  %v4740_v51 = vld [vmem:[#allocation10 + $0xc4] ss:$16 sps:$4 sm:$0xff]   ;;  %v4743_v52 = vld [vmem:[#allocation10 + $0xcc] ss:$16 sps:$4 sm:$0xff]  }
 0x271   :  { %v644_v2 = vmax.f32 %v574_v59, 0.0  ;;  %2206 = vmatprep.subr.bf16.mxu0 %v4710_v55  ;;  %2432 = vmatprep.subr.bf16.mxu1 %v4713_v56  ;;  %v4741_v59 = vld [vmem:[#allocation10 + $0xc8] ss:$16 sps:$4 sm:$0xff]  }
 0x272   :  { %v645_v6 = vmax.f32 %v576_v61, 0.0 }
 0x273   :  { %v672_v7 = vpack.c.bf16 %v644_v2, %v642_v1 }
 0x274   :  { %v673_v8 = vpack.c.bf16 %v645_v6, %v643_v5  ;;  %v579_v9 = vpop.f32.mrb[8].mxu1  ;;  %2207 = vmatpush1.bf16.msra.mxu0 %v4708_v63  ;;  %2433 = vmatpush1.bf16.msra.mxu1 %v4711_v0  ;;  %v4746_v63 = vld [vmem:[#allocation10 + $0xe4] ss:$16 sps:$4 sm:$0xff]   ;;  %v4749_v0 = vld [vmem:[#allocation10 + $0xec] ss:$16 sps:$4 sm:$0xff]  }
 0x275   :  { %v580_v11 = vadd.f32 %v579_v9, %v5509_v34  ;;  %v581_v12 = vpop.f32.mrb[9].mxu1  ;;  %2208 = vmatprep.subr.bf16.mxu0 %v4716_v3  ;;  %2434 = vmatprep.subr.bf16.mxu1 %v4719_v4  ;;  %v4744_v6 = vld [vmem:[#allocation10 + $0xe0] ss:$16 sps:$4 sm:$0xff]  }
 0x276   :  { %v582_v15 = vadd.f32 %v581_v12, %v5512_v35  ;;  %v583_v16 = vpop.f32.mrb[10].mxu1  ;;  %1134 = vmatprep.mubr.bf16.mxu0 %v673_v8  ;;  %1247 = vmatprep.mubr.bf16.mxu1 %v673_v8 }
 0x277   :  { %v584_v17 = vadd.f32 %v583_v16, %v5509_v34  ;;  %v585_v18 = vpop.f32.mrb[11].mxu1  ;;  %1135 = vmatmul.mubr.bf16.gmra.mrb[20].mxu0 %v672_v7  ;;  %1248 = vmatmul.mubr.bf16.gmra.mrb[36].mxu1 %v672_v7  ;;  %v646_v22 = vmax.f32 %v580_v11, 0.0  ;;  %v4747_v7 = vld [vmem:[#allocation10 + $0xe8] ss:$16 sps:$4 sm:$0xff]   ;;  %v4750_v16 = vld [vmem:[#allocation10 + $0x100] ss:$16 sps:$4 sm:$0xff]  }
 0x278   :  { %v586_v19 = vadd.f32 %v585_v18, %v5512_v35  ;;  %2209 = vmatpush1.bf16.msra.mxu0 %v4714_v62  ;;  %2435 = vmatpush1.bf16.msra.mxu1 %v4717_v10  ;;  %v647_v26 = vmax.f32 %v582_v15, 0.0  ;;  %v4752_v62 = vld [vmem:[#allocation10 + $0x104] ss:$16 sps:$4 sm:$0xff]   ;;  %v4755_v10 = vld [vmem:[#allocation10 + $0x10c] ss:$16 sps:$4 sm:$0xff]  }
 0x279   :  { %v648_v23 = vmax.f32 %v584_v17, 0.0  ;;  %2210 = vmatprep.subr.bf16.mxu0 %v4722_v13  ;;  %2436 = vmatprep.subr.bf16.mxu1 %v4725_v14  ;;  %v4753_v17 = vld [vmem:[#allocation10 + $0x108] ss:$16 sps:$4 sm:$0xff]  }
 0x27a   :  { %v649_v32 = vmax.f32 %v586_v19, 0.0 }
 0x27b   :  { %v674_v27 = vpack.c.bf16 %v648_v23, %v646_v22 }
 0x27c   :  { %v675_v28 = vpack.c.bf16 %v649_v32, %v647_v26  ;;  %v589_v31 = vpop.f32.mrb[12].mxu1  ;;  %2211 = vmatpush1.bf16.msra.mxu0 %v4720_v20  ;;  %2437 = vmatpush1.bf16.msra.mxu1 %v4723_v21  ;;  %v4758_v20 = vld [vmem:[#allocation10 + $0x124] ss:$16 sps:$4 sm:$0xff]   ;;  %v4761_v21 = vld [vmem:[#allocation10 + $0x12c] ss:$16 sps:$4 sm:$0xff]  }
 0x27d   :  { %v590_v38 = vadd.f32 %v589_v31, %v5509_v34  ;;  %v591_v39 = vpop.f32.mrb[13].mxu1  ;;  %2212 = vmatprep.subr.bf16.mxu0 %v4728_v24  ;;  %2438 = vmatprep.subr.bf16.mxu1 %v4731_v25  ;;  %v4756_v32 = vld [vmem:[#allocation10 + $0x120] ss:$16 sps:$4 sm:$0xff]  }
 0x27e   :  { %v592_v42 = vadd.f32 %v591_v39, %v5512_v35  ;;  %v593_v43 = vpop.f32.mrb[14].mxu1  ;;  %1144 = vmatprep.mubr.bf16.mxu0 %v675_v28  ;;  %1257 = vmatprep.mubr.bf16.mxu1 %v675_v28 }
 0x27f   :  { %v594_v44 = vadd.f32 %v593_v43, %v5509_v34  ;;  %v595_v45 = vpop.f32.mrb[15].mxu1  ;;  %1145 = vmatmul.mubr.bf16.gmra.mrb[24].mxu0 %v674_v27  ;;  %1258 = vmatmul.mubr.bf16.gmra.mrb[40].mxu1 %v674_v27  ;;  %v650_v49 = vmax.f32 %v590_v38, 0.0  ;;  %v4759_v27 = vld [vmem:[#allocation10 + $0x128] ss:$16 sps:$4 sm:$0xff]   ;;  %v4762_v43 = vld [vmem:[#allocation10 + $0x140] ss:$16 sps:$4 sm:$0xff]  }
 0x280   :  { %v596_v46 = vadd.f32 %v595_v45, %v5512_v35  ;;  %2213 = vmatpush1.bf16.msra.mxu0 %v4726_v36  ;;  %2439 = vmatpush1.bf16.msra.mxu1 %v4729_v37  ;;  %v651_v53 = vmax.f32 %v592_v42, 0.0  ;;  %v4764_v36 = vld [vmem:[#allocation10 + $0x144] ss:$16 sps:$4 sm:$0xff]   ;;  %v4767_v37 = vld [vmem:[#allocation10 + $0x14c] ss:$16 sps:$4 sm:$0xff]  }
 0x281   :  { %v652_v50 = vmax.f32 %v594_v44, 0.0  ;;  %2214 = vmatprep.subr.bf16.mxu0 %v4734_v40  ;;  %2440 = vmatprep.subr.bf16.mxu1 %v4737_v41  ;;  %v4765_v44 = vld [vmem:[#allocation10 + $0x148] ss:$16 sps:$4 sm:$0xff]  }
 0x282   :  { %v653_v54 = vmax.f32 %v596_v46, 0.0 }
 0x283   :  { %v676_v55 = vpack.c.bf16 %v652_v50, %v650_v49 }
 0x284   :  { %v677_v56 = vpack.c.bf16 %v653_v54, %v651_v53  ;;  %v599_v57 = vpop.f32.mrb[16].mxu1  ;;  %2215 = vmatpush1.bf16.msra.mxu0 %v4732_v47  ;;  %2441 = vmatpush1.bf16.msra.mxu1 %v4735_v48  ;;  %v4770_v47 = vld [vmem:[#allocation10 + $0x164] ss:$16 sps:$4 sm:$0xff]   ;;  %v4773_v48 = vld [vmem:[#allocation10 + $0x16c] ss:$16 sps:$4 sm:$0xff]  }
 0x285   :  { %v600_v60 = vadd.f32 %v599_v57, %v5509_v34  ;;  %v601_v61 = vpop.f32.mrb[17].mxu1  ;;  %2216 = vmatprep.subr.bf16.mxu0 %v4740_v51  ;;  %2442 = vmatprep.subr.bf16.mxu1 %v4743_v52  ;;  %v4768_v54 = vld [vmem:[#allocation10 + $0x160] ss:$16 sps:$4 sm:$0xff]  }
 0x286   :  { %v602_v1 = vadd.f32 %v601_v61, %v5512_v35  ;;  %v603_v2 = vpop.f32.mrb[18].mxu1  ;;  %1154 = vmatprep.mubr.bf16.mxu0 %v677_v56  ;;  %1267 = vmatprep.mubr.bf16.mxu1 %v677_v56 }
 0x287   :  { %v604_v3 = vadd.f32 %v603_v2, %v5509_v34  ;;  %v605_v4 = vpop.f32.mrb[19].mxu1  ;;  %1155 = vmatmul.mubr.bf16.gmra.mrb[28].mxu0 %v676_v55  ;;  %1268 = vmatmul.mubr.bf16.gmra.mrb[44].mxu1 %v676_v55  ;;  %v654_v8 = vmax.f32 %v600_v60, 0.0  ;;  %v4771_v55 = vld [vmem:[#allocation10 + $0x168] ss:$16 sps:$4 sm:$0xff]   ;;  %v4774_v2 = vld [vmem:[#allocation10 + $0x180] ss:$16 sps:$4 sm:$0xff]  }
 0x288   :  { %v606_v5 = vadd.f32 %v605_v4, %v5512_v35  ;;  %2217 = vmatpush1.bf16.msra.mxu0 %v4738_v58  ;;  %2443 = vmatpush1.bf16.msra.mxu1 %v4741_v59  ;;  %v655_v11 = vmax.f32 %v602_v1, 0.0  ;;  %v4776_v58 = vld [vmem:[#allocation10 + $0x184] ss:$16 sps:$4 sm:$0xff]   ;;  %v4779_v59 = vld [vmem:[#allocation10 + $0x18c] ss:$16 sps:$4 sm:$0xff]  }
 0x289   :  { %v656_v9 = vmax.f32 %v604_v3, 0.0  ;;  %2218 = vmatprep.subr.bf16.mxu0 %v4746_v63  ;;  %2444 = vmatprep.subr.bf16.mxu1 %v4749_v0  ;;  %v4777_v3 = vld [vmem:[#allocation10 + $0x188] ss:$16 sps:$4 sm:$0xff]  }
 0x28a   :  { %v657_v12 = vmax.f32 %v606_v5, 0.0 }
 0x28b   :  { %v678_v13 = vpack.c.bf16 %v656_v9, %v654_v8 }
 0x28c   :  { %v679_v14 = vpack.c.bf16 %v657_v12, %v655_v11  ;;  %v609_v15 = vpop.f32.mrb[20].mxu1  ;;  %2219 = vmatpush1.bf16.msra.mxu0 %v4744_v6  ;;  %2445 = vmatpush1.bf16.msra.mxu1 %v4747_v7  ;;  %v4782_v6 = vld [vmem:[#allocation10 + $0x1a4] ss:$16 sps:$4 sm:$0xff]   ;;  %v4785_v7 = vld [vmem:[#allocation10 + $0x1ac] ss:$16 sps:$4 sm:$0xff]  }
 0x28d   :  { %v610_v18 = vadd.f32 %v609_v15, %v5509_v34  ;;  %v611_v19 = vpop.f32.mrb[21].mxu1  ;;  %2220 = vmatprep.subr.bf16.mxu0 %v4752_v62  ;;  %2446 = vmatprep.subr.bf16.mxu1 %v4755_v10  ;;  %v4780_v12 = vld [vmem:[#allocation10 + $0x1a0] ss:$16 sps:$4 sm:$0xff]  }
 0x28e   :  { %v612_v22 = vadd.f32 %v611_v19, %v5512_v35  ;;  %v613_v23 = vpop.f32.mrb[22].mxu1  ;;  %1164 = vmatprep.mubr.bf16.mxu0 %v679_v14  ;;  %1277 = vmatprep.mubr.bf16.mxu1 %v679_v14 }
 0x28f   :  { %v614_v24 = vadd.f32 %v613_v23, %v5509_v34  ;;  %v615_v25 = vpop.f32.mrb[23].mxu1  ;;  %1165 = vmatmul.mubr.bf16.gmra.mrb[32].mxu0 %v678_v13  ;;  %1278 = vmatmul.mubr.bf16.gmra.mrb[48].mxu1 %v678_v13  ;;  %v658_v28 = vmax.f32 %v610_v18, 0.0  ;;  %v4783_v13 = vld [vmem:[#allocation10 + $0x1a8] ss:$16 sps:$4 sm:$0xff]   ;;  %v4797_v23 = vld [vmem:[#allocation10 + $0x1ec] ss:$16 sps:$4 sm:$0xff]  }
 0x290   :  { %v616_v26 = vadd.f32 %v615_v25, %v5512_v35  ;;  %2221 = vmatpush1.bf16.msra.mxu0 %v4750_v16  ;;  %2447 = vmatpush1.bf16.msra.mxu1 %v4753_v17  ;;  %v659_v38 = vmax.f32 %v612_v22, 0.0  ;;  %v4794_v22 = vld [vmem:[#allocation10 + $0x1e4] ss:$16 sps:$4 sm:$0xff]   ;;  %v4795_v25 = vld [vmem:[#allocation10 + $0x1e8] ss:$16 sps:$4 sm:$0xff]  }
 0x291   :  { %v660_v31 = vmax.f32 %v614_v24, 0.0  ;;  %2222 = vmatprep.subr.bf16.mxu0 %v4758_v20  ;;  %2448 = vmatprep.subr.bf16.mxu1 %v4761_v21  ;;  %v4786_v20 = vld [vmem:[#allocation10 + $0x1c0] ss:$16 sps:$4 sm:$0xff]   ;;  %v4789_v21 = vld [vmem:[#allocation10 + $0x1c8] ss:$16 sps:$4 sm:$0xff]  }
 0x292   :  { %v661_v39 = vmax.f32 %v616_v26, 0.0  ;;  %v4792_v24 = vld [vmem:[#allocation10 + $0x1e0] ss:$16 sps:$4 sm:$0xff]   ;;  %v4800_v26 = vld [vmem:[#allocation10 + $0x204] ss:$16 sps:$4 sm:$0xff]  }
 0x293   :  { %v680_v40 = vpack.c.bf16 %v660_v31, %v658_v28  ;;  %v750_v28 = vld [vmem:[%s5899_s6] sm:$0xf]  ;;  %v766_v31 = vsub.s32 3, %v5497_v29 }
 0x294   :  { %v681_v41 = vpack.c.bf16 %v661_v39, %v659_v38  ;;  %v619_v42 = vpop.f32.mrb[24].mxu1  ;;  %2223 = vmatpush1.bf16.msra.mxu0 %v4756_v32  ;;  %2449 = vmatpush1.bf16.msra.mxu1 %v4759_v27  ;;  %v4803_v32 = vld [vmem:[#allocation10 + $0x20c] ss:$16 sps:$4 sm:$0xff]   ;;  %v762_v27 = vsub.s32 2, %v5497_v29  ;;  %v5559_v38 = vrot.slane %v750_v28, %v5506_v33  ;;  %v4990_v29 = vld [vmem:[#allocation13 + $0x40] sm:$0xff]  }
 0x295   :  { %v620_v45 = vadd.f32 %v619_v42, %v5509_v34  ;;  %v621_v46 = vpop.f32.mrb[25].mxu1  ;;  %2224 = vmatprep.subr.bf16.mxu0 %v4764_v36  ;;  %2450 = vmatprep.subr.bf16.mxu1 %v4767_v37  ;;  %v5552_v36 = vrot.slane %v750_v28, %v5500_v30  ;;  %v5563_v39 = vrot.slane %v750_v28, %v766_v31 }
 0x296   :  { %v622_v49 = vadd.f32 %v621_v46, %v5512_v35  ;;  %v623_v50 = vpop.f32.mrb[26].mxu1  ;;  %1174 = vmatprep.mubr.bf16.mxu0 %v681_v41  ;;  %1287 = vmatprep.mubr.bf16.mxu1 %v681_v41  ;;  %v5556_v37 = vrot.slane %v750_v28, %v762_v27 }
 0x297   :  { %v624_v51 = vadd.f32 %v623_v50, %v5509_v34  ;;  %v625_v52 = vpop.f32.mrb[27].mxu1  ;;  %1175 = vmatmul.mubr.bf16.gmra.mrb[36].mxu0 %v680_v40  ;;  %1288 = vmatmul.mubr.bf16.gmra.mrb[52].mxu1 %v680_v40  ;;  %v662_v56 = vmax.f32 %v620_v45, 0.0 }
 0x298   :  { %v626_v53 = vadd.f32 %v625_v52, %v5512_v35  ;;  %2225 = vmatpush1.bf16.msra.mxu0 %v4762_v43  ;;  %2451 = vmatpush1.bf16.msra.mxu1 %v4765_v44  ;;  %v663_v60 = vmax.f32 %v622_v49, 0.0 }
 0x299   :  { %v664_v57 = vmax.f32 %v624_v51, 0.0  ;;  %2226 = vmatprep.subr.bf16.mxu0 %v4770_v47  ;;  %2452 = vmatprep.subr.bf16.mxu1 %v4773_v48 }
 0x29a   :  { %v665_v61 = vmax.f32 %v626_v53, 0.0 }
 0x29b   :  { %v682_v63 = vpack.c.bf16 %v664_v57, %v662_v56 }
 0x29c   :  { %v683_v0 = vpack.c.bf16 %v665_v61, %v663_v60  ;;  %v629_v1 = vpop.f32.mrb[28].mxu1  ;;  %2227 = vmatpush1.bf16.msra.mxu0 %v4768_v54  ;;  %2453 = vmatpush1.bf16.msra.mxu1 %v4771_v55 }
 0x29d   :  { %v630_v4 = vadd.f32 %v629_v1, %v5509_v34  ;;  %v631_v5 = vpop.f32.mrb[29].mxu1  ;;  %2228 = vmatprep.subr.bf16.mxu0 %v4776_v58  ;;  %2454 = vmatprep.subr.bf16.mxu1 %v4779_v59 }
 0x29e   :  { %v632_v8 = vadd.f32 %v631_v5, %v5512_v35  ;;  %v633_v9 = vpop.f32.mrb[30].mxu1  ;;  %1184 = vmatprep.mubr.bf16.mxu0 %v683_v0  ;;  %1297 = vmatprep.mubr.bf16.mxu1 %v683_v0 }
 0x29f   :  { %v634_v62 = vadd.f32 %v633_v9, %v5509_v34  ;;  %v635_v10 = vpop.f32.mrb[31].mxu1  ;;  %1185 = vmatmul.mubr.bf16.gmra.mrb[40].mxu0 %v682_v63  ;;  %1298 = vmatmul.mubr.bf16.gmra.mrb[56].mxu1 %v682_v63  ;;  %v666_v14 = vmax.f32 %v630_v4, 0.0  ;;  %v4788_v34 = vld [vmem:[#allocation10 + $0x1c4] ss:$16 sps:$4 sm:$0xff]  }
 0x2a0   :  { %v636_v11 = vadd.f32 %v635_v10, %v5512_v35  ;;  %2229 = vmatpush1.bf16.msra.mxu0 %v4774_v2  ;;  %2455 = vmatpush1.bf16.msra.mxu1 %v4777_v3  ;;  %v667_v16 = vmax.f32 %v632_v8, 0.0  ;;  %v4791_v35 = vld [vmem:[#allocation10 + $0x1cc] ss:$16 sps:$4 sm:$0xff]   ;;  %v4801_v8 = vld [vmem:[#allocation10 + $0x208] ss:$16 sps:$4 sm:$0xff]  }
 0x2a1   :  { %v668_v15 = vmax.f32 %v634_v62, 0.0  ;;  %2230 = vmatprep.subr.bf16.mxu0 %v4782_v6  ;;  %2456 = vmatprep.subr.bf16.mxu1 %v4785_v7  ;;  %v4798_v7 = vld [vmem:[#allocation10 + $0x200] ss:$16 sps:$4 sm:$0xff]  }
 0x2a2   :  { %v669_v17 = vmax.f32 %v636_v11, 0.0 }
 0x2a3   :  { %v684_v18 = vpack.c.bf16 %v668_v15, %v666_v14 }
 0x2a4   :  { %v685_v19 = vpack.c.bf16 %v669_v17, %v667_v16  ;;  %2231 = vmatpush1.bf16.msra.mxu0 %v4780_v12  ;;  %2457 = vmatpush1.bf16.msra.mxu1 %v4783_v13  ;;  %v4806_v12 = vld [vmem:[#allocation10 + $0x224] ss:$16 sps:$4 sm:$0xff]   ;;  %v4809_v13 = vld [vmem:[#allocation10 + $0x22c] ss:$16 sps:$4 sm:$0xff]  }
 0x2a5   :  { %2232 = vmatprep.subr.bf16.mxu0 %v4788_v34  ;;  %2458 = vmatprep.subr.bf16.mxu1 %v4791_v35 }
 0x2a6   :  { %1194 = vmatprep.mubr.bf16.mxu0 %v685_v19  ;;  %1307 = vmatprep.mubr.bf16.mxu1 %v685_v19 }
 0x2a7   :  { %1195 = vmatmul.mubr.bf16.gmra.mrb[44].mxu0 %v684_v18  ;;  %1308 = vmatmul.mubr.bf16.gmra.mrb[60].mxu1 %v684_v18 }
 0x2a8   :  { %2233 = vmatpush1.bf16.msra.mxu0 %v4786_v20  ;;  %2459 = vmatpush1.bf16.msra.mxu1 %v4789_v21 }
 0x2a9   :  { %2234 = vmatprep.subr.bf16.mxu0 %v4794_v22  ;;  %2460 = vmatprep.subr.bf16.mxu1 %v4797_v23  ;;  %v4804_v22 = vld [vmem:[#allocation10 + $0x220] ss:$16 sps:$4 sm:$0xff]   ;;  %v4807_v23 = vld [vmem:[#allocation10 + $0x228] ss:$16 sps:$4 sm:$0xff]  }
 0x2ac   :  { %2235 = vmatpush1.bf16.msra.mxu0 %v4792_v24  ;;  %2461 = vmatpush1.bf16.msra.mxu1 %v4795_v25  ;;  %v4812_v24 = vld [vmem:[#allocation10 + $0x244] ss:$16 sps:$4 sm:$0xff]  }
 0x2ad   :  { %2317 = vmatprep.subr.bf16.mxu0 %v4800_v26  ;;  %2543 = vmatprep.subr.bf16.mxu1 %v4803_v32 }
 0x342   :  { %v1126_v40 = vpop.f32.mrb[16].mxu0  ;;  %v1239_v41 = vpop.f32.mrb[32].mxu1 }
 0x343   :  { %v1127_v42 = vadd.f32 %v1126_v40, %v5552_v36  ;;  %v1240_v43 = vadd.f32 %v1239_v41, %v5556_v37  ;;  %v1128_v44 = vpop.f32.mrb[17].mxu0  ;;  %v1241_v45 = vpop.f32.mrb[33].mxu1  ;;  %v4815_v40 = vld [vmem:[#allocation10 + $0x24c] ss:$16 sps:$4 sm:$0xff]  }
 0x344   :  { %v1129_v46 = vadd.f32 %v1128_v44, %v5559_v38  ;;  %v1242_v47 = vadd.f32 %v1241_v45, %v5563_v39  ;;  %v1130_v48 = vpop.f32.mrb[18].mxu0  ;;  %v1243_v49 = vpop.f32.mrb[34].mxu1 }
 0x345   :  { %v1131_v50 = vadd.f32 %v1130_v48, %v5552_v36  ;;  %v1244_v51 = vadd.f32 %v1243_v49, %v5556_v37  ;;  %v1132_v52 = vpop.f32.mrb[19].mxu0  ;;  %v1245_v53 = vpop.f32.mrb[35].mxu1  ;;  %v1318_v56 = vmax.f32 %v1127_v42, 0.0  ;;  %v1320_v57 = vmax.f32 %v1240_v43, 0.0 }
 0x346   :  { %v1133_v54 = vadd.f32 %v1132_v52, %v5559_v38  ;;  %v1246_v55 = vadd.f32 %v1245_v53, %v5563_v39  ;;  %v1319_v60 = vmax.f32 %v1129_v46, 0.0  ;;  %v1321_v61 = vmax.f32 %v1242_v47, 0.0  ;;  %v4813_v52 = vld [vmem:[#allocation10 + $0x248] ss:$16 sps:$4 sm:$0xff]  }
 0x347   :  { %v1322_v58 = vmax.f32 %v1131_v50, 0.0  ;;  %v1324_v59 = vmax.f32 %v1244_v51, 0.0  ;;  %v4810_v51 = vld [vmem:[#allocation10 + $0x240] ss:$16 sps:$4 sm:$0xff]  }
 0x348   :  { %v1323_v63 = vmax.f32 %v1133_v54, 0.0  ;;  %v1325_v0 = vmax.f32 %v1246_v55, 0.0 }
 0x349   :  { %v1382_v1 = vpack.c.bf16 %v1322_v58, %v1318_v56  ;;  %v5573_v2 = vpack.c.bf16 %v1324_v59, %v1320_v57  ;;  %v4818_v57 = vld [vmem:[#allocation10 + $0x264] ss:$16 sps:$4 sm:$0xff]   ;;  %v4821_v58 = vld [vmem:[#allocation10 + $0x26c] ss:$16 sps:$4 sm:$0xff]  }
 0x34a   :  { %v1383_v3 = vpack.c.bf16 %v1323_v63, %v1319_v60  ;;  %v5575_v4 = vpack.c.bf16 %v1325_v0, %v1321_v61  ;;  %v1136_v5 = vpop.f32.mrb[20].mxu0  ;;  %v1249_v6 = vpop.f32.mrb[36].mxu1 }
 0x34b   :  { %v1137_v9 = vadd.f32 %v1136_v5, %v5552_v36  ;;  %v1250_v62 = vadd.f32 %v1249_v6, %v5556_v37  ;;  %v1138_v10 = vpop.f32.mrb[21].mxu0  ;;  %v1251_v11 = vpop.f32.mrb[37].mxu1 }
 0x34c   :  { %v1139_v14 = vadd.f32 %v1138_v10, %v5559_v38  ;;  %v1252_v15 = vadd.f32 %v1251_v11, %v5563_v39  ;;  %v1140_v16 = vpop.f32.mrb[22].mxu0  ;;  %v1253_v17 = vpop.f32.mrb[38].mxu1  ;;  %2236 = vmatprep.mubr.bf16.mxu0 %v1383_v3  ;;  %2462 = vmatprep.mubr.bf16.mxu1 %v1383_v3 }
 0x34d   :  { %v1141_v18 = vadd.f32 %v1140_v16, %v5552_v36  ;;  %v1254_v19 = vadd.f32 %v1253_v17, %v5556_v37  ;;  %v1142_v34 = vpop.f32.mrb[23].mxu0  ;;  %v1255_v35 = vpop.f32.mrb[39].mxu1  ;;  %2237 = vmatmul.mubr.bf16.vlgmr.msra.gmra.mrb[48].mxu0 %v1382_v1  ;;  %2463 = vmatmul.mubr.bf16.vlgmr.msra.gmra.mrb[64].mxu1 %v1382_v1  ;;  %v1326_v25 = vmax.f32 %v1137_v9, 0.0  ;;  %v1328_v26 = vmax.f32 %v1250_v62, 0.0  ;;  %v4819_v9 = vld [vmem:[#allocation10 + $0x268] ss:$16 sps:$4 sm:$0xff]  }
 0x34e   :  { %v1143_v20 = vadd.f32 %v1142_v34, %v5559_v38  ;;  %v1256_v21 = vadd.f32 %v1255_v35, %v5563_v39  ;;  %2318 = vmatpush1.bf16.msra.mxu0 %v4798_v7  ;;  %2544 = vmatpush1.bf16.msra.mxu1 %v4801_v8  ;;  %v1327_v41 = vmax.f32 %v1139_v14, 0.0  ;;  %v1329_v42 = vmax.f32 %v1252_v15, 0.0  ;;  %v4816_v8 = vld [vmem:[#allocation10 + $0x260] ss:$16 sps:$4 sm:$0xff]   ;;  %v4824_v62 = vld [vmem:[#allocation10 + $0x284] ss:$16 sps:$4 sm:$0xff]  }
 0x34f   :  { %v1330_v32 = vmax.f32 %v1141_v18, 0.0  ;;  %v1332_v28 = vmax.f32 %v1254_v19, 0.0  ;;  %2319 = vmatprep.subr.bf16.mxu0 %v4806_v12  ;;  %2545 = vmatprep.subr.bf16.mxu1 %v4809_v13  ;;  %v4827_v14 = vld [vmem:[#allocation10 + $0x28c] ss:$16 sps:$4 sm:$0xff]  }
 0x350   :  { %v1331_v43 = vmax.f32 %v1143_v20, 0.0  ;;  %v1333_v44 = vmax.f32 %v1256_v21, 0.0 }
 0x351   :  { %v1386_v45 = vpack.c.bf16 %v1330_v32, %v1326_v25  ;;  %v5585_v46 = vpack.c.bf16 %v1332_v28, %v1328_v26 }
 0x352   :  { %v1387_v47 = vpack.c.bf16 %v1331_v43, %v1327_v41  ;;  %v5587_v48 = vpack.c.bf16 %v1333_v44, %v1329_v42  ;;  %2320 = vmatpush1.bf16.msra.mxu0 %v4804_v22  ;;  %v1146_v49 = vpop.f32.mrb[24].mxu0  ;;  %v1259_v50 = vpop.f32.mrb[40].mxu1  ;;  %2546 = vmatpush1.bf16.msra.mxu1 %v4807_v23  ;;  %v4822_v23 = vld [vmem:[#allocation10 + $0x280] ss:$16 sps:$4 sm:$0xff]   ;;  %v4833_v41 = vld [vmem:[#allocation10 + $0x2ac] ss:$16 sps:$4 sm:$0xff]  }
 0x353   :  { %v1147_v53 = vadd.f32 %v1146_v49, %v5552_v36  ;;  %v1260_v54 = vadd.f32 %v1259_v50, %v5556_v37  ;;  %v1148_v55 = vpop.f32.mrb[25].mxu0  ;;  %v1261_v56 = vpop.f32.mrb[41].mxu1  ;;  %2321 = vmatprep.subr.bf16.mxu0 %v4812_v24  ;;  %2547 = vmatprep.subr.bf16.mxu1 %v4815_v40  ;;  %v4825_v24 = vld [vmem:[#allocation10 + $0x288] ss:$16 sps:$4 sm:$0xff]   ;;  %v4830_v40 = vld [vmem:[#allocation10 + $0x2a4] ss:$16 sps:$4 sm:$0xff]  }
 0x354   :  { %v1149_v59 = vadd.f32 %v1148_v55, %v5559_v38  ;;  %v1262_v60 = vadd.f32 %v1261_v56, %v5563_v39  ;;  %v1150_v61 = vpop.f32.mrb[26].mxu0  ;;  %v1263_v63 = vpop.f32.mrb[42].mxu1  ;;  %2246 = vmatprep.mubr.bf16.mxu0 %v1387_v47  ;;  %2472 = vmatprep.mubr.bf16.mxu1 %v1387_v47  ;;  %v4831_v55 = vld [vmem:[#allocation10 + $0x2a8] ss:$16 sps:$4 sm:$0xff]   ;;  %v4836_v56 = vld [vmem:[#allocation10 + $0x2c4] ss:$16 sps:$4 sm:$0xff]  }
 0x355   :  { %v1151_v0 = vadd.f32 %v1150_v61, %v5552_v36  ;;  %v1264_v1 = vadd.f32 %v1263_v63, %v5556_v37  ;;  %v1152_v3 = vpop.f32.mrb[27].mxu0  ;;  %v1265_v5 = vpop.f32.mrb[43].mxu1  ;;  %2247 = vmatmul.mubr.bf16.gmra.mrb[52].mxu0 %v1386_v45  ;;  %2473 = vmatmul.mubr.bf16.gmra.mrb[68].mxu1 %v1386_v45  ;;  %v1334_v10 = vmax.f32 %v1147_v53, 0.0  ;;  %v1336_v11 = vmax.f32 %v1260_v54, 0.0  ;;  %v4828_v54 = vld [vmem:[#allocation10 + $0x2a0] ss:$16 sps:$4 sm:$0xff]  }
 0x356   :  { %v1153_v6 = vadd.f32 %v1152_v3, %v5559_v38  ;;  %v1266_v7 = vadd.f32 %v1265_v5, %v5563_v39  ;;  %2322 = vmatpush1.bf16.msra.mxu0 %v4810_v51  ;;  %2548 = vmatpush1.bf16.msra.mxu1 %v4813_v52  ;;  %v1335_v15 = vmax.f32 %v1149_v59, 0.0  ;;  %v1337_v16 = vmax.f32 %v1262_v60, 0.0  ;;  %v4839_v61 = vld [vmem:[#allocation10 + $0x2cc] ss:$16 sps:$4 sm:$0xff]  }
 0x357   :  { %v1338_v12 = vmax.f32 %v1151_v0, 0.0  ;;  %v1340_v13 = vmax.f32 %v1264_v1, 0.0  ;;  %2323 = vmatprep.subr.bf16.mxu0 %v4818_v57  ;;  %2549 = vmatprep.subr.bf16.mxu1 %v4821_v58 }
 0x358   :  { %v1339_v17 = vmax.f32 %v1153_v6, 0.0  ;;  %v1341_v18 = vmax.f32 %v1266_v7, 0.0 }
 0x359   :  { %v1390_v19 = vpack.c.bf16 %v1338_v12, %v1334_v10  ;;  %v5597_v34 = vpack.c.bf16 %v1340_v13, %v1336_v11  ;;  %v4834_v10 = vld [vmem:[#allocation10 + $0x2c0] ss:$16 sps:$4 sm:$0xff]   ;;  %v4837_v11 = vld [vmem:[#allocation10 + $0x2c8] ss:$16 sps:$4 sm:$0xff]  }
 0x35a   :  { %v1391_v35 = vpack.c.bf16 %v1339_v17, %v1335_v15  ;;  %v5599_v20 = vpack.c.bf16 %v1341_v18, %v1337_v16  ;;  %2324 = vmatpush1.bf16.msra.mxu0 %v4816_v8  ;;  %v1156_v21 = vpop.f32.mrb[28].mxu0  ;;  %v1269_v22 = vpop.f32.mrb[44].mxu1  ;;  %2550 = vmatpush1.bf16.msra.mxu1 %v4819_v9  ;;  %v4842_v16 = vld [vmem:[#allocation10 + $0x2e4] ss:$16 sps:$4 sm:$0xff]   ;;  %v4845_v17 = vld [vmem:[#allocation10 + $0x2ec] ss:$16 sps:$4 sm:$0xff]  }
 0x35b   :  { %v1157_v25 = vadd.f32 %v1156_v21, %v5552_v36  ;;  %v1270_v26 = vadd.f32 %v1269_v22, %v5556_v37  ;;  %v1158_v32 = vpop.f32.mrb[29].mxu0  ;;  %v1271_v28 = vpop.f32.mrb[45].mxu1  ;;  %2325 = vmatprep.subr.bf16.mxu0 %v4824_v62  ;;  %2551 = vmatprep.subr.bf16.mxu1 %v4827_v14 }
 0x35c   :  { %v1159_v42 = vadd.f32 %v1158_v32, %v5559_v38  ;;  %v1272_v43 = vadd.f32 %v1271_v28, %v5563_v39  ;;  %v1160_v44 = vpop.f32.mrb[30].mxu0  ;;  %v1273_v45 = vpop.f32.mrb[46].mxu1  ;;  %2256 = vmatprep.mubr.bf16.mxu0 %v1391_v35  ;;  %2482 = vmatprep.mubr.bf16.mxu1 %v1391_v35  ;;  %v4840_v28 = vld [vmem:[#allocation10 + $0x2e0] ss:$16 sps:$4 sm:$0xff]  }
 0x35d   :  { %v1161_v47 = vadd.f32 %v1160_v44, %v5552_v36  ;;  %v1274_v49 = vadd.f32 %v1273_v45, %v5556_v37  ;;  %v1162_v50 = vpop.f32.mrb[31].mxu0  ;;  %v1275_v51 = vpop.f32.mrb[47].mxu1  ;;  %2257 = vmatmul.mubr.bf16.gmra.mrb[56].mxu0 %v1390_v19  ;;  %2483 = vmatmul.mubr.bf16.gmra.mrb[72].mxu1 %v1390_v19  ;;  %v1342_v57 = vmax.f32 %v1157_v25, 0.0  ;;  %v1344_v58 = vmax.f32 %v1270_v26, 0.0 }
 0x35e   :  { %v1163_v52 = vadd.f32 %v1162_v50, %v5559_v38  ;;  %v1276_v53 = vadd.f32 %v1275_v51, %v5563_v39  ;;  %2326 = vmatpush1.bf16.msra.mxu0 %v4822_v23  ;;  %2552 = vmatpush1.bf16.msra.mxu1 %v4825_v24  ;;  %v1343_v63 = vmax.f32 %v1159_v42, 0.0  ;;  %v1345_v0 = vmax.f32 %v1272_v43, 0.0 }
 0x35f   :  { %v1346_v59 = vmax.f32 %v1161_v47, 0.0  ;;  %v1348_v60 = vmax.f32 %v1274_v49, 0.0  ;;  %2327 = vmatprep.subr.bf16.mxu0 %v4830_v40  ;;  %2553 = vmatprep.subr.bf16.mxu1 %v4833_v41  ;;  %v4843_v40 = vld [vmem:[#allocation10 + $0x2e8] ss:$16 sps:$4 sm:$0xff]   ;;  %v4848_v41 = vld [vmem:[#allocation10 + $0x304] ss:$16 sps:$4 sm:$0xff]  }
 0x360   :  { %v1347_v1 = vmax.f32 %v1163_v52, 0.0  ;;  %v1349_v3 = vmax.f32 %v1276_v53, 0.0  ;;  %v4851_v47 = vld [vmem:[#allocation10 + $0x30c] ss:$16 sps:$4 sm:$0xff]  }
 0x361   :  { %v1394_v5 = vpack.c.bf16 %v1346_v59, %v1342_v57  ;;  %v5609_v6 = vpack.c.bf16 %v1348_v60, %v1344_v58  ;;  %v4846_v59 = vld [vmem:[#allocation10 + $0x300] ss:$16 sps:$4 sm:$0xff]   ;;  %v4849_v60 = vld [vmem:[#allocation10 + $0x308] ss:$16 sps:$4 sm:$0xff]  }
 0x362   :  { %v1395_v7 = vpack.c.bf16 %v1347_v1, %v1343_v63  ;;  %v5611_v8 = vpack.c.bf16 %v1349_v3, %v1345_v0  ;;  %2328 = vmatpush1.bf16.msra.mxu0 %v4828_v54  ;;  %v1166_v9 = vpop.f32.mrb[32].mxu0  ;;  %v1279_v62 = vpop.f32.mrb[48].mxu1  ;;  %2554 = vmatpush1.bf16.msra.mxu1 %v4831_v55  ;;  %v4854_v3 = vld [vmem:[#allocation10 + $0x324] ss:$16 sps:$4 sm:$0xff]  }
 0x363   :  { %v1167_v12 = vadd.f32 %v1166_v9, %v5552_v36  ;;  %v1280_v13 = vadd.f32 %v1279_v62, %v5556_v37  ;;  %v1168_v14 = vpop.f32.mrb[33].mxu0  ;;  %v1281_v15 = vpop.f32.mrb[49].mxu1  ;;  %2329 = vmatprep.subr.bf16.mxu0 %v4836_v56  ;;  %2555 = vmatprep.subr.bf16.mxu1 %v4839_v61 }
 0x364   :  { %v1169_v18 = vadd.f32 %v1168_v14, %v5559_v38  ;;  %v1282_v19 = vadd.f32 %v1281_v15, %v5563_v39  ;;  %v1170_v35 = vpop.f32.mrb[34].mxu0  ;;  %v1283_v21 = vpop.f32.mrb[50].mxu1  ;;  %2266 = vmatprep.mubr.bf16.mxu0 %v1395_v7  ;;  %2492 = vmatprep.mubr.bf16.mxu1 %v1395_v7 }
 0x365   :  { %v1171_v22 = vadd.f32 %v1170_v35, %v5552_v36  ;;  %v1284_v23 = vadd.f32 %v1283_v21, %v5556_v37  ;;  %v1172_v24 = vpop.f32.mrb[35].mxu0  ;;  %v1285_v25 = vpop.f32.mrb[51].mxu1  ;;  %2267 = vmatmul.mubr.bf16.gmra.mrb[60].mxu0 %v1394_v5  ;;  %2493 = vmatmul.mubr.bf16.gmra.mrb[76].mxu1 %v1394_v5  ;;  %v1350_v42 = vmax.f32 %v1167_v12, 0.0  ;;  %v1352_v43 = vmax.f32 %v1280_v13, 0.0  ;;  %v4857_v5 = vld [vmem:[#allocation10 + $0x32c] ss:$16 sps:$4 sm:$0xff]  }
 0x366   :  { %v1173_v26 = vadd.f32 %v1172_v24, %v5559_v38  ;;  %v1286_v32 = vadd.f32 %v1285_v25, %v5563_v39  ;;  %2330 = vmatpush1.bf16.msra.mxu0 %v4834_v10  ;;  %2556 = vmatpush1.bf16.msra.mxu1 %v4837_v11  ;;  %v1351_v49 = vmax.f32 %v1169_v18, 0.0  ;;  %v1353_v50 = vmax.f32 %v1282_v19, 0.0  ;;  %v4855_v18 = vld [vmem:[#allocation10 + $0x328] ss:$16 sps:$4 sm:$0xff]   ;;  %v4860_v19 = vld [vmem:[#allocation10 + $0x344] ss:$16 sps:$4 sm:$0xff]  }
 0x367   :  { %v1354_v44 = vmax.f32 %v1171_v22, 0.0  ;;  %v1356_v45 = vmax.f32 %v1284_v23, 0.0  ;;  %2331 = vmatprep.subr.bf16.mxu0 %v4842_v16  ;;  %2557 = vmatprep.subr.bf16.mxu1 %v4845_v17  ;;  %v4852_v17 = vld [vmem:[#allocation10 + $0x320] ss:$16 sps:$4 sm:$0xff]   ;;  %v4863_v24 = vld [vmem:[#allocation10 + $0x34c] ss:$16 sps:$4 sm:$0xff]  }
 0x368   :  { %v1355_v51 = vmax.f32 %v1173_v26, 0.0  ;;  %v1357_v52 = vmax.f32 %v1286_v32, 0.0 }
 0x369   :  { %v1398_v53 = vpack.c.bf16 %v1354_v44, %v1350_v42  ;;  %v5621_v54 = vpack.c.bf16 %v1356_v45, %v1352_v43 }
 0x36a   :  { %v1399_v55 = vpack.c.bf16 %v1355_v51, %v1351_v49  ;;  %v5623_v56 = vpack.c.bf16 %v1357_v52, %v1353_v50  ;;  %2332 = vmatpush1.bf16.msra.mxu0 %v4840_v28  ;;  %v1176_v57 = vpop.f32.mrb[36].mxu0  ;;  %v1289_v58 = vpop.f32.mrb[52].mxu1  ;;  %2558 = vmatpush1.bf16.msra.mxu1 %v4843_v40  ;;  %v4861_v49 = vld [vmem:[#allocation10 + $0x348] ss:$16 sps:$4 sm:$0xff]  }
 0x36b   :  { %v1177_v61 = vadd.f32 %v1176_v57, %v5552_v36  ;;  %v1290_v63 = vadd.f32 %v1289_v58, %v5556_v37  ;;  %v1178_v0 = vpop.f32.mrb[37].mxu0  ;;  %v1291_v1 = vpop.f32.mrb[53].mxu1  ;;  %2333 = vmatprep.subr.bf16.mxu0 %v4848_v41  ;;  %2559 = vmatprep.subr.bf16.mxu1 %v4851_v47  ;;  %v4858_v47 = vld [vmem:[#allocation10 + $0x340] ss:$16 sps:$4 sm:$0xff]   ;;  %v4869_v57 = vld [vmem:[#allocation10 + $0x36c] ss:$16 sps:$4 sm:$0xff]  }
 0x36c   :  { %v1179_v7 = vadd.f32 %v1178_v0, %v5559_v38  ;;  %v1292_v9 = vadd.f32 %v1291_v1, %v5563_v39  ;;  %v1180_v62 = vpop.f32.mrb[38].mxu0  ;;  %v1293_v10 = vpop.f32.mrb[54].mxu1  ;;  %2276 = vmatprep.mubr.bf16.mxu0 %v1399_v55  ;;  %2502 = vmatprep.mubr.bf16.mxu1 %v1399_v55  ;;  %v4866_v55 = vld [vmem:[#allocation10 + $0x364] ss:$16 sps:$4 sm:$0xff]  }
 0x36d   :  { %v1181_v11 = vadd.f32 %v1180_v62, %v5552_v36  ;;  %v1294_v12 = vadd.f32 %v1293_v10, %v5556_v37  ;;  %v1182_v13 = vpop.f32.mrb[39].mxu0  ;;  %v1295_v14 = vpop.f32.mrb[55].mxu1  ;;  %2277 = vmatmul.mubr.bf16.gmra.mrb[64].mxu0 %v1398_v53  ;;  %2503 = vmatmul.mubr.bf16.gmra.mrb[80].mxu1 %v1398_v53  ;;  %v1358_v35 = vmax.f32 %v1177_v61, 0.0  ;;  %v1360_v21 = vmax.f32 %v1290_v63, 0.0  ;;  %v4867_v62 = vld [vmem:[#allocation10 + $0x368] ss:$16 sps:$4 sm:$0xff]  }
 0x36e   :  { %v1183_v15 = vadd.f32 %v1182_v13, %v5559_v38  ;;  %v1296_v16 = vadd.f32 %v1295_v14, %v5563_v39  ;;  %2334 = vmatpush1.bf16.msra.mxu0 %v4846_v59  ;;  %2560 = vmatpush1.bf16.msra.mxu1 %v4849_v60  ;;  %v1359_v25 = vmax.f32 %v1179_v7, 0.0  ;;  %v1361_v26 = vmax.f32 %v1292_v9, 0.0  ;;  %v4864_v9 = vld [vmem:[#allocation10 + $0x360] ss:$16 sps:$4 sm:$0xff]   ;;  %v4872_v10 = vld [vmem:[#allocation10 + $0x384] ss:$16 sps:$4 sm:$0xff]  }
 0x36f   :  { %v1362_v22 = vmax.f32 %v1181_v11, 0.0  ;;  %v1364_v23 = vmax.f32 %v1294_v12, 0.0  ;;  %2335 = vmatprep.subr.bf16.mxu0 %v4854_v3  ;;  %2561 = vmatprep.subr.bf16.mxu1 %v4857_v5 }
 0x370   :  { %v1363_v32 = vmax.f32 %v1183_v15, 0.0  ;;  %v1365_v28 = vmax.f32 %v1296_v16, 0.0  ;;  %v4875_v15 = vld [vmem:[#allocation10 + $0x38c] ss:$16 sps:$4 sm:$0xff]  }
 0x371   :  { %v1402_v40 = vpack.c.bf16 %v1362_v22, %v1358_v35  ;;  %v5633_v41 = vpack.c.bf16 %v1364_v23, %v1360_v21 }
 0x372   :  { %v1403_v42 = vpack.c.bf16 %v1363_v32, %v1359_v25  ;;  %v5635_v43 = vpack.c.bf16 %v1365_v28, %v1361_v26  ;;  %2336 = vmatpush1.bf16.msra.mxu0 %v4852_v17  ;;  %v1186_v44 = vpop.f32.mrb[40].mxu0  ;;  %v1299_v45 = vpop.f32.mrb[56].mxu1  ;;  %2562 = vmatpush1.bf16.msra.mxu1 %v4855_v18  ;;  %v4870_v26 = vld [vmem:[#allocation10 + $0x380] ss:$16 sps:$4 sm:$0xff]   ;;  %v4873_v32 = vld [vmem:[#allocation10 + $0x388] ss:$16 sps:$4 sm:$0xff]  }
 0x373   :  { %v1187_v50 = vadd.f32 %v1186_v44, %v5552_v36  ;;  %v1300_v51 = vadd.f32 %v1299_v45, %v5556_v37  ;;  %v1188_v52 = vpop.f32.mrb[41].mxu0  ;;  %v1301_v53 = vpop.f32.mrb[57].mxu1  ;;  %2337 = vmatprep.subr.bf16.mxu0 %v4860_v19  ;;  %2563 = vmatprep.subr.bf16.mxu1 %v4863_v24  ;;  %v4878_v45 = vld [vmem:[#allocation10 + $0x3a4] ss:$16 sps:$4 sm:$0xff]  }
 0x374   :  { %v1189_v58 = vadd.f32 %v1188_v52, %v5559_v38  ;;  %v1302_v59 = vadd.f32 %v1301_v53, %v5563_v39  ;;  %v1190_v60 = vpop.f32.mrb[42].mxu0  ;;  %v1303_v61 = vpop.f32.mrb[58].mxu1  ;;  %2286 = vmatprep.mubr.bf16.mxu0 %v1403_v42  ;;  %2512 = vmatprep.mubr.bf16.mxu1 %v1403_v42 }
 0x375   :  { %v1191_v63 = vadd.f32 %v1190_v60, %v5552_v36  ;;  %v1304_v0 = vadd.f32 %v1303_v61, %v5556_v37  ;;  %v1192_v1 = vpop.f32.mrb[43].mxu0  ;;  %v1305_v3 = vpop.f32.mrb[59].mxu1  ;;  %2287 = vmatmul.mubr.bf16.gmra.mrb[68].mxu0 %v1402_v40  ;;  %2513 = vmatmul.mubr.bf16.gmra.mrb[84].mxu1 %v1402_v40  ;;  %v1366_v11 = vmax.f32 %v1187_v50, 0.0  ;;  %v1368_v12 = vmax.f32 %v1300_v51, 0.0  ;;  %v4876_v61 = vld [vmem:[#allocation10 + $0x3a0] ss:$16 sps:$4 sm:$0xff]  }
 0x376   :  { %v1193_v5 = vadd.f32 %v1192_v1, %v5559_v38  ;;  %v1306_v7 = vadd.f32 %v1305_v3, %v5563_v39  ;;  %2338 = vmatpush1.bf16.msra.mxu0 %v4858_v47  ;;  %2564 = vmatpush1.bf16.msra.mxu1 %v4861_v49  ;;  %v1367_v16 = vmax.f32 %v1189_v58, 0.0  ;;  %v1369_v17 = vmax.f32 %v1302_v59, 0.0  ;;  %v4881_v47 = vld [vmem:[#allocation10 + $0x3ac] ss:$16 sps:$4 sm:$0xff]  }
 0x377   :  { %v1370_v13 = vmax.f32 %v1191_v63, 0.0  ;;  %v1372_v14 = vmax.f32 %v1304_v0, 0.0  ;;  %2339 = vmatprep.subr.bf16.mxu0 %v4866_v55  ;;  %2565 = vmatprep.subr.bf16.mxu1 %v4869_v57  ;;  %v4879_v63 = vld [vmem:[#allocation10 + $0x3a8] ss:$16 sps:$4 sm:$0xff]   ;;  %v4884_v0 = vld [vmem:[#allocation10 + $0x3c4] ss:$16 sps:$4 sm:$0xff]  }
 0x378   :  { %v1371_v18 = vmax.f32 %v1193_v5, 0.0  ;;  %v1373_v19 = vmax.f32 %v1306_v7, 0.0 }
 0x379   :  { %v1406_v35 = vpack.c.bf16 %v1370_v13, %v1366_v11  ;;  %v5645_v21 = vpack.c.bf16 %v1372_v14, %v1368_v12  ;;  %v4882_v13 = vld [vmem:[#allocation10 + $0x3c0] ss:$16 sps:$4 sm:$0xff]   ;;  %v4885_v14 = vld [vmem:[#allocation10 + $0x3c8] ss:$16 sps:$4 sm:$0xff]  }
 0x37a   :  { %v1407_v22 = vpack.c.bf16 %v1371_v18, %v1367_v16  ;;  %v5647_v23 = vpack.c.bf16 %v1373_v19, %v1369_v17  ;;  %2340 = vmatpush1.bf16.msra.mxu0 %v4864_v9  ;;  %v1196_v24 = vpop.f32.mrb[44].mxu0  ;;  %v1309_v25 = vpop.f32.mrb[60].mxu1  ;;  %2566 = vmatpush1.bf16.msra.mxu1 %v4867_v62  ;;  %v4893_v16 = vld [vmem:[#allocation10 + $0x3ec] ss:$16 sps:$4 sm:$0xff]   ;;  %v4888_v17 = vld [vmem:[#allocation10 + $0x3e0] ss:$16 sps:$4 sm:$0xff]  }
 0x37b   :  { %v1197_v28 = vadd.f32 %v1196_v24, %v5552_v36  ;;  %v1310_v40 = vadd.f32 %v1309_v25, %v5556_v37  ;;  %v1198_v42 = vpop.f32.mrb[45].mxu0  ;;  %v1311_v44 = vpop.f32.mrb[61].mxu1  ;;  %2341 = vmatprep.subr.bf16.mxu0 %v4872_v10  ;;  %2567 = vmatprep.subr.bf16.mxu1 %v4875_v15  ;;  %v4890_v15 = vld [vmem:[#allocation10 + $0x3e4] ss:$16 sps:$4 sm:$0xff]   ;;  %v4891_v18 = vld [vmem:[#allocation10 + $0x3e8] ss:$16 sps:$4 sm:$0xff]  }
 0x37c   :  { %v1199_v49 = vadd.f32 %v1198_v42, %v5559_v38  ;;  %v1312_v50 = vadd.f32 %v1311_v44, %v5563_v39  ;;  %v1200_v51 = vpop.f32.mrb[46].mxu0  ;;  %v1313_v52 = vpop.f32.mrb[62].mxu1  ;;  %2296 = vmatprep.mubr.bf16.mxu0 %v1407_v22  ;;  %2522 = vmatprep.mubr.bf16.mxu1 %v1407_v22  ;;  %v4896_v19 = vld [vmem:[#allocation11 + $0x4] ss:$8 sps:$4 sm:$0xff]   ;;  %v4899_v22 = vld [vmem:[#allocation11 + $0x14] ss:$8 sps:$4 sm:$0xff]  }
 0x37d   :  { %v1201_v53 = vadd.f32 %v1200_v51, %v5552_v36  ;;  %v1314_v55 = vadd.f32 %v1313_v52, %v5556_v37  ;;  %v1202_v57 = vpop.f32.mrb[47].mxu0  ;;  %v1315_v58 = vpop.f32.mrb[63].mxu1  ;;  %2297 = vmatmul.mubr.bf16.gmra.mrb[72].mxu0 %v1406_v35  ;;  %2523 = vmatmul.mubr.bf16.gmra.mrb[88].mxu1 %v1406_v35  ;;  %v1374_v1 = vmax.f32 %v1197_v28, 0.0  ;;  %v1376_v3 = vmax.f32 %v1310_v40, 0.0  ;;  %v4887_v36 = vld [vmem:[#allocation10 + $0x3cc] ss:$16 sps:$4 sm:$0xff]  }
 0x37e   :  { %v1203_v59 = vadd.f32 %v1202_v57, %v5559_v38  ;;  %v1316_v60 = vadd.f32 %v1315_v58, %v5563_v39  ;;  %2342 = vmatpush1.bf16.msra.mxu0 %v4870_v26  ;;  %2568 = vmatpush1.bf16.msra.mxu1 %v4873_v32  ;;  %v1375_v37 = vmax.f32 %v1199_v49, 0.0  ;;  %v1377_v9 = vmax.f32 %v1312_v50, 0.0  ;;  %v4894_v35 = vld [vmem:[#allocation11] ss:$8 sps:$4 sm:$0xff]   ;;  %v4897_v24 = vld [vmem:[#allocation11 + $0x10] ss:$8 sps:$4 sm:$0xff]  }
 0x37f   :  { %v1378_v5 = vmax.f32 %v1201_v53, 0.0  ;;  %v1380_v7 = vmax.f32 %v1314_v55, 0.0  ;;  %2343 = vmatprep.subr.bf16.mxu0 %v4878_v45  ;;  %2569 = vmatprep.subr.bf16.mxu1 %v4881_v47  ;;  %v4900_v25 = vld [vmem:[#allocation11 + $0x20] ss:$8 sps:$4 sm:$0xff]   ;;  %v4905_v26 = vld [vmem:[#allocation11 + $0x34] ss:$8 sps:$4 sm:$0xff]  }
 0x380   :  { %v1379_v62 = vmax.f32 %v1203_v59, 0.0  ;;  %v1381_v10 = vmax.f32 %v1316_v60, 0.0  ;;  %v4906_v32 = vld [vmem:[#allocation11 + $0x40] ss:$8 sps:$4 sm:$0xff]   ;;  %v4911_v28 = vld [vmem:[#allocation11 + $0x54] ss:$8 sps:$4 sm:$0xff]  }
 0x381   :  { %v1410_v11 = vpack.c.bf16 %v1378_v5, %v1374_v1  ;;  %v5657_v38 = vpack.c.bf16 %v1380_v7, %v1376_v3  ;;  %v4912_v40 = vld [vmem:[#allocation11 + $0x60] ss:$8 sps:$4 sm:$0xff]   ;;  %v4917_v42 = vld [vmem:[#allocation11 + $0x74] ss:$8 sps:$4 sm:$0xff]   ;;  %v4939_v55 = vld [vmem:[#allocation11 + $0xf0] ss:$8 sps:$4 sm:$0xff]  }
 0x382   :  { %v1411_v39 = vpack.c.bf16 %v1379_v62, %v1375_v37  ;;  %v5659_v12 = vpack.c.bf16 %v1381_v10, %v1377_v9  ;;  %2344 = vmatpush1.bf16.msra.mxu0 %v4876_v61  ;;  %2570 = vmatpush1.bf16.msra.mxu1 %v4879_v63  ;;  %v4918_v44 = vld [vmem:[#allocation11 + $0x80] ss:$8 sps:$4 sm:$0xff]   ;;  %v4923_v45 = vld [vmem:[#allocation11 + $0x94] ss:$8 sps:$4 sm:$0xff]  }
 0x383   :  { %2345 = vmatprep.subr.bf16.mxu0 %v4884_v0  ;;  %2571 = vmatprep.subr.bf16.mxu1 %v4887_v36  ;;  %v4924_v47 = vld [vmem:[#allocation11 + $0xa0] ss:$8 sps:$4 sm:$0xff]   ;;  %v4929_v49 = vld [vmem:[#allocation11 + $0xb4] ss:$8 sps:$4 sm:$0xff]  }
 0x384   :  { %2306 = vmatprep.mubr.bf16.mxu0 %v1411_v39  ;;  %2532 = vmatprep.mubr.bf16.mxu1 %v1411_v39  ;;  %v4930_v50 = vld [vmem:[#allocation11 + $0xc0] ss:$8 sps:$4 sm:$0xff]   ;;  %v4935_v51 = vld [vmem:[#allocation11 + $0xd4] ss:$8 sps:$4 sm:$0xff]  }
 0x385   :  { %2307 = vmatmul.mubr.bf16.gmra.mrb[76].mxu0 %v1410_v11  ;;  %2533 = vmatmul.mubr.bf16.gmra.mrb[92].mxu1 %v1410_v11  ;;  %v4936_v52 = vld [vmem:[#allocation11 + $0xe0] ss:$8 sps:$4 sm:$0xff]   ;;  %v4941_v53 = vld [vmem:[#allocation11 + $0xf4] ss:$8 sps:$4 sm:$0xff]  }
 0x386   :  { %2346 = vmatpush1.bf16.msra.mxu0 %v4882_v13  ;;  %2349 = vmatprep.mubr.bf16.mxu0 %v5575_v4  ;;  %v1542_v57 = vld [vmem:[%s5901_s8] sm:$0xf]  ;;  %v4992_v11 = vld [vmem:[#allocation13 + $0x48] sm:$0xff]  }
 0x387   :  { %2572 = vmatpush1.bf16.msra.mxu1 %v4885_v14  ;;  %2575 = vmatprep.mubr.bf16.mxu1 %v5575_v4  ;;  %v4902_v4 = vld [vmem:[#allocation11 + $0x24] ss:$8 sps:$4 sm:$0xff]   ;;  %v5697_v58 = vrot.slane %v1542_v57, %v5500_v30  ;;  %v5701_v59 = vrot.slane %v1542_v57, %v762_v27  ;;  %v5704_v60 = vrot.slane %v1542_v57, %v5506_v33 }
 0x388   :  { %2347 = vmatprep.subr.bf16.mxu0 %v4890_v15  ;;  %2573 = vmatprep.subr.bf16.mxu1 %v4893_v16  ;;  %v5708_v61 = vrot.slane %v1542_v57, %v766_v31  ;;  %v4991_v31 = vld [vmem:[#allocation13] sm:$0xff]  }
 0x38a   :  { %2348 = vmatpush1.bf16.msra.mxu0 %v4888_v17 }
 0x38b   :  { %2574 = vmatpush1.bf16.msra.mxu1 %v4891_v18  ;;  %3148 = vmatprep.subr.bf16.mxu0 %v4896_v19 }
 0x38c   :  { %4214 = vmatprep.subr.bf16.mxu1 %v4990_v29 }
 0x38d   :  { %2350 = vmatmul.mubr.bf16.vlgmr.msra.gmra.mrb[48].mxu0 %v5573_v2 }
 0x38e   :  { %2576 = vmatmul.mubr.bf16.vlgmr.msra.gmra.mrb[64].mxu1 %v5573_v2  ;;  %2359 = vmatprep.mubr.bf16.mxu0 %v5587_v48  ;;  %v4903_v2 = vld [vmem:[#allocation11 + $0x30] ss:$8 sps:$4 sm:$0xff]  }
 0x38f   :  { %2585 = vmatprep.mubr.bf16.mxu1 %v5587_v48  ;;  %3149 = vmatpush1.bf16.msra.mxu0 %v4894_v35  ;;  %v4908_v48 = vld [vmem:[#allocation11 + $0x44] ss:$8 sps:$4 sm:$0xff]  }
 0x390   :  { %3150 = vmatprep.subr.bf16.mxu0 %v4899_v22  ;;  %4215 = vmatpush3.bf16.msra.mxu1 %v4991_v31  ;;  %v4993_v35 = vld [vmem:[#allocation13 + $0x8] sm:$0xff]  }
 0x391   :  { %4216 = vmatprep.subr.bf16.mxu1 %v4992_v11 }
 0x393   :  { %3151 = vmatpush1.bf16.msra.mxu0 %v4897_v24 }
 0x394   :  { %3152 = vmatprep.subr.bf16.mxu0 %v4902_v4  ;;  %4217 = vmatpush3.bf16.msra.mxu1 %v4993_v35 }
 0x395   :  { %2360 = vmatmul.mubr.bf16.gmra.mrb[52].mxu0 %v5585_v46 }
 0x396   :  { %2586 = vmatmul.mubr.bf16.gmra.mrb[68].mxu1 %v5585_v46  ;;  %2369 = vmatprep.mubr.bf16.mxu0 %v5599_v20  ;;  %v4909_v46 = vld [vmem:[#allocation11 + $0x50] ss:$8 sps:$4 sm:$0xff]  }
 0x397   :  { %2595 = vmatprep.mubr.bf16.mxu1 %v5599_v20  ;;  %3153 = vmatpush1.bf16.msra.mxu0 %v4900_v25  ;;  %v4914_v20 = vld [vmem:[#allocation11 + $0x64] ss:$8 sps:$4 sm:$0xff]   ;;  %v4994_v25 = vld [vmem:[#allocation13 + $0x50] sm:$0xff]  }
 0x398   :  { %3154 = vmatprep.subr.bf16.mxu0 %v4905_v26  ;;  %4218 = vmatprep.subr.bf16.mxu1 %v4994_v25 }
 0x39b   :  { %3155 = vmatpush1.bf16.msra.mxu0 %v4903_v2 }
 0x39c   :  { %3156 = vmatprep.subr.bf16.mxu0 %v4908_v48 }
 0x39d   :  { %2370 = vmatmul.mubr.bf16.gmra.mrb[56].mxu0 %v5597_v34 }
 0x39e   :  { %2596 = vmatmul.mubr.bf16.gmra.mrb[72].mxu1 %v5597_v34  ;;  %2379 = vmatprep.mubr.bf16.mxu0 %v5611_v8  ;;  %v4915_v34 = vld [vmem:[#allocation11 + $0x70] ss:$8 sps:$4 sm:$0xff]  }
 0x39f   :  { %2605 = vmatprep.mubr.bf16.mxu1 %v5611_v8  ;;  %3157 = vmatpush1.bf16.msra.mxu0 %v4906_v32  ;;  %v4920_v8 = vld [vmem:[#allocation11 + $0x84] ss:$8 sps:$4 sm:$0xff]   ;;  %v4942_v32 = vld [vmem:[#allocation11 + $0x100] ss:$8 sps:$4 sm:$0xff]  }
 0x3a0   :  { %3158 = vmatprep.subr.bf16.mxu0 %v4911_v28 }
 0x3a3   :  { %3159 = vmatpush1.bf16.msra.mxu0 %v4909_v46 }
 0x3a4   :  { %3160 = vmatprep.subr.bf16.mxu0 %v4914_v20 }
 0x3a5   :  { %2380 = vmatmul.mubr.bf16.gmra.mrb[60].mxu0 %v5609_v6 }
 0x3a6   :  { %2606 = vmatmul.mubr.bf16.gmra.mrb[76].mxu1 %v5609_v6  ;;  %2389 = vmatprep.mubr.bf16.mxu0 %v5623_v56  ;;  %v4921_v6 = vld [vmem:[#allocation11 + $0x90] ss:$8 sps:$4 sm:$0xff]  }
 0x3a7   :  { %2615 = vmatprep.mubr.bf16.mxu1 %v5623_v56  ;;  %3161 = vmatpush1.bf16.msra.mxu0 %v4912_v40  ;;  %v4926_v56 = vld [vmem:[#allocation11 + $0xa4] ss:$8 sps:$4 sm:$0xff]  }
 0x3a8   :  { %3162 = vmatprep.subr.bf16.mxu0 %v4917_v42  ;;  %v4947_v42 = vld [vmem:[#allocation11 + $0x114] ss:$8 sps:$4 sm:$0xff]  }
 0x3ab   :  { %3163 = vmatpush1.bf16.msra.mxu0 %v4915_v34 }
 0x3ac   :  { %3164 = vmatprep.subr.bf16.mxu0 %v4920_v8 }
 0x3ad   :  { %2390 = vmatmul.mubr.bf16.gmra.mrb[64].mxu0 %v5621_v54 }
 0x3ae   :  { %2616 = vmatmul.mubr.bf16.gmra.mrb[80].mxu1 %v5621_v54  ;;  %2399 = vmatprep.mubr.bf16.mxu0 %v5635_v43  ;;  %v4927_v54 = vld [vmem:[#allocation11 + $0xb0] ss:$8 sps:$4 sm:$0xff]  }
 0x3af   :  { %2625 = vmatprep.mubr.bf16.mxu1 %v5635_v43  ;;  %3165 = vmatpush1.bf16.msra.mxu0 %v4918_v44  ;;  %v4932_v43 = vld [vmem:[#allocation11 + $0xc4] ss:$8 sps:$4 sm:$0xff]  }
 0x3b0   :  { %3166 = vmatprep.subr.bf16.mxu0 %v4923_v45 }
 0x3b3   :  { %3167 = vmatpush1.bf16.msra.mxu0 %v4921_v6  ;;  %v4995_v6 = vld [vmem:[#allocation13 + $0x10] sm:$0xff]  }
 0x3b4   :  { %3168 = vmatprep.subr.bf16.mxu0 %v4926_v56  ;;  %4219 = vmatpush3.bf16.msra.mxu1 %v4995_v6 }
 0x3b5   :  { %2400 = vmatmul.mubr.bf16.gmra.mrb[68].mxu0 %v5633_v41 }
 0x3b6   :  { %2626 = vmatmul.mubr.bf16.gmra.mrb[84].mxu1 %v5633_v41  ;;  %2409 = vmatprep.mubr.bf16.mxu0 %v5647_v23  ;;  %v4933_v41 = vld [vmem:[#allocation11 + $0xd0] ss:$8 sps:$4 sm:$0xff]  }
 0x3b7   :  { %2635 = vmatprep.mubr.bf16.mxu1 %v5647_v23  ;;  %3169 = vmatpush1.bf16.msra.mxu0 %v4924_v47  ;;  %v4938_v23 = vld [vmem:[#allocation11 + $0xe4] ss:$8 sps:$4 sm:$0xff]  }
 0x3b8   :  { %3170 = vmatprep.subr.bf16.mxu0 %v4929_v49 }
 0x3bb   :  { %3171 = vmatpush1.bf16.msra.mxu0 %v4927_v54 }
 0x3bc   :  { %3172 = vmatprep.subr.bf16.mxu0 %v4932_v43  ;;  %v4996_v43 = vld [vmem:[#allocation13 + $0x58] sm:$0xff]  }
 0x3bd   :  { %2410 = vmatmul.mubr.bf16.gmra.mrb[72].mxu0 %v5645_v21  ;;  %4220 = vmatprep.subr.bf16.mxu1 %v4996_v43 }
 0x3be   :  { %2636 = vmatmul.mubr.bf16.gmra.mrb[88].mxu1 %v5645_v21  ;;  %2419 = vmatprep.mubr.bf16.mxu0 %v5659_v12  ;;  %v4944_v21 = vld [vmem:[#allocation11 + $0x104] ss:$8 sps:$4 sm:$0xff]  }
 0x3bf   :  { %2645 = vmatprep.mubr.bf16.mxu1 %v5659_v12  ;;  %3173 = vmatpush1.bf16.msra.mxu0 %v4930_v50 }
 0x3c0   :  { %3174 = vmatprep.subr.bf16.mxu0 %v4935_v51 }
 0x3c3   :  { %3175 = vmatpush1.bf16.msra.mxu0 %v4933_v41 }
 0x3c4   :  { %3176 = vmatprep.subr.bf16.mxu0 %v4938_v23  ;;  %v4945_v23 = vld [vmem:[#allocation11 + $0x110] ss:$8 sps:$4 sm:$0xff]  }
 0x3c5   :  { %2420 = vmatmul.mubr.bf16.gmra.mrb[76].mxu0 %v5657_v38 }
 0x3c6   :  { %2646 = vmatmul.mubr.bf16.gmra.mrb[92].mxu1 %v5657_v38 }
 0x3c7   :  { %3177 = vmatpush1.bf16.msra.mxu0 %v4936_v52 }
 0x3c8   :  { %3178 = vmatprep.subr.bf16.mxu0 %v4941_v53 }
 0x3cb   :  { %3179 = vmatpush1.bf16.msra.mxu0 %v4939_v55 }
 0x3cc   :  { %3261 = vmatprep.subr.bf16.mxu0 %v4944_v21  ;;  %v4950_v21 = vld [vmem:[#allocation11 + $0x124] ss:$8 sps:$4 sm:$0xff]  }
 0x460   :  { %v2351_v63 = vpop.f32.mrb[48].mxu0 }
 0x461   :  { %v4358_v0 = vadd.f32 %v2351_v63, %v5697_v58  ;;  %v2577_v1 = vpop.f32.mrb[64].mxu1  ;;  %v2353_v3 = vpop.f32.mrb[49].mxu0 }
 0x462   :  { %v4390_v5 = vadd.f32 %v2577_v1, %v5701_v59  ;;  %v4359_v7 = vadd.f32 %v2353_v3, %v5704_v60  ;;  %v2579_v36 = vpop.f32.mrb[65].mxu1  ;;  %v2355_v37 = vpop.f32.mrb[50].mxu0  ;;  %v4997_v3 = vld [vmem:[#allocation13 + $0x18] sm:$0xff]  }
 0x463   :  { %v4391_v27 = vadd.f32 %v2579_v36, %v5708_v61  ;;  %v4360_v9 = vadd.f32 %v2355_v37, %v5697_v58  ;;  %v2581_v62 = vpop.f32.mrb[66].mxu1  ;;  %v2357_v10 = vpop.f32.mrb[51].mxu0  ;;  %v2656_v13 = vmax.f32 %v4358_v0, 0.0  ;;  %v4998_v37 = vld [vmem:[#allocation13 + $0x60] sm:$0xff]   ;;  %4221 = vmatpush3.bf16.msra.mxu1 %v4997_v3 }
 0x464   :  { %v4392_v38 = vadd.f32 %v2581_v62, %v5701_v59  ;;  %v4361_v39 = vadd.f32 %v2357_v10, %v5704_v60  ;;  %v2583_v12 = vpop.f32.mrb[67].mxu1  ;;  %v2658_v16 = vmax.f32 %v4390_v5, 0.0  ;;  %v2657_v17 = vmax.f32 %v4359_v7, 0.0  ;;  %v4948_v10 = vld [vmem:[#allocation11 + $0x120] ss:$8 sps:$4 sm:$0xff]   ;;  %4222 = vmatprep.subr.bf16.mxu1 %v4998_v37 }
 0x465   :  { %v2660_v14 = vmax.f32 %v4360_v9, 0.0  ;;  %v4393_v15 = vadd.f32 %v2583_v12, %v5708_v61  ;;  %v2659_v22 = vmax.f32 %v4391_v27, 0.0 }
 0x466   :  { %v2662_v18 = vmax.f32 %v4392_v38, 0.0  ;;  %v2661_v19 = vmax.f32 %v4361_v39, 0.0  ;;  %v4953_v39 = vld [vmem:[#allocation11 + $0x134] ss:$8 sps:$4 sm:$0xff]  }
 0x467   :  { %v2720_v24 = vpack.c.bf16 %v2660_v14, %v2656_v13  ;;  %v2663_v4 = vmax.f32 %v4393_v15, 0.0 }
 0x468   :  { %v5718_v26 = vpack.c.bf16 %v2662_v18, %v2658_v16  ;;  %v2721_v2 = vpack.c.bf16 %v2661_v19, %v2657_v17  ;;  %v2361_v48 = vpop.f32.mrb[52].mxu0  ;;  %v4999_v16 = vld [vmem:[#allocation13 + $0x20] sm:$0xff]  }
 0x469   :  { %v5720_v28 = vpack.c.bf16 %v2663_v4, %v2659_v22  ;;  %v4362_v46 = vadd.f32 %v2361_v48, %v5697_v58  ;;  %v2587_v20 = vpop.f32.mrb[68].mxu1  ;;  %v2363_v40 = vpop.f32.mrb[53].mxu0  ;;  %v5000_v22 = vld [vmem:[#allocation13 + $0x68] sm:$0xff]   ;;  %4223 = vmatpush3.bf16.msra.mxu1 %v4999_v16 }
 0x46a   :  { %v4394_v34 = vadd.f32 %v2587_v20, %v5701_v59  ;;  %v4363_v8 = vadd.f32 %v2363_v40, %v5704_v60  ;;  %v2589_v44 = vpop.f32.mrb[69].mxu1  ;;  %v2365_v45 = vpop.f32.mrb[54].mxu0  ;;  %3180 = vmatprep.mubr.bf16.mxu0 %v2721_v2  ;;  %v4951_v2 = vld [vmem:[#allocation11 + $0x130] ss:$8 sps:$4 sm:$0xff]   ;;  %v4956_v20 = vld [vmem:[#allocation11 + $0x144] ss:$8 sps:$4 sm:$0xff]   ;;  %4224 = vmatprep.subr.bf16.mxu1 %v5000_v22 }
 0x46b   :  { %v4395_v56 = vadd.f32 %v2589_v44, %v5708_v61  ;;  %v4364_v47 = vadd.f32 %v2365_v45, %v5697_v58  ;;  %v2591_v49 = vpop.f32.mrb[70].mxu1  ;;  %v2367_v54 = vpop.f32.mrb[55].mxu0  ;;  %3181 = vmatmul.mubr.bf16.vlgmr.msra.gmra.mrb[80].mxu0 %v2720_v24  ;;  %v2664_v52 = vmax.f32 %v4362_v46, 0.0  ;;  %v5001_v44 = vld [vmem:[#allocation13 + $0x28] sm:$0xff]  }
 0x46c   :  { %v4396_v50 = vadd.f32 %v2591_v49, %v5701_v59  ;;  %v4365_v51 = vadd.f32 %v2367_v54, %v5704_v60  ;;  %v2593_v41 = vpop.f32.mrb[71].mxu1  ;;  %3262 = vmatpush1.bf16.msra.mxu0 %v4942_v32  ;;  %v2666_v57 = vmax.f32 %v4394_v34, 0.0  ;;  %v2665_v63 = vmax.f32 %v4363_v8, 0.0  ;;  %v4960_v22 = vld [vmem:[#allocation11 + $0x160] ss:$8 sps:$4 sm:$0xff]  }
 0x46d   :  { %v2668_v53 = vmax.f32 %v4364_v47, 0.0  ;;  %v4397_v55 = vadd.f32 %v2593_v41, %v5708_v61  ;;  %3263 = vmatprep.subr.bf16.mxu0 %v4947_v42  ;;  %v2667_v5 = vmax.f32 %v4395_v56, 0.0  ;;  %v5002_v47 = vld [vmem:[#allocation13 + $0x70] sm:$0xff]   ;;  %4225 = vmatpush3.bf16.msra.mxu1 %v5001_v44 }
 0x46e   :  { %v2670_v0 = vmax.f32 %v4396_v50, 0.0  ;;  %v2669_v1 = vmax.f32 %v4365_v51, 0.0  ;;  %v4954_v50 = vld [vmem:[#allocation11 + $0x140] ss:$8 sps:$4 sm:$0xff]   ;;  %4226 = vmatprep.subr.bf16.mxu1 %v5002_v47  ;;  %v4963_v47 = vld [vmem:[#allocation11 + $0x170] ss:$8 sps:$4 sm:$0xff]  }
 0x46f   :  { %v2724_v7 = vpack.c.bf16 %v2668_v53, %v2664_v52  ;;  %v2671_v36 = vmax.f32 %v4397_v55, 0.0  ;;  %v4959_v53 = vld [vmem:[#allocation11 + $0x154] ss:$8 sps:$4 sm:$0xff]  }
 0x470   :  { %v5730_v27 = vpack.c.bf16 %v2670_v0, %v2666_v57  ;;  %v2725_v9 = vpack.c.bf16 %v2669_v1, %v2665_v63  ;;  %3264 = vmatpush1.bf16.msra.mxu0 %v4945_v23  ;;  %v2371_v62 = vpop.f32.mrb[56].mxu0  ;;  %v5003_v0 = vld [vmem:[#allocation13 + $0x30] sm:$0xff]  }
 0x471   :  { %v5732_v29 = vpack.c.bf16 %v2671_v36, %v2667_v5  ;;  %v4366_v31 = vadd.f32 %v2371_v62, %v5697_v58  ;;  %v2597_v11 = vpop.f32.mrb[72].mxu1  ;;  %v2373_v38 = vpop.f32.mrb[57].mxu0  ;;  %3265 = vmatprep.subr.bf16.mxu0 %v4950_v21  ;;  %v4957_v62 = vld [vmem:[#allocation11 + $0x150] ss:$8 sps:$4 sm:$0xff]   ;;  %4227 = vmatpush3.bf16.msra.mxu1 %v5003_v0 }
 0x472   :  { %v4398_v12 = vadd.f32 %v2597_v11, %v5701_v59  ;;  %v4367_v13 = vadd.f32 %v2373_v38, %v5704_v60  ;;  %v2599_v14 = vpop.f32.mrb[73].mxu1  ;;  %v2375_v15 = vpop.f32.mrb[58].mxu0  ;;  %3190 = vmatprep.mubr.bf16.mxu0 %v2725_v9  ;;  %v4962_v38 = vld [vmem:[#allocation11 + $0x164] ss:$8 sps:$4 sm:$0xff]  }
 0x473   :  { %v4399_v17 = vadd.f32 %v2599_v14, %v5708_v61  ;;  %v4368_v18 = vadd.f32 %v2375_v15, %v5697_v58  ;;  %v2601_v19 = vpop.f32.mrb[74].mxu1  ;;  %v2377_v35 = vpop.f32.mrb[59].mxu0  ;;  %3191 = vmatmul.mubr.bf16.gmra.mrb[84].mxu0 %v2724_v7  ;;  %v2672_v48 = vmax.f32 %v4366_v31, 0.0 }
 0x474   :  { %v4400_v24 = vadd.f32 %v2601_v19, %v5701_v59  ;;  %v4369_v4 = vadd.f32 %v2377_v35, %v5704_v60  ;;  %v2603_v25 = vpop.f32.mrb[75].mxu1  ;;  %3266 = vmatpush1.bf16.msra.mxu0 %v4948_v10  ;;  %v2674_v40 = vmax.f32 %v4398_v12, 0.0  ;;  %v2673_v42 = vmax.f32 %v4367_v13, 0.0 }
 0x475   :  { %v2676_v32 = vmax.f32 %v4368_v18, 0.0  ;;  %v4401_v46 = vadd.f32 %v2603_v25, %v5708_v61  ;;  %3267 = vmatprep.subr.bf16.mxu0 %v4953_v39  ;;  %v2675_v45 = vmax.f32 %v4399_v17, 0.0 }
 0x476   :  { %v2678_v34 = vmax.f32 %v4400_v24, 0.0  ;;  %v2677_v8 = vmax.f32 %v4369_v4, 0.0 }
 0x477   :  { %v2728_v6 = vpack.c.bf16 %v2676_v32, %v2672_v48  ;;  %v2679_v56 = vmax.f32 %v4401_v46, 0.0  ;;  %v4965_v48 = vld [vmem:[#allocation11 + $0x174] ss:$8 sps:$4 sm:$0xff]  }
 0x478   :  { %v5742_v49 = vpack.c.bf16 %v2678_v34, %v2674_v40  ;;  %v2729_v54 = vpack.c.bf16 %v2677_v8, %v2673_v42  ;;  %3268 = vmatpush1.bf16.msra.mxu0 %v4951_v2  ;;  %v2381_v43 = vpop.f32.mrb[60].mxu0 }
 0x479   :  { %v5744_v51 = vpack.c.bf16 %v2679_v56, %v2675_v45  ;;  %v4370_v41 = vadd.f32 %v2381_v43, %v5697_v58  ;;  %v2607_v23 = vpop.f32.mrb[76].mxu1  ;;  %v2383_v52 = vpop.f32.mrb[61].mxu0  ;;  %3269 = vmatprep.subr.bf16.mxu0 %v4956_v20 }
 0x47a   :  { %v4402_v55 = vadd.f32 %v2607_v23, %v5701_v59  ;;  %v4371_v21 = vadd.f32 %v2383_v52, %v5704_v60  ;;  %v2609_v57 = vpop.f32.mrb[77].mxu1  ;;  %v2385_v63 = vpop.f32.mrb[62].mxu0  ;;  %3200 = vmatprep.mubr.bf16.mxu0 %v2729_v54 }
 0x47b   :  { %v4403_v1 = vadd.f32 %v2609_v57, %v5708_v61  ;;  %v4372_v3 = vadd.f32 %v2385_v63, %v5697_v58  ;;  %v2611_v5 = vpop.f32.mrb[78].mxu1  ;;  %v2387_v7 = vpop.f32.mrb[63].mxu0  ;;  %3201 = vmatmul.mubr.bf16.gmra.mrb[88].mxu0 %v2728_v6  ;;  %v2680_v10 = vmax.f32 %v4370_v41, 0.0  ;;  %v4968_v41 = vld [vmem:[#allocation11 + $0x184] ss:$8 sps:$4 sm:$0xff]  }
 0x47c   :  { %v4404_v36 = vadd.f32 %v2611_v5, %v5701_v59  ;;  %v4373_v37 = vadd.f32 %v2387_v7, %v5704_v60  ;;  %v2613_v9 = vpop.f32.mrb[79].mxu1  ;;  %3270 = vmatpush1.bf16.msra.mxu0 %v4954_v50  ;;  %v2682_v39 = vmax.f32 %v4402_v55, 0.0  ;;  %v2681_v12 = vmax.f32 %v4371_v21, 0.0  ;;  %v4966_v5 = vld [vmem:[#allocation11 + $0x180] ss:$8 sps:$4 sm:$0xff]  }
 0x47d   :  { %v2684_v31 = vmax.f32 %v4372_v3, 0.0  ;;  %v4405_v11 = vadd.f32 %v2613_v9, %v5708_v61  ;;  %3271 = vmatprep.subr.bf16.mxu0 %v4959_v53  ;;  %v2683_v15 = vmax.f32 %v4403_v1, 0.0 }
 0x47e   :  { %v2686_v13 = vmax.f32 %v4404_v36, 0.0  ;;  %v2685_v14 = vmax.f32 %v4373_v37, 0.0 }
 0x47f   :  { %v2732_v16 = vpack.c.bf16 %v2684_v31, %v2680_v10  ;;  %v2687_v17 = vmax.f32 %v4405_v11, 0.0 }
 0x480   :  { %v5754_v18 = vpack.c.bf16 %v2686_v13, %v2682_v39  ;;  %v2733_v19 = vpack.c.bf16 %v2685_v14, %v2681_v12  ;;  %3272 = vmatpush1.bf16.msra.mxu0 %v4957_v62  ;;  %v2391_v35 = vpop.f32.mrb[64].mxu0  ;;  %v4971_v62 = vld [vmem:[#allocation11 + $0x194] ss:$8 sps:$4 sm:$0xff]  }
 0x481   :  { %v5756_v24 = vpack.c.bf16 %v2687_v17, %v2683_v15  ;;  %v4374_v4 = vadd.f32 %v2391_v35, %v5697_v58  ;;  %v2617_v25 = vpop.f32.mrb[80].mxu1  ;;  %v2393_v2 = vpop.f32.mrb[65].mxu0  ;;  %3273 = vmatprep.subr.bf16.mxu0 %v4962_v38 }
 0x482   :  { %v4406_v32 = vadd.f32 %v2617_v25, %v5701_v59  ;;  %v4375_v46 = vadd.f32 %v2393_v2, %v5704_v60  ;;  %v2619_v20 = vpop.f32.mrb[81].mxu1  ;;  %v2395_v40 = vpop.f32.mrb[66].mxu0  ;;  %3210 = vmatprep.mubr.bf16.mxu0 %v2733_v19  ;;  %v4969_v19 = vld [vmem:[#allocation11 + $0x190] ss:$8 sps:$4 sm:$0xff]   ;;  %v4974_v25 = vld [vmem:[#allocation11 + $0x1a4] ss:$8 sps:$4 sm:$0xff]  }
 0x483   :  { %v4407_v42 = vadd.f32 %v2619_v20, %v5708_v61  ;;  %v4376_v34 = vadd.f32 %v2395_v40, %v5697_v58  ;;  %v2621_v8 = vpop.f32.mrb[82].mxu1  ;;  %v2397_v44 = vpop.f32.mrb[67].mxu0  ;;  %3211 = vmatmul.mubr.bf16.gmra.mrb[92].mxu0 %v2732_v16  ;;  %v2688_v54 = vmax.f32 %v4374_v4, 0.0 }
 0x484   :  { %v4408_v45 = vadd.f32 %v2621_v8, %v5701_v59  ;;  %v4377_v6 = vadd.f32 %v2397_v44, %v5704_v60  ;;  %v2623_v56 = vpop.f32.mrb[83].mxu1  ;;  %3274 = vmatpush1.bf16.msra.mxu0 %v4960_v22  ;;  %v2690_v23 = vmax.f32 %v4406_v32, 0.0  ;;  %v2689_v52 = vmax.f32 %v4375_v46, 0.0 }
 0x485   :  { %v2692_v43 = vmax.f32 %v4376_v34, 0.0  ;;  %v4409_v50 = vadd.f32 %v2623_v56, %v5708_v61  ;;  %3275 = vmatprep.subr.bf16.mxu0 %v4965_v48  ;;  %v2691_v21 = vmax.f32 %v4407_v42, 0.0 }
 0x486   :  { %v2694_v53 = vmax.f32 %v4408_v45, 0.0  ;;  %v2693_v55 = vmax.f32 %v4377_v6, 0.0  ;;  %v4972_v45 = vld [vmem:[#allocation11 + $0x1a0] ss:$8 sps:$4 sm:$0xff]  }
 0x487   :  { %v2736_v57 = vpack.c.bf16 %v2692_v43, %v2688_v54  ;;  %v2695_v63 = vmax.f32 %v4409_v50, 0.0  ;;  %v4977_v43 = vld [vmem:[#allocation11 + $0x1b4] ss:$8 sps:$4 sm:$0xff]  }
 0x488   :  { %v5766_v0 = vpack.c.bf16 %v2694_v53, %v2690_v23  ;;  %v2737_v1 = vpack.c.bf16 %v2693_v55, %v2689_v52  ;;  %3276 = vmatpush1.bf16.msra.mxu0 %v4963_v47  ;;  %v2401_v3 = vpop.f32.mrb[68].mxu0 }
 0x489   :  { %v5768_v7 = vpack.c.bf16 %v2695_v63, %v2691_v21  ;;  %v4378_v36 = vadd.f32 %v2401_v3, %v5697_v58  ;;  %v2627_v37 = vpop.f32.mrb[84].mxu1  ;;  %v2403_v9 = vpop.f32.mrb[69].mxu0  ;;  %3277 = vmatprep.subr.bf16.mxu0 %v4968_v41 }
 0x48a   :  { %v4410_v10 = vadd.f32 %v2627_v37, %v5701_v59  ;;  %v4379_v31 = vadd.f32 %v2403_v9, %v5704_v60  ;;  %v2629_v11 = vpop.f32.mrb[85].mxu1  ;;  %v2405_v38 = vpop.f32.mrb[70].mxu0  ;;  %3220 = vmatprep.mubr.bf16.mxu0 %v2737_v1 }
 0x48b   :  { %v4411_v39 = vadd.f32 %v2629_v11, %v5708_v61  ;;  %v4380_v12 = vadd.f32 %v2405_v38, %v5697_v58  ;;  %v2631_v13 = vpop.f32.mrb[86].mxu1  ;;  %v2407_v14 = vpop.f32.mrb[71].mxu0  ;;  %3221 = vmatmul.mubr.bf16.gmra.mrb[96].mxu0 %v2736_v57  ;;  %v2696_v35 = vmax.f32 %v4378_v36, 0.0 }
 0x48c   :  { %v4412_v15 = vadd.f32 %v2631_v13, %v5701_v59  ;;  %v4381_v16 = vadd.f32 %v2407_v14, %v5704_v60  ;;  %v2633_v17 = vpop.f32.mrb[87].mxu1  ;;  %3278 = vmatpush1.bf16.msra.mxu0 %v4966_v5  ;;  %v2698_v2 = vmax.f32 %v4410_v10, 0.0  ;;  %v2697_v48 = vmax.f32 %v4379_v31, 0.0  ;;  %v4975_v5 = vld [vmem:[#allocation11 + $0x1b0] ss:$8 sps:$4 sm:$0xff]  }
 0x48d   :  { %v2700_v22 = vmax.f32 %v4380_v12, 0.0  ;;  %v4413_v4 = vadd.f32 %v2633_v17, %v5708_v61  ;;  %3279 = vmatprep.subr.bf16.mxu0 %v4971_v62  ;;  %v2699_v20 = vmax.f32 %v4411_v39, 0.0  ;;  %v4980_v62 = vld [vmem:[#allocation11 + $0x1c4] ss:$8 sps:$4 sm:$0xff]   ;;  %v4978_v17 = vld [vmem:[#allocation11 + $0x1c0] ss:$8 sps:$4 sm:$0xff]  }
 0x48e   :  { %v2702_v32 = vmax.f32 %v4412_v15, 0.0  ;;  %v2701_v46 = vmax.f32 %v4381_v16, 0.0 }
 0x48f   :  { %v2740_v40 = vpack.c.bf16 %v2700_v22, %v2696_v35  ;;  %v2703_v42 = vmax.f32 %v4413_v4, 0.0 }
 0x490   :  { %v5778_v34 = vpack.c.bf16 %v2702_v32, %v2698_v2  ;;  %v2741_v8 = vpack.c.bf16 %v2701_v46, %v2697_v48  ;;  %3280 = vmatpush1.bf16.msra.mxu0 %v4969_v19  ;;  %v2411_v44 = vpop.f32.mrb[72].mxu0 }
 0x491   :  { %v5780_v6 = vpack.c.bf16 %v2703_v42, %v2699_v20  ;;  %v4382_v56 = vadd.f32 %v2411_v44, %v5697_v58  ;;  %v2637_v47 = vpop.f32.mrb[88].mxu1  ;;  %v2413_v54 = vpop.f32.mrb[73].mxu0  ;;  %3281 = vmatprep.subr.bf16.mxu0 %v4974_v25  ;;  %v4983_v25 = vld [vmem:[#allocation11 + $0x1d4] ss:$8 sps:$4 sm:$0xff]  }
 0x492   :  { %v4414_v50 = vadd.f32 %v2637_v47, %v5701_v59  ;;  %v4383_v41 = vadd.f32 %v2413_v54, %v5704_v60  ;;  %v2639_v23 = vpop.f32.mrb[89].mxu1  ;;  %v2415_v52 = vpop.f32.mrb[74].mxu0  ;;  %3230 = vmatprep.mubr.bf16.mxu0 %v2741_v8  ;;  %v4981_v47 = vld [vmem:[#allocation11 + $0x1d0] ss:$8 sps:$4 sm:$0xff]  }
 0x493   :  { %v4415_v53 = vadd.f32 %v2639_v23, %v5708_v61  ;;  %v4384_v55 = vadd.f32 %v2415_v52, %v5697_v58  ;;  %v2641_v21 = vpop.f32.mrb[90].mxu1  ;;  %v2417_v57 = vpop.f32.mrb[75].mxu0  ;;  %3231 = vmatmul.mubr.bf16.gmra.mrb[100].mxu0 %v2740_v40  ;;  %v2704_v36 = vmax.f32 %v4382_v56, 0.0 }
 0x494   :  { %v4416_v63 = vadd.f32 %v2641_v21, %v5701_v59  ;;  %v4385_v1 = vadd.f32 %v2417_v57, %v5704_v60  ;;  %v2643_v3 = vpop.f32.mrb[91].mxu1  ;;  %3282 = vmatpush1.bf16.msra.mxu0 %v4972_v45  ;;  %v2706_v10 = vmax.f32 %v4414_v50, 0.0  ;;  %v2705_v31 = vmax.f32 %v4383_v41, 0.0  ;;  %v4986_v41 = vld [vmem:[#allocation11 + $0x1e4] ss:$8 sps:$4 sm:$0xff]  }
 0x495   :  { %v2708_v37 = vmax.f32 %v4384_v55, 0.0  ;;  %v4417_v9 = vadd.f32 %v2643_v3, %v5708_v61  ;;  %3283 = vmatprep.subr.bf16.mxu0 %v4977_v43  ;;  %v2707_v39 = vmax.f32 %v4415_v53, 0.0  ;;  %v4989_v3 = vld [vmem:[#allocation11 + $0x1f4] ss:$8 sps:$4 sm:$0xff]  }
 0x496   :  { %v2710_v11 = vmax.f32 %v4416_v63, 0.0  ;;  %v2709_v38 = vmax.f32 %v4385_v1, 0.0 }
 0x497   :  { %v2744_v12 = vpack.c.bf16 %v2708_v37, %v2704_v36  ;;  %v2711_v13 = vmax.f32 %v4417_v9, 0.0 }
 0x498   :  { %v5790_v14 = vpack.c.bf16 %v2710_v11, %v2706_v10  ;;  %v2745_v15 = vpack.c.bf16 %v2709_v38, %v2705_v31  ;;  %3284 = vmatpush1.bf16.msra.mxu0 %v4975_v5  ;;  %v2421_v16 = vpop.f32.mrb[76].mxu0 }
 0x499   :  { %v2747_v19 = vpack.c.bf16 %v2711_v13, %v2707_v39  ;;  %v4386_v35 = vadd.f32 %v2421_v16, %v5697_v58  ;;  %v2647_v22 = vpop.f32.mrb[92].mxu1  ;;  %v2423_v4 = vpop.f32.mrb[77].mxu0  ;;  %3285 = vmatprep.subr.bf16.mxu0 %v4980_v62  ;;  %v5007_v39 = vld [vmem:[#allocation14 + $0x8] sm:$0xff]  }
 0x49a   :  { %v4418_v2 = vadd.f32 %v2647_v22, %v5701_v59  ;;  %v4387_v48 = vadd.f32 %v2423_v4, %v5704_v60  ;;  %v2649_v32 = vpop.f32.mrb[93].mxu1  ;;  %v2425_v46 = vpop.f32.mrb[78].mxu0  ;;  %3240 = vmatprep.mubr.bf16.mxu0 %v2745_v15 }
 0x49b   :  { %v4419_v20 = vadd.f32 %v2649_v32, %v5708_v61  ;;  %v4388_v40 = vadd.f32 %v2425_v46, %v5697_v58  ;;  %v2651_v42 = vpop.f32.mrb[94].mxu1  ;;  %v2427_v8 = vpop.f32.mrb[79].mxu0  ;;  %3241 = vmatmul.mubr.bf16.gmra.mrb[104].mxu0 %v2744_v12  ;;  %v2712_v54 = vmax.f32 %v4386_v35, 0.0  ;;  %v5008_v35 = vld [vmem:[#allocation14 + $0x10] sm:$0xff]  }
 0x49c   :  { %v4420_v44 = vadd.f32 %v2651_v42, %v5701_v59  ;;  %v4389_v45 = vadd.f32 %v2427_v8, %v5704_v60  ;;  %v2653_v56 = vpop.f32.mrb[95].mxu1  ;;  %3286 = vmatpush1.bf16.msra.mxu0 %v4978_v17  ;;  %v2714_v23 = vmax.f32 %v4418_v2, 0.0  ;;  %v2713_v52 = vmax.f32 %v4387_v48, 0.0  ;;  %v4984_v60 = vld [vmem:[#allocation11 + $0x1e0] ss:$8 sps:$4 sm:$0xff]  }
 0x49d   :  { %v2716_v43 = vmax.f32 %v4388_v40, 0.0  ;;  %v4421_v50 = vadd.f32 %v2653_v56, %v5708_v61  ;;  %3287 = vmatprep.subr.bf16.mxu0 %v4983_v25  ;;  %v2715_v55 = vmax.f32 %v4419_v20, 0.0  ;;  %v4987_v61 = vld [vmem:[#allocation11 + $0x1f0] ss:$8 sps:$4 sm:$0xff]  }
 0x49e   :  { %v2718_v53 = vmax.f32 %v4420_v44, 0.0  ;;  %v2717_v58 = vmax.f32 %v4389_v45, 0.0 }
 0x49f   :  { %v2748_v21 = vpack.c.bf16 %v2716_v43, %v2712_v54  ;;  %v2719_v57 = vmax.f32 %v4421_v50, 0.0 }
 0x4a0   :  { %v2750_v63 = vpack.c.bf16 %v2718_v53, %v2714_v23  ;;  %v2749_v59 = vpack.c.bf16 %v2717_v58, %v2713_v52  ;;  %3288 = vmatpush1.bf16.msra.mxu0 %v4981_v47 }
 0x4a1   :  { %v2751_v1 = vpack.c.bf16 %v2719_v57, %v2715_v55  ;;  %3289 = vmatprep.subr.bf16.mxu0 %v4986_v41 }
 0x4a2   :  { %3250 = vmatprep.mubr.bf16.mxu0 %v2749_v59 }
 0x4a3   :  { %3251 = vmatmul.mubr.bf16.gmra.mrb[108].mxu0 %v2748_v21 }
 0x4a4   :  { %3290 = vmatpush1.bf16.msra.mxu0 %v4984_v60  ;;  %3293 = vmatprep.mubr.bf16.mxu0 %v5720_v28  ;;  %v5005_v28 = vld [vmem:[#allocation13 + $0x38] sm:$0xff]  }
 0x4a5   :  { %3291 = vmatprep.subr.bf16.mxu0 %v4989_v3 }
 0x4a8   :  { %3292 = vmatpush1.bf16.msra.mxu0 %v4987_v61 }
 0x4ab   :  { %3294 = vmatmul.mubr.bf16.vlgmr.msra.gmra.mrb[80].mxu0 %v5718_v26  ;;  %v5004_v26 = vld [vmem:[#allocation13 + $0x78] sm:$0xff]  }
 0x4ac   :  { %3303 = vmatprep.mubr.bf16.mxu0 %v5732_v29  ;;  %4228 = vmatprep.subr.bf16.mxu1 %v5004_v26  ;;  %v2816_v29 = vld [vmem:[%s5903_s10] sm:$0x3] }
 0x4ad   :  { %4229 = vmatpush3.bf16.msra.mxu1 %v5005_v28 }
 0x4b3   :  { %3304 = vmatmul.mubr.bf16.gmra.mrb[84].mxu0 %v5730_v27  ;;  %v5006_v27 = vld [vmem:[#allocation14] sm:$0xff]  }
 0x4b4   :  { %3313 = vmatprep.mubr.bf16.mxu0 %v5744_v51  ;;  %4326 = vmatprep.subr.bf16.mxu1 %v5006_v27  ;;  %v5820_v51 = vrot.slane %v2816_v29, %v5506_v33 }
 0x4bb   :  { %3314 = vmatmul.mubr.bf16.gmra.mrb[88].mxu0 %v5742_v49  ;;  %v5817_v49 = vrot.slane %v2816_v29, %v5500_v30 }
 0x4bc   :  { %3323 = vmatprep.mubr.bf16.mxu0 %v5756_v24 }
 0x4c3   :  { %3324 = vmatmul.mubr.bf16.gmra.mrb[92].mxu0 %v5754_v18 }
 0x4c4   :  { %3333 = vmatprep.mubr.bf16.mxu0 %v5768_v7 }
 0x4cb   :  { %3334 = vmatmul.mubr.bf16.gmra.mrb[96].mxu0 %v5766_v0 }
 0x4cc   :  { %3343 = vmatprep.mubr.bf16.mxu0 %v5780_v6 }
 0x4d3   :  { %3344 = vmatmul.mubr.bf16.gmra.mrb[100].mxu0 %v5778_v34 }
 0x4d4   :  { %3353 = vmatprep.mubr.bf16.mxu0 %v2747_v19 }
 0x4db   :  { %3354 = vmatmul.mubr.bf16.gmra.mrb[104].mxu0 %v5790_v14 }
 0x4dc   :  { %3363 = vmatprep.mubr.bf16.mxu0 %v2751_v1 }
 0x4e3   :  { %3364 = vmatmul.mubr.bf16.gmra.mrb[108].mxu0 %v2750_v63 }
 0x57e   :  { %v3295_v18 = vpop.f32.mrb[80].mxu0 }
 0x57f   :  { %v4422_v24 = vadd.f32 %v3295_v18, %v5817_v49  ;;  %v3297_v0 = vpop.f32.mrb[81].mxu0 }
 0x580   :  { %v4423_v7 = vadd.f32 %v3297_v0, %v5820_v51  ;;  %v3299_v34 = vpop.f32.mrb[82].mxu0 }
 0x581   :  { %v4424_v6 = vadd.f32 %v3299_v34, %v5817_v49  ;;  %v3301_v5 = vpop.f32.mrb[83].mxu0  ;;  %v3374_v37 = vmax.f32 %v4422_v24, 0.0 }
 0x582   :  { %v4425_v36 = vadd.f32 %v3301_v5, %v5820_v51  ;;  %v3375_v62 = vmax.f32 %v4423_v7, 0.0 }
 0x583   :  { %v3376_v9 = vmax.f32 %v4424_v6, 0.0 }
 0x584   :  { %v3377_v30 = vmax.f32 %v4425_v36, 0.0 }
 0x585   :  { %v3406_v10 = vpack.c.bf16 %v3376_v9, %v3374_v37 }
 0x586   :  { %v3407_v31 = vpack.c.bf16 %v3377_v30, %v3375_v62  ;;  %v3305_v33 = vpop.f32.mrb[84].mxu0 }
 0x587   :  { %v4426_v11 = vadd.f32 %v3305_v33, %v5817_v49  ;;  %v3307_v38 = vpop.f32.mrb[85].mxu0 }
 0x588   :  { %v4427_v12 = vadd.f32 %v3307_v38, %v5820_v51  ;;  %v3309_v13 = vpop.f32.mrb[86].mxu0  ;;  %3589 = vmatprep.mubr.bf16.mxu1 %v3407_v31 }
 0x589   :  { %v4428_v14 = vadd.f32 %v3309_v13, %v5817_v49  ;;  %v3311_v15 = vpop.f32.mrb[87].mxu0  ;;  %3590 = vmatmul.mubr.bf16.vlgmr.msra.gmra.mrb[96].mxu1 %v3406_v10  ;;  %v3378_v17 = vmax.f32 %v4426_v11, 0.0 }
 0x58a   :  { %v4429_v16 = vadd.f32 %v3311_v15, %v5820_v51  ;;  %4327 = vmatpush3.bf16.msra.mxu1 %v5006_v27  ;;  %v3379_v22 = vmax.f32 %v4427_v12, 0.0 }
 0x58b   :  { %v3380_v19 = vmax.f32 %v4428_v14, 0.0  ;;  %4328 = vmatprep.subr.bf16.mxu1 %v5007_v39 }
 0x58c   :  { %v3381_v4 = vmax.f32 %v4429_v16, 0.0 }
 0x58d   :  { %v3408_v25 = vpack.c.bf16 %v3380_v19, %v3378_v17 }
 0x58e   :  { %v3409_v2 = vpack.c.bf16 %v3381_v4, %v3379_v22  ;;  %v3315_v48 = vpop.f32.mrb[88].mxu0  ;;  %4329 = vmatpush3.bf16.msra.mxu1 %v5007_v39 }
 0x58f   :  { %v4430_v32 = vadd.f32 %v3315_v48, %v5817_v49  ;;  %v3317_v46 = vpop.f32.mrb[89].mxu0  ;;  %4330 = vmatprep.subr.bf16.mxu1 %v5008_v35 }
 0x590   :  { %v4431_v20 = vadd.f32 %v3317_v46, %v5820_v51  ;;  %v3319_v40 = vpop.f32.mrb[90].mxu0  ;;  %3597 = vmatprep.mubr.bf16.mxu1 %v3409_v2 }
 0x591   :  { %v4432_v42 = vadd.f32 %v3319_v40, %v5817_v49  ;;  %v3321_v8 = vpop.f32.mrb[91].mxu0  ;;  %3598 = vmatmul.mubr.bf16.gmra.mrb[100].mxu1 %v3408_v25  ;;  %v3382_v45 = vmax.f32 %v4430_v32, 0.0 }
 0x592   :  { %v4433_v44 = vadd.f32 %v3321_v8, %v5820_v51  ;;  %4331 = vmatpush3.bf16.msra.mxu1 %v5008_v35  ;;  %v3383_v47 = vmax.f32 %v4431_v20, 0.0 }
 0x593   :  { %v3384_v56 = vmax.f32 %v4432_v42, 0.0 }
 0x594   :  { %v3385_v54 = vmax.f32 %v4433_v44, 0.0 }
 0x595   :  { %v3410_v43 = vpack.c.bf16 %v3384_v56, %v3382_v45 }
 0x596   :  { %v3411_v50 = vpack.c.bf16 %v3385_v54, %v3383_v47  ;;  %v3325_v41 = vpop.f32.mrb[92].mxu0 }
 0x597   :  { %v4434_v23 = vadd.f32 %v3325_v41, %v5817_v49  ;;  %v3327_v52 = vpop.f32.mrb[93].mxu0 }
 0x598   :  { %v4435_v53 = vadd.f32 %v3327_v52, %v5820_v51  ;;  %v3329_v58 = vpop.f32.mrb[94].mxu0  ;;  %3605 = vmatprep.mubr.bf16.mxu1 %v3411_v50 }
 0x599   :  { %v4436_v55 = vadd.f32 %v3329_v58, %v5817_v49  ;;  %v3331_v21 = vpop.f32.mrb[95].mxu0  ;;  %3606 = vmatmul.mubr.bf16.gmra.mrb[104].mxu1 %v3410_v43  ;;  %v3386_v63 = vmax.f32 %v4434_v23, 0.0 }
 0x59a   :  { %v4437_v57 = vadd.f32 %v3331_v21, %v5820_v51  ;;  %v3387_v60 = vmax.f32 %v4435_v53, 0.0 }
 0x59b   :  { %v3388_v59 = vmax.f32 %v4436_v55, 0.0 }
 0x59c   :  { %v3389_v1 = vmax.f32 %v4437_v57, 0.0 }
 0x59d   :  { %v3412_v3 = vpack.c.bf16 %v3388_v59, %v3386_v63  ;;  %v5009_v63 = vld [vmem:[#allocation14 + $0x18] sm:$0xff]   ;;  %v5010_v59 = vld [vmem:[#allocation14 + $0x20] sm:$0xff]  }
 0x59e   :  { %v3413_v61 = vpack.c.bf16 %v3389_v1, %v3387_v60  ;;  %v3335_v26 = vpop.f32.mrb[96].mxu0  ;;  %4332 = vmatprep.subr.bf16.mxu1 %v5009_v63  ;;  %v5011_v60 = vld [vmem:[#allocation14 + $0x28] sm:$0xff]  }
 0x59f   :  { %v4438_v28 = vadd.f32 %v3335_v26, %v5817_v49  ;;  %v3337_v27 = vpop.f32.mrb[97].mxu0  ;;  %4333 = vmatpush3.bf16.msra.mxu1 %v5009_v63 }
 0x5a0   :  { %v4439_v29 = vadd.f32 %v3337_v27, %v5820_v51  ;;  %v3339_v18 = vpop.f32.mrb[98].mxu0  ;;  %3613 = vmatprep.mubr.bf16.mxu1 %v3413_v61  ;;  %4334 = vmatprep.subr.bf16.mxu1 %v5010_v59 }
 0x5a1   :  { %v4440_v24 = vadd.f32 %v3339_v18, %v5817_v49  ;;  %v3341_v0 = vpop.f32.mrb[99].mxu0  ;;  %3614 = vmatmul.mubr.bf16.gmra.mrb[108].mxu1 %v3412_v3  ;;  %v3390_v34 = vmax.f32 %v4438_v28, 0.0  ;;  %v5857_v3 = vld [vmem:[%s5905_s12] ss:$0 sm:$0xff] }
 0x5a2   :  { %v4441_v7 = vadd.f32 %v3341_v0, %v5820_v51  ;;  %v3391_v5 = vmax.f32 %v4439_v29, 0.0 }
 0x5a3   :  { %v3392_v6 = vmax.f32 %v4440_v24, 0.0  ;;  %4335 = vmatpush3.bf16.msra.mxu1 %v5010_v59 }
 0x5a4   :  { %v3393_v36 = vmax.f32 %v4441_v7, 0.0  ;;  %4336 = vmatprep.subr.bf16.mxu1 %v5011_v60 }
 0x5a5   :  { %v3414_v37 = vpack.c.bf16 %v3392_v6, %v3390_v34 }
 0x5a6   :  { %v3415_v9 = vpack.c.bf16 %v3393_v36, %v3391_v5  ;;  %v3345_v62 = vpop.f32.mrb[100].mxu0 }
 0x5a7   :  { %v4442_v30 = vadd.f32 %v3345_v62, %v5817_v49  ;;  %v3347_v10 = vpop.f32.mrb[101].mxu0  ;;  %4337 = vmatpush3.bf16.msra.mxu1 %v5011_v60 }
 0x5a8   :  { %v4443_v31 = vadd.f32 %v3347_v10, %v5820_v51  ;;  %v3349_v33 = vpop.f32.mrb[102].mxu0  ;;  %3621 = vmatprep.mubr.bf16.mxu1 %v3415_v9 }
 0x5a9   :  { %v4444_v11 = vadd.f32 %v3349_v33, %v5817_v49  ;;  %v3351_v38 = vpop.f32.mrb[103].mxu0  ;;  %3622 = vmatmul.mubr.bf16.gmra.mrb[112].mxu1 %v3414_v37  ;;  %v3394_v12 = vmax.f32 %v4442_v30, 0.0 }
 0x5aa   :  { %v4445_v39 = vadd.f32 %v3351_v38, %v5820_v51  ;;  %v3395_v14 = vmax.f32 %v4443_v31, 0.0 }
 0x5ab   :  { %v3396_v13 = vmax.f32 %v4444_v11, 0.0 }
 0x5ac   :  { %v3397_v15 = vmax.f32 %v4445_v39, 0.0 }
 0x5ad   :  { %v3416_v16 = vpack.c.bf16 %v3396_v13, %v3394_v12 }
 0x5ae   :  { %v3417_v17 = vpack.c.bf16 %v3397_v15, %v3395_v14  ;;  %v3355_v19 = vpop.f32.mrb[104].mxu0 }
 0x5af   :  { %v4446_v35 = vadd.f32 %v3355_v19, %v5817_v49  ;;  %v3357_v22 = vpop.f32.mrb[105].mxu0 }
 0x5b0   :  { %v4447_v4 = vadd.f32 %v3357_v22, %v5820_v51  ;;  %v3359_v25 = vpop.f32.mrb[106].mxu0  ;;  %3629 = vmatprep.mubr.bf16.mxu1 %v3417_v17 }
 0x5b1   :  { %v4448_v2 = vadd.f32 %v3359_v25, %v5817_v49  ;;  %v3361_v48 = vpop.f32.mrb[107].mxu0  ;;  %3630 = vmatmul.mubr.bf16.gmra.mrb[116].mxu1 %v3416_v16  ;;  %v3398_v46 = vmax.f32 %v4446_v35, 0.0 }
 0x5b2   :  { %v4449_v32 = vadd.f32 %v3361_v48, %v5820_v51  ;;  %v3399_v40 = vmax.f32 %v4447_v4, 0.0 }
 0x5b3   :  { %v3400_v20 = vmax.f32 %v4448_v2, 0.0 }
 0x5b4   :  { %v3401_v42 = vmax.f32 %v4449_v32, 0.0 }
 0x5b5   :  { %v3418_v8 = vpack.c.bf16 %v3400_v20, %v3398_v46 }
 0x5b6   :  { %v3419_v44 = vpack.c.bf16 %v3401_v42, %v3399_v40  ;;  %v3365_v45 = vpop.f32.mrb[108].mxu0 }
 0x5b7   :  { %v4450_v56 = vadd.f32 %v3365_v45, %v5817_v49  ;;  %v3367_v47 = vpop.f32.mrb[109].mxu0 }
 0x5b8   :  { %v4451_v54 = vadd.f32 %v3367_v47, %v5820_v51  ;;  %v3369_v43 = vpop.f32.mrb[110].mxu0  ;;  %3637 = vmatprep.mubr.bf16.mxu1 %v3419_v44 }
 0x5b9   :  { %v4452_v50 = vadd.f32 %v3369_v43, %v5817_v49  ;;  %v3371_v41 = vpop.f32.mrb[111].mxu0  ;;  %3638 = vmatmul.mubr.bf16.gmra.mrb[120].mxu1 %v3418_v8  ;;  %v3402_v52 = vmax.f32 %v4450_v56, 0.0  ;;  %v5012_v49 = vld [vmem:[#allocation14 + $0x30] sm:$0xff]  }
 0x5ba   :  { %v4453_v23 = vadd.f32 %v3371_v41, %v5820_v51  ;;  %v3403_v58 = vmax.f32 %v4451_v54, 0.0  ;;  %4338 = vmatprep.subr.bf16.mxu1 %v5012_v49  ;;  %v5013_v51 = vld [vmem:[#allocation14 + $0x38] sm:$0xff]  }
 0x5bb   :  { %v3404_v53 = vmax.f32 %v4452_v50, 0.0  ;;  %4339 = vmatpush3.bf16.msra.mxu1 %v5012_v49 }
 0x5bc   :  { %v3405_v55 = vmax.f32 %v4453_v23, 0.0  ;;  %4340 = vmatprep.subr.bf16.mxu1 %v5013_v51 }
 0x5bd   :  { %v3420_v21 = vpack.c.bf16 %v3404_v53, %v3402_v52 }
 0x5be   :  { %v3421_v57 = vpack.c.bf16 %v3405_v55, %v3403_v58 }
 0x5bf   :  { %4341 = vmatpush3.bf16.msra.mxu1 %v5013_v51 }
 0x5c0   :  { %3645 = vmatprep.mubr.bf16.mxu1 %v3421_v57 }
 0x5c1   :  { %3646 = vmatmul.mubr.bf16.gmra.mrb[124].mxu1 %v3420_v21 }
 0x65c   :  { %v4230_v1 = vpop.f32.mrb[96].mxu1 }
 0x65d   :  { %v4231_v61 = vpop.f32.mrb[97].mxu1 }
 0x65e   :  { %v4232_v26 = vadd.f32 %v4231_v61, %v4230_v1  ;;  %v4233_v28 = vpop.f32.mrb[98].mxu1 }
 0x65f   :  { %v4234_v27 = vpop.f32.mrb[99].mxu1 }
 0x660   :  { %v3592_v29 = vadd.f32 %v4232_v26, %v5857_v3  ;;  %v4235_v18 = vadd.f32 %v4234_v27, %v4233_v28 }
 0x662   :  { %v3595_v24 = vadd.f32 %v4235_v18, %v5857_v3  ;;  %v3654_v0 = vmax.f32 %v3592_v29, 0.0 }
 0x664   :  { %v3655_v7 = vmax.f32 %v3595_v24, 0.0  ;;  %v4236_v34 = vpop.f32.mrb[100].mxu1 }
 0x665   :  { %v4237_v6 = vpop.f32.mrb[101].mxu1 }
 0x666   :  { %v4238_v5 = vadd.f32 %v4237_v6, %v4236_v34  ;;  %v4239_v36 = vpop.f32.mrb[102].mxu1  ;;  %v3670_v37 = vpack.c.bf16 %v3655_v7, %v3654_v0 }
 0x667   :  { %v4240_v9 = vpop.f32.mrb[103].mxu1 }
 0x668   :  { %v3600_v62 = vadd.f32 %v4238_v5, %v5857_v3  ;;  %v4241_v30 = vadd.f32 %v4240_v9, %v4239_v36  ;;  %4342 = vmatprep.mubr.bf16.mxu1 %v3670_v37 }
 0x66a   :  { %v3603_v10 = vadd.f32 %v4241_v30, %v5857_v3  ;;  %v3656_v31 = vmax.f32 %v3600_v62, 0.0 }
 0x66c   :  { %v3657_v33 = vmax.f32 %v3603_v10, 0.0  ;;  %v4242_v11 = vpop.f32.mrb[104].mxu1 }
 0x66d   :  { %v4243_v38 = vpop.f32.mrb[105].mxu1 }
 0x66e   :  { %v3671_v39 = vpack.c.bf16 %v3657_v33, %v3656_v31  ;;  %v4244_v12 = vadd.f32 %v4243_v38, %v4242_v11  ;;  %v4245_v13 = vpop.f32.mrb[106].mxu1 }
 0x66f   :  { %v4246_v14 = vpop.f32.mrb[107].mxu1 }
 0x670   :  { %v3608_v15 = vadd.f32 %v4244_v12, %v5857_v3  ;;  %v4247_v16 = vadd.f32 %v4246_v14, %v4245_v13  ;;  %4343 = vmatmul.mubr.bf16.vlgmr.msra.gmra.mrb[128].mxu1 %v3671_v39  ;;  %v4189_v13 = vld [vmem:[%s5907_s14] ss:$0 sm:$0xff]  ;;  %s5239_s14 = smov [#allocation16]  }
 0x671   :  { %s3867_s7 = sshll.u32 %s5239_s14, 4  ;;  %s3868_s7 = int_to_ptr.vmem [resolvable:$true] %s3867_s7 }
 0x672   :  { %v3611_v17 = vadd.f32 %v4247_v16, %v5857_v3  ;;  %v3658_v19 = vmax.f32 %v3608_v15, 0.0  ;;  %s5190_s22 = scalar_lea.vmem %s3868_s7, 2048  ;;  %p5195_p9 = scmp.lt.s32.totalorder %s3868_s7, %s3868_s7 }
 0x673   :  { %p5191_p8 = scmp.ne.s32.totalorder %s3868_s7, %s5190_s22  ;;  %p5196_p10 = scmp.lt.s32.totalorder %s5190_s22, %s5190_s22 }
 0x674   :  { %v3659_v35 = vmax.f32 %v3611_v17, 0.0  ;;  %v4248_v22 = vpop.f32.mrb[108].mxu1 }
 0x675   :  { %v4249_v4 = vpop.f32.mrb[109].mxu1  ;;  %p5197_p11 = por %p5196_p10, %p5195_p9 }
 0x676   :  { %v4250_v25 = vadd.f32 %v4249_v4, %v4248_v22  ;;  %v4251_v2 = vpop.f32.mrb[110].mxu1  ;;  %v3672_v48 = vpack.c.bf16 %v3659_v35, %v3658_v19 }
 0x677   :  { %v4252_v32 = vpop.f32.mrb[111].mxu1  ;;  %p5198_p12 = pnand %p5197_p11, %p5191_p8 }
 0x678   :  { %v3616_v46 = vadd.f32 %v4250_v25, %v5857_v3  ;;  %v4253_v20 = vadd.f32 %v4252_v32, %v4251_v2  ;;  %4346 = vmatprep.mubr.bf16.mxu1 %v3672_v48 }
 0x67a   :  { %v3619_v40 = vadd.f32 %v4253_v20, %v5857_v3  ;;  %v3660_v42 = vmax.f32 %v3616_v46, 0.0 }
 0x67c   :  { %v3661_v8 = vmax.f32 %v3619_v40, 0.0  ;;  %v4254_v44 = vpop.f32.mrb[112].mxu1 }
 0x67d   :  { %v4255_v45 = vpop.f32.mrb[113].mxu1 }
 0x67e   :  { %v4256_v56 = vadd.f32 %v4255_v45, %v4254_v44  ;;  %v4257_v47 = vpop.f32.mrb[114].mxu1  ;;  %v3673_v54 = vpack.c.bf16 %v3661_v8, %v3660_v42 }
 0x67f   :  { %v4258_v43 = vpop.f32.mrb[115].mxu1 }
 0x680   :  { %v3624_v50 = vadd.f32 %v4256_v56, %v5857_v3  ;;  %v4259_v41 = vadd.f32 %v4258_v43, %v4257_v47  ;;  %4347 = vmatmul.mubr.bf16.gmra.mrb[132].mxu1 %v3673_v54 }
 0x682   :  { %v3627_v23 = vadd.f32 %v4259_v41, %v5857_v3  ;;  %v3662_v52 = vmax.f32 %v3624_v50, 0.0 }
 0x684   :  { %v3663_v53 = vmax.f32 %v3627_v23, 0.0  ;;  %v4260_v58 = vpop.f32.mrb[116].mxu1 }
 0x685   :  { %v4261_v55 = vpop.f32.mrb[117].mxu1 }
 0x686   :  { %v4262_v21 = vadd.f32 %v4261_v55, %v4260_v58  ;;  %v4263_v57 = vpop.f32.mrb[118].mxu1  ;;  %v3674_v63 = vpack.c.bf16 %v3663_v53, %v3662_v52 }
 0x687   :  { %v4264_v59 = vpop.f32.mrb[119].mxu1 }
 0x688   :  { %v3632_v60 = vadd.f32 %v4262_v21, %v5857_v3  ;;  %v4265_v49 = vadd.f32 %v4264_v59, %v4263_v57  ;;  %4350 = vmatprep.mubr.bf16.mxu1 %v3674_v63 }
 0x68a   :  { %v3635_v51 = vadd.f32 %v4265_v49, %v5857_v3  ;;  %v3664_v1 = vmax.f32 %v3632_v60, 0.0 }
 0x68c   :  { %v3665_v61 = vmax.f32 %v3635_v51, 0.0  ;;  %v4266_v26 = vpop.f32.mrb[120].mxu1 }
 0x68d   :  { %v4267_v28 = vpop.f32.mrb[121].mxu1 }
 0x68e   :  { %v4268_v27 = vadd.f32 %v4267_v28, %v4266_v26  ;;  %v4269_v29 = vpop.f32.mrb[122].mxu1  ;;  %v3675_v18 = vpack.c.bf16 %v3665_v61, %v3664_v1 }
 0x68f   :  { %v4270_v24 = vpop.f32.mrb[123].mxu1 }
 0x690   :  { %v3640_v0 = vadd.f32 %v4268_v27, %v5857_v3  ;;  %v4271_v7 = vadd.f32 %v4270_v24, %v4269_v29  ;;  %4351 = vmatmul.mubr.bf16.gmra.mrb[136].mxu1 %v3675_v18 }
 0x692   :  { %v3643_v34 = vadd.f32 %v4271_v7, %v5857_v3  ;;  %v3666_v6 = vmax.f32 %v3640_v0, 0.0 }
 0x694   :  { %v3667_v5 = vmax.f32 %v3643_v34, 0.0  ;;  %v4272_v36 = vpop.f32.mrb[124].mxu1 }
 0x695   :  { %v4273_v37 = vpop.f32.mrb[125].mxu1 }
 0x696   :  { %v4274_v9 = vadd.f32 %v4273_v37, %v4272_v36  ;;  %v4275_v62 = vpop.f32.mrb[126].mxu1  ;;  %v3676_v30 = vpack.c.bf16 %v3667_v5, %v3666_v6 }
 0x697   :  { %v4276_v10 = vpop.f32.mrb[127].mxu1 }
 0x698   :  { %v3648_v31 = vadd.f32 %v4274_v9, %v5857_v3  ;;  %v4277_v33 = vadd.f32 %v4276_v10, %v4275_v62  ;;  %4354 = vmatprep.mubr.bf16.mxu1 %v3676_v30 }
 0x69a   :  { %v3651_v11 = vadd.f32 %v4277_v33, %v5857_v3  ;;  %v3668_v38 = vmax.f32 %v3648_v31, 0.0 }
 0x69c   :  { %v3669_v39 = vmax.f32 %v3651_v11, 0.0 }
 0x69e   :  { %v3677_v12 = vpack.c.bf16 %v3669_v39, %v3668_v38 }
 0x6a0   :  { %4355 = vmatmul.mubr.bf16.gmra.mrb[140].mxu1 %v3677_v12 }
 0x743   :  { %v4344_v14 = vpop.f32.mrb[128].mxu1 }
 0x744   :  { %v3792_v15 = vadd.f32 %v4344_v14, %v4189_v13  ;;  %v3783_v16 = vpop.f32.mrb[129].mxu1 }
 0x745   :  { %v3784_v17 = vadd.f32 %v4189_v13, %v3783_v16  ;;  %v4345_v19 = vpop.f32.mrb[130].mxu1 }
 0x746   :  { %3848 = vst [vmem:[#allocation16 + $0x10] sm:$0xff] %v3792_v15  ;;  %v3795_v35 = vadd.f32 %v4345_v19, %v4189_v13  ;;  %v3786_v22 = vpop.f32.mrb[131].mxu1 }
 0x747   :  { %3846 = vst [vmem:[#allocation16] sm:$0xff] %v3784_v17  ;;  %v3787_v4 = vadd.f32 %v4189_v13, %v3786_v22 }
 0x748   :  { %3849 = vst [vmem:[#allocation16 + $0x18] sm:$0xff] %v3795_v35 }
 0x749   :  { %3847 = vst [vmem:[#allocation16 + $0x8] sm:$0xff] %v3787_v4 }
 0x753   :  { %v4348_v3 = vpop.f32.mrb[132].mxu1 }
 0x754   :  { %v3808_v25 = vadd.f32 %v4348_v3, %v4189_v13  ;;  %v3799_v2 = vpop.f32.mrb[133].mxu1 }
 0x755   :  { %v3800_v48 = vadd.f32 %v4189_v13, %v3799_v2  ;;  %v4349_v32 = vpop.f32.mrb[134].mxu1 }
 0x756   :  { %3852 = vst [vmem:[#allocation16 + $0x30] sm:$0xff] %v3808_v25  ;;  %v3811_v46 = vadd.f32 %v4349_v32, %v4189_v13  ;;  %v3802_v20 = vpop.f32.mrb[135].mxu1 }
 0x757   :  { %3850 = vst [vmem:[#allocation16 + $0x20] sm:$0xff] %v3800_v48  ;;  %v3803_v40 = vadd.f32 %v4189_v13, %v3802_v20 }
 0x758   :  { %3853 = vst [vmem:[#allocation16 + $0x38] sm:$0xff] %v3811_v46 }
 0x759   :  { %3851 = vst [vmem:[#allocation16 + $0x28] sm:$0xff] %v3803_v40 }
 0x763   :  { %v4352_v42 = vpop.f32.mrb[136].mxu1 }
 0x764   :  { %v3824_v8 = vadd.f32 %v4352_v42, %v4189_v13  ;;  %v3815_v44 = vpop.f32.mrb[137].mxu1 }
 0x765   :  { %v3816_v45 = vadd.f32 %v4189_v13, %v3815_v44  ;;  %v4353_v56 = vpop.f32.mrb[138].mxu1 }
 0x766   :  { %3856 = vst [vmem:[#allocation16 + $0x50] sm:$0xff] %v3824_v8  ;;  %v3827_v47 = vadd.f32 %v4353_v56, %v4189_v13  ;;  %v3818_v54 = vpop.f32.mrb[139].mxu1 }
 0x767   :  { %3854 = vst [vmem:[#allocation16 + $0x40] sm:$0xff] %v3816_v45  ;;  %v3819_v43 = vadd.f32 %v4189_v13, %v3818_v54 }
 0x768   :  { %3857 = vst [vmem:[#allocation16 + $0x58] sm:$0xff] %v3827_v47 }
 0x769   :  { %3855 = vst [vmem:[#allocation16 + $0x48] sm:$0xff] %v3819_v43 }
 0x773   :  { %v4356_v50 = vpop.f32.mrb[140].mxu1 }
 0x774   :  { %v3840_v41 = vadd.f32 %v4356_v50, %v4189_v13  ;;  %v3831_v23 = vpop.f32.mrb[141].mxu1 }
 0x775   :  { %v3832_v52 = vadd.f32 %v4189_v13, %v3831_v23  ;;  %v4357_v53 = vpop.f32.mrb[142].mxu1 }
 0x776   :  { %3860 = vst [vmem:[#allocation16 + $0x70] sm:$0xff] %v3840_v41  ;;  %v3843_v58 = vadd.f32 %v4357_v53, %v4189_v13  ;;  %v3834_v55 = vpop.f32.mrb[143].mxu1 }
 0x777   :  { %3858 = vst [vmem:[#allocation16 + $0x60] sm:$0xff] %v3832_v52  ;;  %v3835_v21 = vadd.f32 %v4189_v13, %v3834_v55 }
 0x778   :  { %3861 = vst [vmem:[#allocation16 + $0x78] sm:$0xff] %v3843_v58 }
 0x779   :  { %3859 = vst [vmem:[#allocation16 + $0x68] sm:$0xff] %v3835_v21 }
 0x77a   :  { %5201 = shalt.err (!%p5198_p12)
}
 0x77b   :  { %s5202_s27 = scalar_lea.hbm %s5908_s15, 2048 }
 0x77c   :  { %p5203_p13 = scmp.ne.s32.totalorder %s5908_s15, %s5202_s27  ;;  %p5206_p0 = scmp.lt.u32.totalorder %s5202_s27, %s5908_s15 }
 0x77e   :  { %p5208_p1 = pnand %p5206_p0, %p5203_p13 }
 0x780   :  { %5211 = shalt.err (!%p5208_p1)
}
 0x781   :  { %3873 = dma.vmem_to_hbm [thread:$0]  %s3868_s7, 2048, %s5908_s15, [#allocation4], %s5232_s21, %s5232_s21, %s5233_s29  }
 0x782   :  { %5222 = dma.done.wait [#allocation4], 2048  }
 0x783   :  { %5223 = vsyncadd [#allocation4], 4294965248 }
 0x784   :  { %3877 = vsyncpa [#allocation3], 1 }
 0x785   :  { %3878 = vsyncpa [#allocation6], 1 }
 0x786   :  { %3879 = vsyncpa [#allocation9], 1 }
 0x787   :  { %3880 = vsyncpa [#allocation12], 1 }
 0x788   :  { %3881 = vsyncpa [#allocation15], 1 }
 0x789   :  { %3882 = vsyncpa [#allocation4], 1 }

</bundles_post_ra>
